<compile_context>
chip_gen: v6e
topology: v6e:2x2x1
jax: 0.10.0
libtpu: 0.0.40
codegen_flags: <defaults>
</compile_context>

<pallas_src>
import functools

import jax
import jax.numpy as jnp
from jax.experimental import pallas as pl
from jax.experimental.pallas import tpu as pltpu


# ---------------------------------------------------------------------------
# helpers
# ---------------------------------------------------------------------------
def _row_tile(n, cap):
    """Largest row block <= cap that divides n and is a multiple of 8, else n."""
    if n <= cap:
        return n
    start = min(cap, n)
    start -= start % 8
    for b in range(start, 7, -8):
        if n % b == 0:
            return b
    # TODO(synk): pad + mask the tail instead of collapsing to one whole-n block.
    return n


def _erf_f32(x):
    # Abramowitz-Stegun 7.1.26 polynomial erf (|err| < 1.5e-7); exp goes to EUP.
    # TODO(synk): switch to a native erf lowering if Mosaic exposes one.
    p = 0.3275911
    a1, a2, a3, a4, a5 = 0.254829592, -0.284496736, 1.421413741, -1.453152027, 1.061405429
    ax = jnp.abs(x)
    t = 1.0 / (1.0 + p * ax)
    poly = ((((a5 * t + a4) * t + a3) * t + a2) * t + a1) * t
    y = 1.0 - poly * jnp.exp(-(ax * ax))
    return jnp.where(x >= 0.0, y, -y)


def _gelu_exact(x):
    return 0.5 * x * (1.0 + _erf_f32(x * 0.7071067811865476))


def _finalize_bn_stats(pstats, count, eps=1e-5):
    """[n_blocks, 2, D] partial (sum, sumsq) -> [2, D] (mu, 1/sqrt(var+eps))."""
    tot = jnp.sum(pstats, axis=0)
    mu = tot[0] / count
    var = jnp.maximum(tot[1] / count - mu * mu, 0.0)
    inv = jax.lax.rsqrt(var + eps)
    return jnp.stack([mu, inv], axis=0)


# ---------------------------------------------------------------------------
# Kernel 1: fused T2V position embedding + mean + residual add (row-tiled).
#   out[r,c] = x[r,c] + mean_f( [tau@w0+b0, sin(tau@w+b)][r,f] )
# ---------------------------------------------------------------------------
def _t2v_kernel(tau_ref, x_ref, w_ref, b_ref, o_ref):
    s = jnp.dot(tau_ref[...], w_ref[...], preferred_element_type=jnp.float32) + b_ref[...]
    col = jax.lax.broadcasted_iota(jnp.int32, s.shape, 1)
    v = jnp.where(col == 0, s, jnp.sin(s))      # column 0 = trend term v2, rest = sin(v1)
    o_ref[...] = x_ref[...] + jnp.mean(v, axis=-1, keepdims=True)


def t2v_transformer_input(tau, batch_x, w_cat, b_cat, block_rows=1024):
    B, S, d_mark = tau.shape
    c_in = batch_x.shape[-1]
    F = w_cat.shape[1]
    M = B * S
    bm = _row_tile(M, block_rows)
    out = pl.pallas_call(
        _t2v_kernel,
        grid=(M // bm,),
        out_shape=jax.ShapeDtypeStruct((M, c_in), jnp.float32),
        in_specs=[
            pl.BlockSpec((bm, d_mark), lambda i: (i, 0)),
            pl.BlockSpec((bm, c_in), lambda i: (i, 0)),
            pl.BlockSpec((d_mark, F), lambda i: (0, 0)),
            pl.BlockSpec((1, F), lambda i: (0, 0)),
        ],
        out_specs=pl.BlockSpec((bm, c_in), lambda i: (i, 0)),
        compiler_params=pltpu.CompilerParams(dimension_semantics=("parallel",)),
    )(tau.reshape(M, d_mark), batch_x.reshape(M, c_in), w_cat, b_cat.reshape(1, F))
    return out.reshape(B, S, c_in)


# ---------------------------------------------------------------------------
# Kernel 2: patch extraction + patch embedding + positional embedding, fused.
#   For each series row: u[p,:] = z[p*stride : p*stride+patch_len] @ W_P + b + pos[p]
#   (z already RevIN-normalized and replication-padded).  No xpat / pos_tiled
#   materialization in HBM.
# ---------------------------------------------------------------------------
def _patch_embed_kernel(z_ref, wp_ref, b_ref, pos_ref, u_ref, *,
                        patch_num, patch_len, stride):
    z = z_ref[...]                                   # [gt, L_pad] f32
    w = wp_ref[...]
    b = b_ref[...]
    for p in range(patch_num):                       # static unroll
        xp = z[:, p * stride: p * stride + patch_len]          # [gt, patch_len]
        u_ref[:, p, :] = (jnp.dot(xp, w, preferred_element_type=jnp.float32)
                          + b + pos_ref[p:p + 1, :])


def patch_embed(z2d, wp, b, w_pos, patch_num, patch_len, stride, d_model,
                block_series=256):
    G, L = z2d.shape
    gt = _row_tile(G, block_series)
    kernel = functools.partial(_patch_embed_kernel, patch_num=patch_num,
                               patch_len=patch_len, stride=stride)
    return pl.pallas_call(
        kernel,
        grid=(G // gt,),
        out_shape=jax.ShapeDtypeStruct((G, patch_num, d_model), jnp.float32),
        in_specs=[
            pl.BlockSpec((gt, L), lambda i: (i, 0)),
            pl.BlockSpec((patch_len, d_model), lambda i: (0, 0)),
            pl.BlockSpec((1, d_model), lambda i: (0, 0)),
            pl.BlockSpec((patch_num, d_model), lambda i: (0, 0)),
        ],
        out_specs=pl.BlockSpec((gt, patch_num, d_model), lambda i: (i, 0, 0)),
        compiler_params=pltpu.CompilerParams(dimension_semantics=("parallel",)),
    )(z2d, wp, b.reshape(1, -1), w_pos)


# ---------------------------------------------------------------------------
# Kernel 3: per-series multi-head res-attention (grid over B*nvars).
#   Applies the pending BatchNorm of the previous layer (identity for layer 0),
#   fused QKV projection, per-head attention with res-attention score carry,
#   single fused output projection, residual add, and per-block BN partials.
# ---------------------------------------------------------------------------
def _attn_kernel(src_ref, stats_ref, prev_ref, wqkv_ref, bqkv_ref, wo_ref, bo_ref,
                 src1_ref, scores_ref, pstats_ref, *, n_heads, d_k, scale):
    D = n_heads * d_k
    x = src_ref[0]                                   # [P, D] f32
    mu = stats_ref[0:1, :]
    inv = stats_ref[1:2, :]
    xn = (x - mu) * inv                              # pending BatchNorm from previous layer

    mmd = wqkv_ref.dtype                             # matmul operand dtype (bf16/f32)
    qkv = jnp.dot(xn.astype(mmd), wqkv_ref[...],
                  preferred_element_type=jnp.float32) + bqkv_ref[...]   # [P, 3D] f32

    heads = []
    for h in range(n_heads):                         # static unroll
        q = qkv[:, h * d_k:(h + 1) * d_k]
        k = qkv[:, D + h * d_k:D + (h + 1) * d_k]
        v = qkv[:, 2 * D + h * d_k:2 * D + (h + 1) * d_k]
        # contract last dims -> K consumed untransposed by the MXU
        s = jax.lax.dot_general(q.astype(mmd), k.astype(mmd), (((1,), (1,)), ((), ())),
                                preferred_element_type=jnp.float32) * scale
        s = s + prev_ref[h]                          # res-attention carry
        scores_ref[h] = s
        m = jnp.max(s, axis=-1, keepdims=True)
        e = jnp.exp(s - m)
        p = e * pl.reciprocal(jnp.sum(e, axis=-1, keepdims=True), approx=True)
        heads.append(jnp.dot(p.astype(mmd), v.astype(mmd),
                             preferred_element_type=jnp.float32))        # [P, d_k]
    # one D-deep output projection instead of H shallow d_k-deep matmuls
    o = jnp.concatenate(heads, axis=1)               # [P, D]
    attn = jnp.dot(o.astype(mmd), wo_ref[...], preferred_element_type=jnp.float32) + bo_ref[...]

    src1 = xn + attn                                 # residual (dropout == 0)
    src1_ref[0] = src1
    s1 = jnp.sum(src1, axis=0, keepdims=True)
    s2 = jnp.sum(src1 * src1, axis=0, keepdims=True)
    pstats_ref[0] = jnp.concatenate([s1, s2], axis=0)


def attention_layer(src3, stats_in, prev, lp, n_heads, d_k, mm_dtype):
    G, P, D = src3.shape
    kernel = functools.partial(_attn_kernel, n_heads=n_heads, d_k=d_k,
                               scale=d_k ** -0.5)
    return pl.pallas_call(
        kernel,
        grid=(G,),
        out_shape=(
            jax.ShapeDtypeStruct((G, P, D), jnp.float32),
            jax.ShapeDtypeStruct((G * n_heads, P, P), jnp.float32),
            jax.ShapeDtypeStruct((G, 2, D), jnp.float32),
        ),
        in_specs=[
            pl.BlockSpec((1, P, D), lambda g: (g, 0, 0)),
            pl.BlockSpec((2, D), lambda g: (0, 0)),
            pl.BlockSpec((n_heads, P, P), lambda g: (g, 0, 0)),
            pl.BlockSpec((D, 3 * D), lambda g: (0, 0)),
            pl.BlockSpec((1, 3 * D), lambda g: (0, 0)),
            pl.BlockSpec((D, D), lambda g: (0, 0)),
            pl.BlockSpec((1, D), lambda g: (0, 0)),
        ],
        out_specs=(
            pl.BlockSpec((1, P, D), lambda g: (g, 0, 0)),
            pl.BlockSpec((n_heads, P, P), lambda g: (g, 0, 0)),
            pl.BlockSpec((1, 2, D), lambda g: (g, 0, 0)),
        ),
        compiler_params=pltpu.CompilerParams(dimension_semantics=("parallel",)),
    )(src3, stats_in, prev,
      lp["Wqkv_w"].astype(mm_dtype), lp["Wqkv_b"].reshape(1, -1),
      lp["Wo_w"].astype(mm_dtype), lp["Wo_b"].reshape(1, -1))


# ---------------------------------------------------------------------------
# Kernel 4: apply BatchNorm1 + feed-forward (FF1 -> GELU -> FF2) + residual,
#   row-tiled over all N = B*nvars*patch_num tokens, emitting BN2 partials.
# ---------------------------------------------------------------------------
def _ffn_kernel(src1_ref, stats_ref, w1_ref, b1_ref, w2_ref, b2_ref,
                src2_ref, pstats_ref):
    x = src1_ref[...]                                # [bm, D] f32
    mu = stats_ref[0:1, :]
    inv = stats_ref[1:2, :]
    xn = (x - mu) * inv                              # BatchNorm after attention

    mmd = w1_ref.dtype
    h = jnp.dot(xn.astype(mmd), w1_ref[...], preferred_element_type=jnp.float32) + b1_ref[...]
    h = _gelu_exact(h)                               # exact-erf GELU (PyTorch default)
    ff = jnp.dot(h.astype(mmd), w2_ref[...], preferred_element_type=jnp.float32) + b2_ref[...]

    src2 = xn + ff                                   # residual (dropout == 0)
    src2_ref[...] = src2
    s1 = jnp.sum(src2, axis=0, keepdims=True)
    s2 = jnp.sum(src2 * src2, axis=0, keepdims=True)
    pstats_ref[0] = jnp.concatenate([s1, s2], axis=0)


def ffn_layer(src1, stats1, lp, mm_dtype, block_rows=1024):
    N, D = src1.shape
    d_ff = lp["ff1_w"].shape[1]
    bm = _row_tile(N, block_rows)
    nt = N // bm
    return pl.pallas_call(
        _ffn_kernel,
        grid=(nt,),
        out_shape=(jax.ShapeDtypeStruct((N, D), jnp.float32),
                   jax.ShapeDtypeStruct((nt, 2, D), jnp.float32)),
        in_specs=[
            pl.BlockSpec((bm, D), lambda i: (i, 0)),
            pl.BlockSpec((2, D), lambda i: (0, 0)),
            pl.BlockSpec((D, d_ff), lambda i: (0, 0)),
            pl.BlockSpec((1, d_ff), lambda i: (0, 0)),
            pl.BlockSpec((d_ff, D), lambda i: (0, 0)),
            pl.BlockSpec((1, D), lambda i: (0, 0)),
        ],
        out_specs=(pl.BlockSpec((bm, D), lambda i: (i, 0)),
                   pl.BlockSpec((1, 2, D), lambda i: (i, 0, 0))),
        compiler_params=pltpu.CompilerParams(dimension_semantics=("parallel",)),
    )(src1, stats1,
      lp["ff1_w"].astype(mm_dtype), lp["ff1_b"].reshape(1, -1),
      lp["ff2_w"].astype(mm_dtype), lp["ff2_b"].reshape(1, -1))


# ---------------------------------------------------------------------------
# Kernel 5: flatten head with the last BatchNorm folded in as per-column
#   scale/shift, plus fused RevIN denorm:  y = ((x*cs+ct) @ W + b) * stdev + mean
# ---------------------------------------------------------------------------
def _head_kernel(x_ref, cs_ref, ct_ref, w_ref, b_ref, scale_ref, shift_ref, o_ref):
    xn = x_ref[...] * cs_ref[...] + ct_ref[...]
    mmd = w_ref.dtype
    y = jnp.dot(xn.astype(mmd), w_ref[...], preferred_element_type=jnp.float32) + b_ref[...]
    o_ref[...] = y * scale_ref[...] + shift_ref[...]


def head_denorm(x2d, col_scale, col_shift, w, b, scale, shift, mm_dtype, block_rows=512):
    G, K = x2d.shape
    N = w.shape[1]
    bg = _row_tile(G, block_rows)
    return pl.pallas_call(
        _head_kernel,
        grid=(G // bg,),
        out_shape=jax.ShapeDtypeStruct((G, N), jnp.float32),
        in_specs=[
            pl.BlockSpec((bg, K), lambda i: (i, 0)),
            pl.BlockSpec((1, K), lambda i: (0, 0)),
            pl.BlockSpec((1, K), lambda i: (0, 0)),
            pl.BlockSpec((K, N), lambda i: (0, 0)),
            pl.BlockSpec((1, N), lambda i: (0, 0)),
            pl.BlockSpec((bg, 1), lambda i: (i, 0)),
            pl.BlockSpec((bg, 1), lambda i: (i, 0)),
        ],
        out_specs=pl.BlockSpec((bg, N), lambda i: (i, 0)),
        compiler_params=pltpu.CompilerParams(dimension_semantics=("parallel",)),
    )(x2d, col_scale, col_shift, w.astype(mm_dtype), b.reshape(1, -1), scale, shift)


# ---------------------------------------------------------------------------
# Model glue (cheap shape plumbing + RevIN stats + tiny BN-stat reductions)
# ---------------------------------------------------------------------------
def patchtst_backbone(z, p, cfg, mm_dtype):
    # z: [B, nvars, seq_len]
    B, nv, L = z.shape
    patch_len, stride = cfg["patch_len"], cfg["stride"]
    P, D = cfg["patch_num"], cfg["d_model"]
    H, pred_len = cfg["n_heads"], cfg["pred_len"]
    d_k = D // H
    G = B * nv

    # RevIN 'norm' (affine=False, subtract_last=False); stats over the time axis
    mean = jnp.mean(z, axis=-1, keepdims=True)
    stdev = jnp.sqrt(jnp.var(z, axis=-1, keepdims=True) + 1e-5)
    zn = (z - mean) / stdev

    # padding_patch == 'end': ReplicationPad1d((0, stride)); unfold happens in-kernel
    zp = jnp.concatenate([zn, jnp.repeat(zn[..., -1:], stride, axis=-1)], axis=-1)
    u = patch_embed(zp.reshape(G, L + stride), p["W_P_w"], p["W_P_b"], p["W_pos"],
                    P, patch_len, stride, D)                         # [G, P, D]

    src = u
    scores = jnp.zeros((G * H, P, P), jnp.float32)                   # res-attention carry
    # "pending" BatchNorm applied at the start of the next kernel; identity for layer 0
    pending = jnp.stack([jnp.zeros((D,), jnp.float32), jnp.ones((D,), jnp.float32)])

    # TODO(synk): eval-mode running statistics for BatchNorm are not represented;
    # batch (training-mode) statistics are used, as in the previous version.
    for lp in p["layers"]:
        src1, scores, pstats1 = attention_layer(src, pending, scores, lp, H, d_k, mm_dtype)
        stats1 = _finalize_bn_stats(pstats1, G * P)                  # tiny [*,2,D] reduce
        src2, pstats2 = ffn_layer(src1.reshape(G * P, D), stats1, lp, mm_dtype)
        pending = _finalize_bn_stats(pstats2, G * P)
        src = src2.reshape(G, P, D)

    # Fold the final pending BatchNorm into per-column scale/shift of the head.
    # src flattens patch-major (row = p*D + d); head_w is stored in that layout
    # (== torch weight with rows permuted from d*P + p), so no transpose is needed.
    mu2, inv2 = pending[0], pending[1]
    col_scale = jnp.tile(inv2, (P,)).reshape(1, P * D)
    col_shift = jnp.tile(-mu2 * inv2, (P,)).reshape(1, P * D)

    y = head_denorm(src.reshape(G, P * D), col_scale, col_shift,
                    p["head_w"], p["head_b"],
                    stdev.reshape(G, 1), mean.reshape(G, 1), mm_dtype)
    return y.reshape(B, nv, pred_len)


def t2v_patchtst_forward(batch_x, batch_x_mark, batch_y, batch_y_mark, mode, p, cfg):
    del batch_y, mode
    seq_len, pred_len = cfg["seq_len"], cfg["pred_len"]
    mm_dtype = cfg.get("matmul_dtype", jnp.float32)
    # T2V_input = cat(batch_x_mark, batch_y_mark[:, -pred_len:, :], dim=-2); only
    # the first seq_len rows reach the output (sliced before the mean).
    t2v_input = jnp.concatenate([batch_x_mark, batch_y_mark[:, -pred_len:, :]], axis=-2)
    tau = t2v_input[:, :seq_len, :]
    transformer_input = t2v_transformer_input(tau, batch_x, p["t2v_w"], p["t2v_b"])
    x = jnp.transpose(transformer_input, (0, 2, 1))   # [B, c_in, seq_len]
    x = patchtst_backbone(x, p, cfg, mm_dtype)        # [B, c_in, pred_len]
    return jnp.transpose(x, (0, 2, 1))                # [B, pred_len, c_in]


# ---------------------------------------------------------------------------
# Deterministic synthetic parameter init (shapes follow the torch __init__;
# QKV fused as [d_model, 3*d_model]; head weight stored patch-major).
# ---------------------------------------------------------------------------
def init_params(key, cfg):
    d_mark, F = cfg["d_mark"], cfg["T2V_outmodel"]
    d_model, d_ff = cfg["d_model"], cfg["d_ff"]
    patch_len, pred_len, patch_num = cfg["patch_len"], cfg["pred_len"], cfg["patch_num"]
    keys = iter(jax.random.split(key, 128))
    u = lambda shape, a=1.0: jax.random.uniform(next(keys), shape, jnp.float32, -a, a)
    n = lambda shape, s=0.1: s * jax.random.normal(next(keys), shape, jnp.float32)

    p = {}
    # SineActivation params (uniform(-1, 1) as in torch); trend column first.
    w0, b0 = u((d_mark, 1)), u((1,))
    w, b = u((d_mark, F - 1)), u((F - 1,))
    p["t2v_w"] = jnp.concatenate([w0, w], axis=1)      # [d_mark, F]
    p["t2v_b"] = jnp.concatenate([b0, b], axis=0)      # [F]
    # PatchTST backbone
    p["W_P_w"], p["W_P_b"] = n((patch_len, d_model)), n((d_model,))
    p["W_pos"] = u((patch_num, d_model), 0.02)         # pe='zeros', learn_pe=True
    layers = []
    for _ in range(cfg["e_layers"]):
        layers.append(dict(
            Wqkv_w=n((d_model, 3 * d_model)), Wqkv_b=n((3 * d_model,)),
            Wo_w=n((d_model, d_model)), Wo_b=n((d_model,)),
            ff1_w=n((d_model, d_ff)), ff1_b=n((d_ff,)),
            ff2_w=n((d_ff, d_model)), ff2_b=n((d_model,)),
        ))
    p["layers"] = layers
    # head weight rows indexed patch-major (p*d_model + d); equivalent to the torch
    # [d_model*patch_num, pred_len] weight with rows permuted (random init anyway).
    p["head_w"], p["head_b"] = n((patch_num * d_model, pred_len)), n((pred_len,))
    return p


if __name__ == "__main__":
    cfg = dict(
        d_feature=4, seq_len=16, pred_len=8, e_layers=2, n_heads=2,
        d_model=16, d_ff=32, dropout=0.0, patch_len=4, stride=4,
        T2V_outmodel=8, d_mark=5,
        # bf16 matmul operands with f32 accumulation (softmax/BN/GELU stay f32);
        # set to jnp.float32 for full-f32 parity with a PyTorch f32 forward.
        matmul_dtype=jnp.bfloat16,
    )
    # patch_num = (seq_len - patch_len)//stride + 1, +1 for padding_patch='end'
    cfg["patch_num"] = (cfg["seq_len"] - cfg["patch_len"]) // cfg["stride"] + 1 + 1

    root = jax.random.PRNGKey(0)
    kx, kxm, ky, kym, kp = jax.random.split(root, 5)
    B, label_len = 2, 4
    batch_x = jax.random.normal(kx, (B, cfg["seq_len"], cfg["d_feature"]), jnp.float32)
    batch_x_mark = jax.random.normal(kxm, (B, cfg["seq_len"], cfg["d_mark"]), jnp.float32)
    batch_y = jax.random.normal(
        ky, (B, label_len + cfg["pred_len"], cfg["d_feature"]), jnp.float32)
    batch_y_mark = jax.random.normal(
        kym, (B, label_len + cfg["pred_len"], cfg["d_mark"]), jnp.float32)
    params = init_params(kp, cfg)

    fwd = jax.jit(lambda bx, bxm, by, bym, prm:
                  t2v_patchtst_forward(bx, bxm, by, bym, "test", prm, cfg))
    out = jax.block_until_ready(fwd(batch_x, batch_x_mark, batch_y, batch_y_mark, params))
    assert out.shape == (B, cfg["pred_len"], cfg["d_feature"])
    assert bool(jnp.all(jnp.isfinite(out)))
    print("KERNEL_OK")
</pallas_src>

<mosaic_0001>
module attributes {stable_mosaic.version = 11 : i64} {
  func.func @_t2v_kernel(%arg0: i32, %arg1: memref<32x5xf32, #tpu.memory_space<vmem>>, %arg2: memref<32x4xf32, #tpu.memory_space<vmem>>, %arg3: memref<5x8xf32, #tpu.memory_space<vmem>>, %arg4: memref<1x8xf32, #tpu.memory_space<vmem>>, %arg5: memref<32x4xf32, #tpu.memory_space<vmem>>) attributes {dimension_semantics = [#tpu.dimension_semantics<parallel>], iteration_bounds = array<i64: 1>, scalar_prefetch = 0 : i64, scratch_operands = 0 : i64, tpu.core_type = #tpu.core_type<tc>, window_params = [{transform_indices = @transform_0, window_bounds = array<i64: 32, 5>}, {transform_indices = @transform_1, window_bounds = array<i64: 32, 4>}, {pipeline_mode = #tpu.pipeline_mode<synchronous>, transform_indices = @transform_2, window_bounds = array<i64: 5, 8>}, {pipeline_mode = #tpu.pipeline_mode<synchronous>, transform_indices = @transform_3, window_bounds = array<i64: 1, 8>}, {transform_indices = @transform_4, window_bounds = array<i64: 32, 4>}]} {
    %c0 = arith.constant 0 : index
    %c0_0 = arith.constant 0 : index
    %0 = vector.load %arg1[%c0, %c0_0] : memref<32x5xf32, #tpu.memory_space<vmem>>, vector<32x5xf32>
    %c0_1 = arith.constant 0 : index
    %c0_2 = arith.constant 0 : index
    %1 = vector.load %arg3[%c0_1, %c0_2] : memref<5x8xf32, #tpu.memory_space<vmem>>, vector<5x8xf32>
    %cst = arith.constant dense<0.000000e+00> : vector<32x8xf32>
    %2 = tpu.matmul %0, %1, %cst {dimension_numbers = #tpu.dot_dimension_numbers<[1], [0], [0], [1], [0, 0, 1, 1], [], []>} : vector<32x5xf32>, vector<5x8xf32>, vector<32x8xf32> -> vector<32x8xf32>
    %c0_3 = arith.constant 0 : index
    %c0_4 = arith.constant 0 : index
    %3 = vector.load %arg4[%c0_3, %c0_4] : memref<1x8xf32, #tpu.memory_space<vmem>>, vector<1x8xf32>
    %4 = vector.broadcast %3 : vector<1x8xf32> to vector<32x8xf32>
    %5 = arith.addf %2, %4 : vector<32x8xf32>
    %6 = tpu.iota {dimensions = array<i32: 1>} : vector<32x8xi32>
    %c0_i32 = arith.constant 0 : i32
    %7 = vector.broadcast %c0_i32 : i32 to vector<32x8xi32>
    %8 = arith.cmpi eq, %6, %7 : vector<32x8xi32>
    %9 = math.sin %5 : vector<32x8xf32>
    %10 = arith.select %8, %5, %9 : vector<32x8xi1>, vector<32x8xf32>
    %c0_5 = arith.constant 0 : index
    %c0_6 = arith.constant 0 : index
    %11 = vector.load %arg2[%c0_5, %c0_6] : memref<32x4xf32, #tpu.memory_space<vmem>>, vector<32x4xf32>
    %cst_7 = arith.constant dense<0.000000e+00> : vector<32xf32>
    %12 = vector.multi_reduction <add>, %10, %cst_7 [1] : vector<32x8xf32> to vector<32xf32>
    %13 = vector.shape_cast %12 : vector<32xf32> to vector<32x1xf32>
    %cst_8 = arith.constant 8.000000e+00 : f32
    %14 = vector.broadcast %cst_8 : f32 to vector<32x1xf32>
    %15 = arith.divf %13, %14 : vector<32x1xf32>
    %16 = vector.broadcast %15 : vector<32x1xf32> to vector<32x4xf32>
    %17 = arith.addf %11, %16 : vector<32x4xf32>
    %c0_9 = arith.constant 0 : index
    %c0_10 = arith.constant 0 : index
    %18 = vector.load %arg5[%c0_9, %c0_10] : memref<32x4xf32, #tpu.memory_space<vmem>>, vector<32x4xf32>
    tpu.vector_store %arg5[%c0_9, %c0_10], %17 {strides = array<i32>} : memref<32x4xf32, #tpu.memory_space<vmem>>, vector<32x4xf32>,
    return
  }
  func.func @transform_0(%arg0: i32) -> (i32, i32) {
    %c0_i32 = arith.constant 0 : i32
    %c0_i32_0 = arith.constant 0 : i32
    return %arg0, %c0_i32 : i32, i32
  }
  func.func @transform_1(%arg0: i32) -> (i32, i32) {
    %c0_i32 = arith.constant 0 : i32
    %c0_i32_0 = arith.constant 0 : i32
    return %arg0, %c0_i32 : i32, i32
  }
  func.func @transform_2(%arg0: i32) -> (i32, i32) {
    %c0_i32 = arith.constant 0 : i32
    %c0_i32_0 = arith.constant 0 : i32
    %c0_i32_1 = arith.constant 0 : i32
    return %c0_i32, %c0_i32_0 : i32, i32
  }
  func.func @transform_3(%arg0: i32) -> (i32, i32) {
    %c0_i32 = arith.constant 0 : i32
    %c0_i32_0 = arith.constant 0 : i32
    %c0_i32_1 = arith.constant 0 : i32
    return %c0_i32, %c0_i32_0 : i32, i32
  }
  func.func @transform_4(%arg0: i32) -> (i32, i32) {
    %c0_i32 = arith.constant 0 : i32
    %c0_i32_0 = arith.constant 0 : i32
    return %arg0, %c0_i32 : i32, i32
  }
}

module attributes {stable_mosaic.version = 11 : i64} {
  func.func @_patch_embed_kernel(%arg0: i32, %arg1: memref<8x20xf32, #tpu.memory_space<vmem>>, %arg2: memref<4x16xf32, #tpu.memory_space<vmem>>, %arg3: memref<1x16xf32, #tpu.memory_space<vmem>>, %arg4: memref<5x16xf32, #tpu.memory_space<vmem>>, %arg5: memref<8x5x16xf32, #tpu.memory_space<vmem>>) attributes {dimension_semantics = [#tpu.dimension_semantics<parallel>], iteration_bounds = array<i64: 1>, scalar_prefetch = 0 : i64, scratch_operands = 0 : i64, tpu.core_type = #tpu.core_type<tc>, window_params = [{transform_indices = @transform_0, window_bounds = array<i64: 8, 20>}, {pipeline_mode = #tpu.pipeline_mode<synchronous>, transform_indices = @transform_1, window_bounds = array<i64: 4, 16>}, {pipeline_mode = #tpu.pipeline_mode<synchronous>, transform_indices = @transform_2, window_bounds = array<i64: 1, 16>}, {pipeline_mode = #tpu.pipeline_mode<synchronous>, transform_indices = @transform_3, window_bounds = array<i64: 5, 16>}, {transform_indices = @transform_4, window_bounds = array<i64: 8, 5, 16>}]} {
    %c0 = arith.constant 0 : index
    %c0_0 = arith.constant 0 : index
    %0 = vector.load %arg1[%c0, %c0_0] : memref<8x20xf32, #tpu.memory_space<vmem>>, vector<8x20xf32>
    %c0_1 = arith.constant 0 : index
    %c0_2 = arith.constant 0 : index
    %1 = vector.load %arg2[%c0_1, %c0_2] : memref<4x16xf32, #tpu.memory_space<vmem>>, vector<4x16xf32>
    %c0_3 = arith.constant 0 : index
    %c0_4 = arith.constant 0 : index
    %2 = vector.load %arg3[%c0_3, %c0_4] : memref<1x16xf32, #tpu.memory_space<vmem>>, vector<1x16xf32>
    %3 = vector.extract_strided_slice %0 {offsets = [0, 0], sizes = [8, 4], strides = [1, 1]} : vector<8x20xf32> to vector<8x4xf32>
    %cst = arith.constant dense<0.000000e+00> : vector<8x16xf32>
    %4 = tpu.matmul %3, %1, %cst {dimension_numbers = #tpu.dot_dimension_numbers<[1], [0], [0], [1], [0, 0, 1, 1], [], []>} : vector<8x4xf32>, vector<4x16xf32>, vector<8x16xf32> -> vector<8x16xf32>
    %5 = vector.broadcast %2 : vector<1x16xf32> to vector<8x16xf32>
    %6 = arith.addf %4, %5 : vector<8x16xf32>
    %c0_5 = arith.constant 0 : index
    %c0_6 = arith.constant 0 : index
    %7 = vector.load %arg4[%c0_5, %c0_6] : memref<5x16xf32, #tpu.memory_space<vmem>>, vector<1x16xf32>
    %8 = vector.broadcast %7 : vector<1x16xf32> to vector<8x16xf32>
    %9 = arith.addf %6, %8 : vector<8x16xf32>
    %c0_7 = arith.constant 0 : index
    %c0_8 = arith.constant 0 : index
    %c0_9 = arith.constant 0 : index
    %10 = vector.load %arg5[%c0_7, %c0_8, %c0_9] : memref<8x5x16xf32, #tpu.memory_space<vmem>>, vector<8x1x16xf32>
    %11 = vector.shape_cast %10 : vector<8x1x16xf32> to vector<8x16xf32>
    %12 = vector.shape_cast %9 : vector<8x16xf32> to vector<8x1x16xf32>
    tpu.vector_store %arg5[%c0_7, %c0_8, %c0_9], %12 {strides = array<i32>} : memref<8x5x16xf32, #tpu.memory_space<vmem>>, vector<8x1x16xf32>,
    %13 = vector.extract_strided_slice %0 {offsets = [0, 4], sizes = [8, 4], strides = [1, 1]} : vector<8x20xf32> to vector<8x4xf32>
    %cst_10 = arith.constant dense<0.000000e+00> : vector<8x16xf32>
    %14 = tpu.matmul %13, %1, %cst_10 {dimension_numbers = #tpu.dot_dimension_numbers<[1], [0], [0], [1], [0, 0, 1, 1], [], []>} : vector<8x4xf32>, vector<4x16xf32>, vector<8x16xf32> -> vector<8x16xf32>
    %15 = vector.broadcast %2 : vector<1x16xf32> to vector<8x16xf32>
    %16 = arith.addf %14, %15 : vector<8x16xf32>
    %c1 = arith.constant 1 : index
    %c0_11 = arith.constant 0 : index
    %17 = vector.load %arg4[%c1, %c0_11] : memref<5x16xf32, #tpu.memory_space<vmem>>, vector<1x16xf32>
    %18 = vector.broadcast %17 : vector<1x16xf32> to vector<8x16xf32>
    %19 = arith.addf %16, %18 : vector<8x16xf32>
    %c0_12 = arith.constant 0 : index
    %c1_13 = arith.constant 1 : index
    %c0_14 = arith.constant 0 : index
    %20 = vector.load %arg5[%c0_12, %c1_13, %c0_14] : memref<8x5x16xf32, #tpu.memory_space<vmem>>, vector<8x1x16xf32>
    %21 = vector.shape_cast %20 : vector<8x1x16xf32> to vector<8x16xf32>
    %22 = vector.shape_cast %19 : vector<8x16xf32> to vector<8x1x16xf32>
    tpu.vector_store %arg5[%c0_12, %c1_13, %c0_14], %22 {strides = array<i32>} : memref<8x5x16xf32, #tpu.memory_space<vmem>>, vector<8x1x16xf32>,
    %23 = vector.extract_strided_slice %0 {offsets = [0, 8], sizes = [8, 4], strides = [1, 1]} : vector<8x20xf32> to vector<8x4xf32>
    %cst_15 = arith.constant dense<0.000000e+00> : vector<8x16xf32>
    %24 = tpu.matmul %23, %1, %cst_15 {dimension_numbers = #tpu.dot_dimension_numbers<[1], [0], [0], [1], [0, 0, 1, 1], [], []>} : vector<8x4xf32>, vector<4x16xf32>, vector<8x16xf32> -> vector<8x16xf32>
    %25 = vector.broadcast %2 : vector<1x16xf32> to vector<8x16xf32>
    %26 = arith.addf %24, %25 : vector<8x16xf32>
    %c2 = arith.constant 2 : index
    %c0_16 = arith.constant 0 : index
    %27 = vector.load %arg4[%c2, %c0_16] : memref<5x16xf32, #tpu.memory_space<vmem>>, vector<1x16xf32>
    %28 = vector.broadcast %27 : vector<1x16xf32> to vector<8x16xf32>
    %29 = arith.addf %26, %28 : vector<8x16xf32>
    %c0_17 = arith.constant 0 : index
    %c2_18 = arith.constant 2 : index
    %c0_19 = arith.constant 0 : index
    %30 = vector.load %arg5[%c0_17, %c2_18, %c0_19] : memref<8x5x16xf32, #tpu.memory_space<vmem>>, vector<8x1x16xf32>
    %31 = vector.shape_cast %30 : vector<8x1x16xf32> to vector<8x16xf32>
    %32 = vector.shape_cast %29 : vector<8x16xf32> to vector<8x1x16xf32>
    tpu.vector_store %arg5[%c0_17, %c2_18, %c0_19], %32 {strides = array<i32>} : memref<8x5x16xf32, #tpu.memory_space<vmem>>, vector<8x1x16xf32>,
    %33 = vector.extract_strided_slice %0 {offsets = [0, 12], sizes = [8, 4], strides = [1, 1]} : vector<8x20xf32> to vector<8x4xf32>
    %cst_20 = arith.constant dense<0.000000e+00> : vector<8x16xf32>
    %34 = tpu.matmul %33, %1, %cst_20 {dimension_numbers = #tpu.dot_dimension_numbers<[1], [0], [0], [1], [0, 0, 1, 1], [], []>} : vector<8x4xf32>, vector<4x16xf32>, vector<8x16xf32> -> vector<8x16xf32>
    %35 = vector.broadcast %2 : vector<1x16xf32> to vector<8x16xf32>
    %36 = arith.addf %34, %35 : vector<8x16xf32>
    %c3 = arith.constant 3 : index
    %c0_21 = arith.constant 0 : index
    %37 = vector.load %arg4[%c3, %c0_21] : memref<5x16xf32, #tpu.memory_space<vmem>>, vector<1x16xf32>
    %38 = vector.broadcast %37 : vector<1x16xf32> to vector<8x16xf32>
    %39 = arith.addf %36, %38 : vector<8x16xf32>
    %c0_22 = arith.constant 0 : index
    %c3_23 = arith.constant 3 : index
    %c0_24 = arith.constant 0 : index
    %40 = vector.load %arg5[%c0_22, %c3_23, %c0_24] : memref<8x5x16xf32, #tpu.memory_space<vmem>>, vector<8x1x16xf32>
    %41 = vector.shape_cast %40 : vector<8x1x16xf32> to vector<8x16xf32>
    %42 = vector.shape_cast %39 : vector<8x16xf32> to vector<8x1x16xf32>
    tpu.vector_store %arg5[%c0_22, %c3_23, %c0_24], %42 {strides = array<i32>} : memref<8x5x16xf32, #tpu.memory_space<vmem>>, vector<8x1x16xf32>,
    %43 = vector.extract_strided_slice %0 {offsets = [0, 16], sizes = [8, 4], strides = [1, 1]} : vector<8x20xf32> to vector<8x4xf32>
    %cst_25 = arith.constant dense<0.000000e+00> : vector<8x16xf32>
    %44 = tpu.matmul %43, %1, %cst_25 {dimension_numbers = #tpu.dot_dimension_numbers<[1], [0], [0], [1], [0, 0, 1, 1], [], []>} : vector<8x4xf32>, vector<4x16xf32>, vector<8x16xf32> -> vector<8x16xf32>
    %45 = vector.broadcast %2 : vector<1x16xf32> to vector<8x16xf32>
    %46 = arith.addf %44, %45 : vector<8x16xf32>
    %c4 = arith.constant 4 : index
    %c0_26 = arith.constant 0 : index
    %47 = vector.load %arg4[%c4, %c0_26] : memref<5x16xf32, #tpu.memory_space<vmem>>, vector<1x16xf32>
    %48 = vector.broadcast %47 : vector<1x16xf32> to vector<8x16xf32>
    %49 = arith.addf %46, %48 : vector<8x16xf32>
    %c0_27 = arith.constant 0 : index
    %c4_28 = arith.constant 4 : index
    %c0_29 = arith.constant 0 : index
    %50 = vector.load %arg5[%c0_27, %c4_28, %c0_29] : memref<8x5x16xf32, #tpu.memory_space<vmem>>, vector<8x1x16xf32>
    %51 = vector.shape_cast %50 : vector<8x1x16xf32> to vector<8x16xf32>
    %52 = vector.shape_cast %49 : vector<8x16xf32> to vector<8x1x16xf32>
    tpu.vector_store %arg5[%c0_27, %c4_28, %c0_29], %52 {strides = array<i32>} : memref<8x5x16xf32, #tpu.memory_space<vmem>>, vector<8x1x16xf32>,
    return
  }
  func.func @transform_0(%arg0: i32) -> (i32, i32) {
    %c0_i32 = arith.constant 0 : i32
    %c0_i32_0 = arith.constant 0 : i32
    return %arg0, %c0_i32 : i32, i32
  }
  func.func @transform_1(%arg0: i32) -> (i32, i32) {
    %c0_i32 = arith.constant 0 : i32
    %c0_i32_0 = arith.constant 0 : i32
    %c0_i32_1 = arith.constant 0 : i32
    return %c0_i32, %c0_i32_0 : i32, i32
  }
  func.func @transform_2(%arg0: i32) -> (i32, i32) {
    %c0_i32 = arith.constant 0 : i32
    %c0_i32_0 = arith.constant 0 : i32
    %c0_i32_1 = arith.constant 0 : i32
    return %c0_i32, %c0_i32_0 : i32, i32
  }
  func.func @transform_3(%arg0: i32) -> (i32, i32) {
    %c0_i32 = arith.constant 0 : i32
    %c0_i32_0 = arith.constant 0 : i32
    %c0_i32_1 = arith.constant 0 : i32
    return %c0_i32, %c0_i32_0 : i32, i32
  }
  func.func @transform_4(%arg0: i32) -> (i32, i32, i32) {
    %c0_i32 = arith.constant 0 : i32
    %c0_i32_0 = arith.constant 0 : i32
    %c0_i32_1 = arith.constant 0 : i32
    return %arg0, %c0_i32, %c0_i32_0 : i32, i32, i32
  }
}

module attributes {stable_mosaic.version = 11 : i64} {
  func.func @_attn_kernel(%arg0: i32, %arg1: memref<1x5x16xf32, #tpu.memory_space<vmem>>, %arg2: memref<2x16xf32, #tpu.memory_space<vmem>>, %arg3: memref<2x5x5xf32, #tpu.memory_space<vmem>>, %arg4: memref<16x48xbf16, #tpu.memory_space<vmem>>, %arg5: memref<1x48xf32, #tpu.memory_space<vmem>>, %arg6: memref<16x16xbf16, #tpu.memory_space<vmem>>, %arg7: memref<1x16xf32, #tpu.memory_space<vmem>>, %arg8: memref<1x5x16xf32, #tpu.memory_space<vmem>>, %arg9: memref<2x5x5xf32, #tpu.memory_space<vmem>>, %arg10: memref<1x2x16xf32, #tpu.memory_space<vmem>>) attributes {dimension_semantics = [#tpu.dimension_semantics<parallel>], iteration_bounds = array<i64: 8>, scalar_prefetch = 0 : i64, scratch_operands = 0 : i64, tpu.core_type = #tpu.core_type<tc>, window_params = [{transform_indices = @transform_0, window_bounds = array<i64: 1, 5, 16>}, {pipeline_mode = #tpu.pipeline_mode<synchronous>, transform_indices = @transform_1, window_bounds = array<i64: 2, 16>}, {transform_indices = @transform_2, window_bounds = array<i64: 2, 5, 5>}, {pipeline_mode = #tpu.pipeline_mode<synchronous>, transform_indices = @transform_3, window_bounds = array<i64: 16, 48>}, {pipeline_mode = #tpu.pipeline_mode<synchronous>, transform_indices = @transform_4, window_bounds = array<i64: 1, 48>}, {pipeline_mode = #tpu.pipeline_mode<synchronous>, transform_indices = @transform_5, window_bounds = array<i64: 16, 16>}, {pipeline_mode = #tpu.pipeline_mode<synchronous>, transform_indices = @transform_6, window_bounds = array<i64: 1, 16>}, {transform_indices = @transform_7, window_bounds = array<i64: 1, 5, 16>}, {transform_indices = @transform_8, window_bounds = array<i64: 2, 5, 5>}, {transform_indices = @transform_9, window_bounds = array<i64: 1, 2, 16>}]} {
    %c0 = arith.constant 0 : index
    %c0_0 = arith.constant 0 : index
    %c0_1 = arith.constant 0 : index
    %0 = vector.load %arg1[%c0, %c0_0, %c0_1] : memref<1x5x16xf32, #tpu.memory_space<vmem>>, vector<1x5x16xf32>
    %1 = vector.shape_cast %0 : vector<1x5x16xf32> to vector<5x16xf32>
    %c0_2 = arith.constant 0 : index
    %c0_3 = arith.constant 0 : index
    %2 = vector.load %arg2[%c0_2, %c0_3] : memref<2x16xf32, #tpu.memory_space<vmem>>, vector<1x16xf32>
    %c1 = arith.constant 1 : index
    %c0_4 = arith.constant 0 : index
    %3 = vector.load %arg2[%c1, %c0_4] : memref<2x16xf32, #tpu.memory_space<vmem>>, vector<1x16xf32>
    %4 = vector.broadcast %2 : vector<1x16xf32> to vector<5x16xf32>
    %5 = arith.subf %1, %4 : vector<5x16xf32>
    %6 = vector.broadcast %3 : vector<1x16xf32> to vector<5x16xf32>
    %7 = arith.mulf %5, %6 : vector<5x16xf32>
    %8 = arith.truncf %7 : vector<5x16xf32> to vector<5x16xbf16>
    %c0_5 = arith.constant 0 : index
    %c0_6 = arith.constant 0 : index
    %9 = vector.load %arg4[%c0_5, %c0_6] : memref<16x48xbf16, #tpu.memory_space<vmem>>, vector<16x48xbf16>
    %cst = arith.constant dense<0.000000e+00> : vector<5x48xf32>
    %10 = tpu.matmul %8, %9, %cst {dimension_numbers = #tpu.dot_dimension_numbers<[1], [0], [0], [1], [0, 0, 1, 1], [], []>} : vector<5x16xbf16>, vector<16x48xbf16>, vector<5x48xf32> -> vector<5x48xf32>
    %c0_7 = arith.constant 0 : index
    %c0_8 = arith.constant 0 : index
    %11 = vector.load %arg5[%c0_7, %c0_8] : memref<1x48xf32, #tpu.memory_space<vmem>>, vector<1x48xf32>
    %12 = vector.broadcast %11 : vector<1x48xf32> to vector<5x48xf32>
    %13 = arith.addf %10, %12 : vector<5x48xf32>
    %14 = vector.extract_strided_slice %13 {offsets = [0, 0], sizes = [5, 8], strides = [1, 1]} : vector<5x48xf32> to vector<5x8xf32>
    %15 = vector.extract_strided_slice %13 {offsets = [0, 16], sizes = [5, 8], strides = [1, 1]} : vector<5x48xf32> to vector<5x8xf32>
    %16 = vector.extract_strided_slice %13 {offsets = [0, 32], sizes = [5, 8], strides = [1, 1]} : vector<5x48xf32> to vector<5x8xf32>
    %17 = arith.truncf %14 : vector<5x8xf32> to vector<5x8xbf16>
    %18 = arith.truncf %15 : vector<5x8xf32> to vector<5x8xbf16>
    %cst_9 = arith.constant dense<0.000000e+00> : vector<5x5xf32>
    %19 = tpu.matmul %17, %18, %cst_9 {dimension_numbers = #tpu.dot_dimension_numbers<[1], [1], [0], [0], [0, 0, 1, 0], [], []>} : vector<5x8xbf16>, vector<5x8xbf16>, vector<5x5xf32> -> vector<5x5xf32>
    %cst_10 = arith.constant 0.353553385 : f32
    %20 = vector.broadcast %cst_10 : f32 to vector<5x5xf32>
    %21 = arith.mulf %19, %20 : vector<5x5xf32>
    %c0_11 = arith.constant 0 : index
    %c0_12 = arith.constant 0 : index
    %c0_13 = arith.constant 0 : index
    %22 = vector.load %arg3[%c0_11, %c0_12, %c0_13] : memref<2x5x5xf32, #tpu.memory_space<vmem>>, vector<1x5x5xf32>
    %23 = vector.shape_cast %22 : vector<1x5x5xf32> to vector<5x5xf32>
    %24 = arith.addf %21, %23 : vector<5x5xf32>
    %c0_14 = arith.constant 0 : index
    %c0_15 = arith.constant 0 : index
    %c0_16 = arith.constant 0 : index
    %25 = vector.load %arg9[%c0_14, %c0_15, %c0_16] : memref<2x5x5xf32, #tpu.memory_space<vmem>>, vector<1x5x5xf32>
    %26 = vector.shape_cast %25 : vector<1x5x5xf32> to vector<5x5xf32>
    %27 = vector.shape_cast %24 : vector<5x5xf32> to vector<1x5x5xf32>
    tpu.vector_store %arg9[%c0_14, %c0_15, %c0_16], %27 {strides = array<i32>} : memref<2x5x5xf32, #tpu.memory_space<vmem>>, vector<1x5x5xf32>,
    %cst_17 = arith.constant dense<0xFF800000> : vector<5xf32>
    %28 = vector.multi_reduction <maximumf>, %24, %cst_17 [1] : vector<5x5xf32> to vector<5xf32>
    %29 = vector.shape_cast %28 : vector<5xf32> to vector<5x1xf32>
    %30 = vector.broadcast %29 : vector<5x1xf32> to vector<5x5xf32>
    %31 = arith.subf %24, %30 : vector<5x5xf32>
    %32 = math.exp %31 : vector<5x5xf32>
    %cst_18 = arith.constant dense<0.000000e+00> : vector<5xf32>
    %33 = vector.multi_reduction <add>, %32, %cst_18 [1] : vector<5x5xf32> to vector<5xf32>
    %34 = vector.shape_cast %33 : vector<5xf32> to vector<5x1xf32>
    %35 = tpu.reciprocal %34 {approx = true} : vector<5x1xf32> -> vector<5x1xf32>
    %36 = vector.broadcast %35 : vector<5x1xf32> to vector<5x5xf32>
    %37 = arith.mulf %32, %36 : vector<5x5xf32>
    %38 = arith.truncf %37 : vector<5x5xf32> to vector<5x5xbf16>
    %39 = arith.truncf %16 : vector<5x8xf32> to vector<5x8xbf16>
    %cst_19 = arith.constant dense<0.000000e+00> : vector<5x8xf32>
    %40 = tpu.matmul %38, %39, %cst_19 {dimension_numbers = #tpu.dot_dimension_numbers<[1], [0], [0], [1], [0, 0, 1, 1], [], []>} : vector<5x5xbf16>, vector<5x8xbf16>, vector<5x8xf32> -> vector<5x8xf32>
    %41 = vector.extract_strided_slice %13 {offsets = [0, 8], sizes = [5, 8], strides = [1, 1]} : vector<5x48xf32> to vector<5x8xf32>
    %42 = vector.extract_strided_slice %13 {offsets = [0, 24], sizes = [5, 8], strides = [1, 1]} : vector<5x48xf32> to vector<5x8xf32>
    %43 = vector.extract_strided_slice %13 {offsets = [0, 40], sizes = [5, 8], strides = [1, 1]} : vector<5x48xf32> to vector<5x8xf32>
    %44 = arith.truncf %41 : vector<5x8xf32> to vector<5x8xbf16>
    %45 = arith.truncf %42 : vector<5x8xf32> to vector<5x8xbf16>
    %cst_20 = arith.constant dense<0.000000e+00> : vector<5x5xf32>
    %46 = tpu.matmul %44, %45, %cst_20 {dimension_numbers = #tpu.dot_dimension_numbers<[1], [1], [0], [0], [0, 0, 1, 0], [], []>} : vector<5x8xbf16>, vector<5x8xbf16>, vector<5x5xf32> -> vector<5x5xf32>
    %cst_21 = arith.constant 0.353553385 : f32
    %47 = vector.broadcast %cst_21 : f32 to vector<5x5xf32>
    %48 = arith.mulf %46, %47 : vector<5x5xf32>
    %c1_22 = arith.constant 1 : index
    %c0_23 = arith.constant 0 : index
    %c0_24 = arith.constant 0 : index
    %49 = vector.load %arg3[%c1_22, %c0_23, %c0_24] : memref<2x5x5xf32, #tpu.memory_space<vmem>>, vector<1x5x5xf32>
    %50 = vector.shape_cast %49 : vector<1x5x5xf32> to vector<5x5xf32>
    %51 = arith.addf %48, %50 : vector<5x5xf32>
    %c1_25 = arith.constant 1 : index
    %c0_26 = arith.constant 0 : index
    %c0_27 = arith.constant 0 : index
    %52 = vector.load %arg9[%c1_25, %c0_26, %c0_27] : memref<2x5x5xf32, #tpu.memory_space<vmem>>, vector<1x5x5xf32>
    %53 = vector.shape_cast %52 : vector<1x5x5xf32> to vector<5x5xf32>
    %54 = vector.shape_cast %51 : vector<5x5xf32> to vector<1x5x5xf32>
    tpu.vector_store %arg9[%c1_25, %c0_26, %c0_27], %54 {strides = array<i32>} : memref<2x5x5xf32, #tpu.memory_space<vmem>>, vector<1x5x5xf32>,
    %cst_28 = arith.constant dense<0xFF800000> : vector<5xf32>
    %55 = vector.multi_reduction <maximumf>, %51, %cst_28 [1] : vector<5x5xf32> to vector<5xf32>
    %56 = vector.shape_cast %55 : vector<5xf32> to vector<5x1xf32>
    %57 = vector.broadcast %56 : vector<5x1xf32> to vector<5x5xf32>
    %58 = arith.subf %51, %57 : vector<5x5xf32>
    %59 = math.exp %58 : vector<5x5xf32>
    %cst_29 = arith.constant dense<0.000000e+00> : vector<5xf32>
    %60 = vector.multi_reduction <add>, %59, %cst_29 [1] : vector<5x5xf32> to vector<5xf32>
    %61 = vector.shape_cast %60 : vector<5xf32> to vector<5x1xf32>
    %62 = tpu.reciprocal %61 {approx = true} : vector<5x1xf32> -> vector<5x1xf32>
    %63 = vector.broadcast %62 : vector<5x1xf32> to vector<5x5xf32>
    %64 = arith.mulf %59, %63 : vector<5x5xf32>
    %65 = arith.truncf %64 : vector<5x5xf32> to vector<5x5xbf16>
    %66 = arith.truncf %43 : vector<5x8xf32> to vector<5x8xbf16>
    %cst_30 = arith.constant dense<0.000000e+00> : vector<5x8xf32>
    %67 = tpu.matmul %65, %66, %cst_30 {dimension_numbers = #tpu.dot_dimension_numbers<[1], [0], [0], [1], [0, 0, 1, 1], [], []>} : vector<5x5xbf16>, vector<5x8xbf16>, vector<5x8xf32> -> vector<5x8xf32>
    %68 = tpu.concatenate %40, %67 in 1 : vector<5x8xf32>, vector<5x8xf32> -> vector<5x16xf32>
    %69 = arith.truncf %68 : vector<5x16xf32> to vector<5x16xbf16>
    %c0_31 = arith.constant 0 : index
    %c0_32 = arith.constant 0 : index
    %70 = vector.load %arg6[%c0_31, %c0_32] : memref<16x16xbf16, #tpu.memory_space<vmem>>, vector<16x16xbf16>
    %cst_33 = arith.constant dense<0.000000e+00> : vector<5x16xf32>
    %71 = tpu.matmul %69, %70, %cst_33 {dimension_numbers = #tpu.dot_dimension_numbers<[1], [0], [0], [1], [0, 0, 1, 1], [], []>} : vector<5x16xbf16>, vector<16x16xbf16>, vector<5x16xf32> -> vector<5x16xf32>
    %c0_34 = arith.constant 0 : index
    %c0_35 = arith.constant 0 : index
    %72 = vector.load %arg7[%c0_34, %c0_35] : memref<1x16xf32, #tpu.memory_space<vmem>>, vector<1x16xf32>
    %73 = vector.broadcast %72 : vector<1x16xf32> to vector<5x16xf32>
    %74 = arith.addf %71, %73 : vector<5x16xf32>
    %75 = arith.addf %7, %74 : vector<5x16xf32>
    %c0_36 = arith.constant 0 : index
    %c0_37 = arith.constant 0 : index
    %c0_38 = arith.constant 0 : index
    %76 = vector.load %arg8[%c0_36, %c0_37, %c0_38] : memref<1x5x16xf32, #tpu.memory_space<vmem>>, vector<1x5x16xf32>
    %77 = vector.shape_cast %76 : vector<1x5x16xf32> to vector<5x16xf32>
    %78 = vector.shape_cast %75 : vector<5x16xf32> to vector<1x5x16xf32>
    tpu.vector_store %arg8[%c0_36, %c0_37, %c0_38], %78 {strides = array<i32>} : memref<1x5x16xf32, #tpu.memory_space<vmem>>, vector<1x5x16xf32>,
    %cst_39 = arith.constant dense<0.000000e+00> : vector<16xf32>
    %79 = vector.multi_reduction <add>, %75, %cst_39 [0] : vector<5x16xf32> to vector<16xf32>
    %80 = vector.shape_cast %79 : vector<16xf32> to vector<1x16xf32>
    %81 = arith.mulf %75, %75 : vector<5x16xf32>
    %cst_40 = arith.constant dense<0.000000e+00> : vector<16xf32>
    %82 = vector.multi_reduction <add>, %81, %cst_40 [0] : vector<5x16xf32> to vector<16xf32>
    %83 = vector.shape_cast %82 : vector<16xf32> to vector<1x16xf32>
    %84 = tpu.concatenate %80, %83 in 0 : vector<1x16xf32>, vector<1x16xf32> -> vector<2x16xf32>
    %c0_41 = arith.constant 0 : index
    %c0_42 = arith.constant 0 : index
    %c0_43 = arith.constant 0 : index
    %85 = vector.load %arg10[%c0_41, %c0_42, %c0_43] : memref<1x2x16xf32, #tpu.memory_space<vmem>>, vector<1x2x16xf32>
    %86 = vector.shape_cast %85 : vector<1x2x16xf32> to vector<2x16xf32>
    %87 = vector.shape_cast %84 : vector<2x16xf32> to vector<1x2x16xf32>
    tpu.vector_store %arg10[%c0_41, %c0_42, %c0_43], %87 {strides = array<i32>} : memref<1x2x16xf32, #tpu.memory_space<vmem>>, vector<1x2x16xf32>,
    return
  }
  func.func @transform_0(%arg0: i32) -> (i32, i32, i32) {
    %c0_i32 = arith.constant 0 : i32
    %c0_i32_0 = arith.constant 0 : i32
    %c0_i32_1 = arith.constant 0 : i32
    return %arg0, %c0_i32, %c0_i32_0 : i32, i32, i32
  }
  func.func @transform_1(%arg0: i32) -> (i32, i32) {
    %c0_i32 = arith.constant 0 : i32
    %c0_i32_0 = arith.constant 0 : i32
    %c0_i32_1 = arith.constant 0 : i32
    return %c0_i32, %c0_i32_0 : i32, i32
  }
  func.func @transform_2(%arg0: i32) -> (i32, i32, i32) {
    %c0_i32 = arith.constant 0 : i32
    %c0_i32_0 = arith.constant 0 : i32
    %c0_i32_1 = arith.constant 0 : i32
    return %arg0, %c0_i32, %c0_i32_0 : i32, i32, i32
  }
  func.func @transform_3(%arg0: i32) -> (i32, i32) {
    %c0_i32 = arith.constant 0 : i32
    %c0_i32_0 = arith.constant 0 : i32
    %c0_i32_1 = arith.constant 0 : i32
    return %c0_i32, %c0_i32_0 : i32, i32
  }
  func.func @transform_4(%arg0: i32) -> (i32, i32) {
    %c0_i32 = arith.constant 0 : i32
    %c0_i32_0 = arith.constant 0 : i32
    %c0_i32_1 = arith.constant 0 : i32
    return %c0_i32, %c0_i32_0 : i32, i32
  }
  func.func @transform_5(%arg0: i32) -> (i32, i32) {
    %c0_i32 = arith.constant 0 : i32
    %c0_i32_0 = arith.constant 0 : i32
    %c0_i32_1 = arith.constant 0 : i32
    return %c0_i32, %c0_i32_0 : i32, i32
  }
  func.func @transform_6(%arg0: i32) -> (i32, i32) {
    %c0_i32 = arith.constant 0 : i32
    %c0_i32_0 = arith.constant 0 : i32
    %c0_i32_1 = arith.constant 0 : i32
    return %c0_i32, %c0_i32_0 : i32, i32
  }
  func.func @transform_7(%arg0: i32) -> (i32, i32, i32) {
    %c0_i32 = arith.constant 0 : i32
    %c0_i32_0 = arith.constant 0 : i32
    %c0_i32_1 = arith.constant 0 : i32
    return %arg0, %c0_i32, %c0_i32_0 : i32, i32, i32
  }
  func.func @transform_8(%arg0: i32) -> (i32, i32, i32) {
    %c0_i32 = arith.constant 0 : i32
    %c0_i32_0 = arith.constant 0 : i32
    %c0_i32_1 = arith.constant 0 : i32
    return %arg0, %c0_i32, %c0_i32_0 : i32, i32, i32
  }
  func.func @transform_9(%arg0: i32) -> (i32, i32, i32) {
    %c0_i32 = arith.constant 0 : i32
    %c0_i32_0 = arith.constant 0 : i32
    %c0_i32_1 = arith.constant 0 : i32
    return %arg0, %c0_i32, %c0_i32_0 : i32, i32, i32
  }
}

module attributes {stable_mosaic.version = 11 : i64} {
  func.func @_ffn_kernel(%arg0: i32, %arg1: memref<40x16xf32, #tpu.memory_space<vmem>>, %arg2: memref<2x16xf32, #tpu.memory_space<vmem>>, %arg3: memref<16x32xbf16, #tpu.memory_space<vmem>>, %arg4: memref<1x32xf32, #tpu.memory_space<vmem>>, %arg5: memref<32x16xbf16, #tpu.memory_space<vmem>>, %arg6: memref<1x16xf32, #tpu.memory_space<vmem>>, %arg7: memref<40x16xf32, #tpu.memory_space<vmem>>, %arg8: memref<1x2x16xf32, #tpu.memory_space<vmem>>) attributes {dimension_semantics = [#tpu.dimension_semantics<parallel>], iteration_bounds = array<i64: 1>, scalar_prefetch = 0 : i64, scratch_operands = 0 : i64, tpu.core_type = #tpu.core_type<tc>, window_params = [{transform_indices = @transform_0, window_bounds = array<i64: 40, 16>}, {pipeline_mode = #tpu.pipeline_mode<synchronous>, transform_indices = @transform_1, window_bounds = array<i64: 2, 16>}, {pipeline_mode = #tpu.pipeline_mode<synchronous>, transform_indices = @transform_2, window_bounds = array<i64: 16, 32>}, {pipeline_mode = #tpu.pipeline_mode<synchronous>, transform_indices = @transform_3, window_bounds = array<i64: 1, 32>}, {pipeline_mode = #tpu.pipeline_mode<synchronous>, transform_indices = @transform_4, window_bounds = array<i64: 32, 16>}, {pipeline_mode = #tpu.pipeline_mode<synchronous>, transform_indices = @transform_5, window_bounds = array<i64: 1, 16>}, {transform_indices = @transform_6, window_bounds = array<i64: 40, 16>}, {transform_indices = @transform_7, window_bounds = array<i64: 1, 2, 16>}]} {
    %c0 = arith.constant 0 : index
    %c0_0 = arith.constant 0 : index
    %0 = vector.load %arg1[%c0, %c0_0] : memref<40x16xf32, #tpu.memory_space<vmem>>, vector<40x16xf32>
    %c0_1 = arith.constant 0 : index
    %c0_2 = arith.constant 0 : index
    %1 = vector.load %arg2[%c0_1, %c0_2] : memref<2x16xf32, #tpu.memory_space<vmem>>, vector<1x16xf32>
    %c1 = arith.constant 1 : index
    %c0_3 = arith.constant 0 : index
    %2 = vector.load %arg2[%c1, %c0_3] : memref<2x16xf32, #tpu.memory_space<vmem>>, vector<1x16xf32>
    %3 = vector.broadcast %1 : vector<1x16xf32> to vector<40x16xf32>
    %4 = arith.subf %0, %3 : vector<40x16xf32>
    %5 = vector.broadcast %2 : vector<1x16xf32> to vector<40x16xf32>
    %6 = arith.mulf %4, %5 : vector<40x16xf32>
    %7 = arith.truncf %6 : vector<40x16xf32> to vector<40x16xbf16>
    %c0_4 = arith.constant 0 : index
    %c0_5 = arith.constant 0 : index
    %8 = vector.load %arg3[%c0_4, %c0_5] : memref<16x32xbf16, #tpu.memory_space<vmem>>, vector<16x32xbf16>
    %cst = arith.constant dense<0.000000e+00> : vector<40x32xf32>
    %9 = tpu.matmul %7, %8, %cst {dimension_numbers = #tpu.dot_dimension_numbers<[1], [0], [0], [1], [0, 0, 1, 1], [], []>} : vector<40x16xbf16>, vector<16x32xbf16>, vector<40x32xf32> -> vector<40x32xf32>
    %c0_6 = arith.constant 0 : index
    %c0_7 = arith.constant 0 : index
    %10 = vector.load %arg4[%c0_6, %c0_7] : memref<1x32xf32, #tpu.memory_space<vmem>>, vector<1x32xf32>
    %11 = vector.broadcast %10 : vector<1x32xf32> to vector<40x32xf32>
    %12 = arith.addf %9, %11 : vector<40x32xf32>
    %cst_8 = arith.constant 5.000000e-01 : f32
    %13 = vector.broadcast %cst_8 : f32 to vector<40x32xf32>
    %14 = arith.mulf %13, %12 : vector<40x32xf32>
    %cst_9 = arith.constant 0.707106769 : f32
    %15 = vector.broadcast %cst_9 : f32 to vector<40x32xf32>
    %16 = arith.mulf %12, %15 : vector<40x32xf32>
    %17 = math.absf %16 : vector<40x32xf32>
    %cst_10 = arith.constant 0.327591091 : f32
    %18 = vector.broadcast %cst_10 : f32 to vector<40x32xf32>
    %19 = arith.mulf %18, %17 : vector<40x32xf32>
    %cst_11 = arith.constant 1.000000e+00 : f32
    %20 = vector.broadcast %cst_11 : f32 to vector<40x32xf32>
    %21 = arith.addf %20, %19 : vector<40x32xf32>
    %cst_12 = arith.constant 1.000000e+00 : f32
    %22 = vector.broadcast %cst_12 : f32 to vector<40x32xf32>
    %23 = arith.divf %22, %21 : vector<40x32xf32>
    %cst_13 = arith.constant 1.06140542 : f32
    %24 = vector.broadcast %cst_13 : f32 to vector<40x32xf32>
    %25 = arith.mulf %24, %23 : vector<40x32xf32>
    %cst_14 = arith.constant -1.45315206 : f32
    %26 = vector.broadcast %cst_14 : f32 to vector<40x32xf32>
    %27 = arith.addf %25, %26 : vector<40x32xf32>
    %28 = arith.mulf %27, %23 : vector<40x32xf32>
    %cst_15 = arith.constant 1.42141378 : f32
    %29 = vector.broadcast %cst_15 : f32 to vector<40x32xf32>
    %30 = arith.addf %28, %29 : vector<40x32xf32>
    %31 = arith.mulf %30, %23 : vector<40x32xf32>
    %cst_16 = arith.constant -0.284496725 : f32
    %32 = vector.broadcast %cst_16 : f32 to vector<40x32xf32>
    %33 = arith.addf %31, %32 : vector<40x32xf32>
    %34 = arith.mulf %33, %23 : vector<40x32xf32>
    %cst_17 = arith.constant 0.254829586 : f32
    %35 = vector.broadcast %cst_17 : f32 to vector<40x32xf32>
    %36 = arith.addf %34, %35 : vector<40x32xf32>
    %37 = arith.mulf %36, %23 : vector<40x32xf32>
    %38 = arith.mulf %17, %17 : vector<40x32xf32>
    %cst_18 = arith.constant 0.000000e+00 : f32
    %39 = vector.broadcast %cst_18 : f32 to vector<40x32xf32>
    %40 = arith.subf %39, %38 : vector<40x32xf32>
    %41 = math.exp %40 : vector<40x32xf32>
    %42 = arith.mulf %37, %41 : vector<40x32xf32>
    %cst_19 = arith.constant 1.000000e+00 : f32
    %43 = vector.broadcast %cst_19 : f32 to vector<40x32xf32>
    %44 = arith.subf %43, %42 : vector<40x32xf32>
    %cst_20 = arith.constant 0.000000e+00 : f32
    %45 = vector.broadcast %cst_20 : f32 to vector<40x32xf32>
    %46 = arith.cmpf oge, %16, %45 : vector<40x32xf32>
    %cst_21 = arith.constant 0.000000e+00 : f32
    %47 = vector.broadcast %cst_21 : f32 to vector<40x32xf32>
    %48 = arith.subf %47, %44 : vector<40x32xf32>
    %49 = arith.select %46, %44, %48 : vector<40x32xi1>, vector<40x32xf32>
    %cst_22 = arith.constant 1.000000e+00 : f32
    %50 = vector.broadcast %cst_22 : f32 to vector<40x32xf32>
    %51 = arith.addf %50, %49 : vector<40x32xf32>
    %52 = arith.mulf %14, %51 : vector<40x32xf32>
    %53 = arith.truncf %52 : vector<40x32xf32> to vector<40x32xbf16>
    %c0_23 = arith.constant 0 : index
    %c0_24 = arith.constant 0 : index
    %54 = vector.load %arg5[%c0_23, %c0_24] : memref<32x16xbf16, #tpu.memory_space<vmem>>, vector<32x16xbf16>
    %cst_25 = arith.constant dense<0.000000e+00> : vector<40x16xf32>
    %55 = tpu.matmul %53, %54, %cst_25 {dimension_numbers = #tpu.dot_dimension_numbers<[1], [0], [0], [1], [0, 0, 1, 1], [], []>} : vector<40x32xbf16>, vector<32x16xbf16>, vector<40x16xf32> -> vector<40x16xf32>
    %c0_26 = arith.constant 0 : index
    %c0_27 = arith.constant 0 : index
    %56 = vector.load %arg6[%c0_26, %c0_27] : memref<1x16xf32, #tpu.memory_space<vmem>>, vector<1x16xf32>
    %57 = vector.broadcast %56 : vector<1x16xf32> to vector<40x16xf32>
    %58 = arith.addf %55, %57 : vector<40x16xf32>
    %59 = arith.addf %6, %58 : vector<40x16xf32>
    %c0_28 = arith.constant 0 : index
    %c0_29 = arith.constant 0 : index
    %60 = vector.load %arg7[%c0_28, %c0_29] : memref<40x16xf32, #tpu.memory_space<vmem>>, vector<40x16xf32>
    tpu.vector_store %arg7[%c0_28, %c0_29], %59 {strides = array<i32>} : memref<40x16xf32, #tpu.memory_space<vmem>>, vector<40x16xf32>,
    %cst_30 = arith.constant dense<0.000000e+00> : vector<16xf32>
    %61 = vector.multi_reduction <add>, %59, %cst_30 [0] : vector<40x16xf32> to vector<16xf32>
    %62 = vector.shape_cast %61 : vector<16xf32> to vector<1x16xf32>
    %63 = arith.mulf %59, %59 : vector<40x16xf32>
    %cst_31 = arith.constant dense<0.000000e+00> : vector<16xf32>
    %64 = vector.multi_reduction <add>, %63, %cst_31 [0] : vector<40x16xf32> to vector<16xf32>
    %65 = vector.shape_cast %64 : vector<16xf32> to vector<1x16xf32>
    %66 = tpu.concatenate %62, %65 in 0 : vector<1x16xf32>, vector<1x16xf32> -> vector<2x16xf32>
    %c0_32 = arith.constant 0 : index
    %c0_33 = arith.constant 0 : index
    %c0_34 = arith.constant 0 : index
    %67 = vector.load %arg8[%c0_32, %c0_33, %c0_34] : memref<1x2x16xf32, #tpu.memory_space<vmem>>, vector<1x2x16xf32>
    %68 = vector.shape_cast %67 : vector<1x2x16xf32> to vector<2x16xf32>
    %69 = vector.shape_cast %66 : vector<2x16xf32> to vector<1x2x16xf32>
    tpu.vector_store %arg8[%c0_32, %c0_33, %c0_34], %69 {strides = array<i32>} : memref<1x2x16xf32, #tpu.memory_space<vmem>>, vector<1x2x16xf32>,
    return
  }
  func.func @transform_0(%arg0: i32) -> (i32, i32) {
    %c0_i32 = arith.constant 0 : i32
    %c0_i32_0 = arith.constant 0 : i32
    return %arg0, %c0_i32 : i32, i32
  }
  func.func @transform_1(%arg0: i32) -> (i32, i32) {
    %c0_i32 = arith.constant 0 : i32
    %c0_i32_0 = arith.constant 0 : i32
    %c0_i32_1 = arith.constant 0 : i32
    return %c0_i32, %c0_i32_0 : i32, i32
  }
  func.func @transform_2(%arg0: i32) -> (i32, i32) {
    %c0_i32 = arith.constant 0 : i32
    %c0_i32_0 = arith.constant 0 : i32
    %c0_i32_1 = arith.constant 0 : i32
    return %c0_i32, %c0_i32_0 : i32, i32
  }
  func.func @transform_3(%arg0: i32) -> (i32, i32) {
    %c0_i32 = arith.constant 0 : i32
    %c0_i32_0 = arith.constant 0 : i32
    %c0_i32_1 = arith.constant 0 : i32
    return %c0_i32, %c0_i32_0 : i32, i32
  }
  func.func @transform_4(%arg0: i32) -> (i32, i32) {
    %c0_i32 = arith.constant 0 : i32
    %c0_i32_0 = arith.constant 0 : i32
    %c0_i32_1 = arith.constant 0 : i32
    return %c0_i32, %c0_i32_0 : i32, i32
  }
  func.func @transform_5(%arg0: i32) -> (i32, i32) {
    %c0_i32 = arith.constant 0 : i32
    %c0_i32_0 = arith.constant 0 : i32
    %c0_i32_1 = arith.constant 0 : i32
    return %c0_i32, %c0_i32_0 : i32, i32
  }
  func.func @transform_6(%arg0: i32) -> (i32, i32) {
    %c0_i32 = arith.constant 0 : i32
    %c0_i32_0 = arith.constant 0 : i32
    return %arg0, %c0_i32 : i32, i32
  }
  func.func @transform_7(%arg0: i32) -> (i32, i32, i32) {
    %c0_i32 = arith.constant 0 : i32
    %c0_i32_0 = arith.constant 0 : i32
    %c0_i32_1 = arith.constant 0 : i32
    return %arg0, %c0_i32, %c0_i32_0 : i32, i32, i32
  }
}

module attributes {stable_mosaic.version = 11 : i64} {
  func.func @_attn_kernel(%arg0: i32, %arg1: memref<1x5x16xf32, #tpu.memory_space<vmem>>, %arg2: memref<2x16xf32, #tpu.memory_space<vmem>>, %arg3: memref<2x5x5xf32, #tpu.memory_space<vmem>>, %arg4: memref<16x48xbf16, #tpu.memory_space<vmem>>, %arg5: memref<1x48xf32, #tpu.memory_space<vmem>>, %arg6: memref<16x16xbf16, #tpu.memory_space<vmem>>, %arg7: memref<1x16xf32, #tpu.memory_space<vmem>>, %arg8: memref<1x5x16xf32, #tpu.memory_space<vmem>>, %arg9: memref<2x5x5xf32, #tpu.memory_space<vmem>>, %arg10: memref<1x2x16xf32, #tpu.memory_space<vmem>>) attributes {dimension_semantics = [#tpu.dimension_semantics<parallel>], iteration_bounds = array<i64: 8>, scalar_prefetch = 0 : i64, scratch_operands = 0 : i64, tpu.core_type = #tpu.core_type<tc>, window_params = [{transform_indices = @transform_0, window_bounds = array<i64: 1, 5, 16>}, {pipeline_mode = #tpu.pipeline_mode<synchronous>, transform_indices = @transform_1, window_bounds = array<i64: 2, 16>}, {transform_indices = @transform_2, window_bounds = array<i64: 2, 5, 5>}, {pipeline_mode = #tpu.pipeline_mode<synchronous>, transform_indices = @transform_3, window_bounds = array<i64: 16, 48>}, {pipeline_mode = #tpu.pipeline_mode<synchronous>, transform_indices = @transform_4, window_bounds = array<i64: 1, 48>}, {pipeline_mode = #tpu.pipeline_mode<synchronous>, transform_indices = @transform_5, window_bounds = array<i64: 16, 16>}, {pipeline_mode = #tpu.pipeline_mode<synchronous>, transform_indices = @transform_6, window_bounds = array<i64: 1, 16>}, {transform_indices = @transform_7, window_bounds = array<i64: 1, 5, 16>}, {transform_indices = @transform_8, window_bounds = array<i64: 2, 5, 5>}, {transform_indices = @transform_9, window_bounds = array<i64: 1, 2, 16>}]} {
    %c0 = arith.constant 0 : index
    %c0_0 = arith.constant 0 : index
    %c0_1 = arith.constant 0 : index
    %0 = vector.load %arg1[%c0, %c0_0, %c0_1] : memref<1x5x16xf32, #tpu.memory_space<vmem>>, vector<1x5x16xf32>
    %1 = vector.shape_cast %0 : vector<1x5x16xf32> to vector<5x16xf32>
    %c0_2 = arith.constant 0 : index
    %c0_3 = arith.constant 0 : index
    %2 = vector.load %arg2[%c0_2, %c0_3] : memref<2x16xf32, #tpu.memory_space<vmem>>, vector<1x16xf32>
    %c1 = arith.constant 1 : index
    %c0_4 = arith.constant 0 : index
    %3 = vector.load %arg2[%c1, %c0_4] : memref<2x16xf32, #tpu.memory_space<vmem>>, vector<1x16xf32>
    %4 = vector.broadcast %2 : vector<1x16xf32> to vector<5x16xf32>
    %5 = arith.subf %1, %4 : vector<5x16xf32>
    %6 = vector.broadcast %3 : vector<1x16xf32> to vector<5x16xf32>
    %7 = arith.mulf %5, %6 : vector<5x16xf32>
    %8 = arith.truncf %7 : vector<5x16xf32> to vector<5x16xbf16>
    %c0_5 = arith.constant 0 : index
    %c0_6 = arith.constant 0 : index
    %9 = vector.load %arg4[%c0_5, %c0_6] : memref<16x48xbf16, #tpu.memory_space<vmem>>, vector<16x48xbf16>
    %cst = arith.constant dense<0.000000e+00> : vector<5x48xf32>
    %10 = tpu.matmul %8, %9, %cst {dimension_numbers = #tpu.dot_dimension_numbers<[1], [0], [0], [1], [0, 0, 1, 1], [], []>} : vector<5x16xbf16>, vector<16x48xbf16>, vector<5x48xf32> -> vector<5x48xf32>
    %c0_7 = arith.constant 0 : index
    %c0_8 = arith.constant 0 : index
    %11 = vector.load %arg5[%c0_7, %c0_8] : memref<1x48xf32, #tpu.memory_space<vmem>>, vector<1x48xf32>
    %12 = vector.broadcast %11 : vector<1x48xf32> to vector<5x48xf32>
    %13 = arith.addf %10, %12 : vector<5x48xf32>
    %14 = vector.extract_strided_slice %13 {offsets = [0, 0], sizes = [5, 8], strides = [1, 1]} : vector<5x48xf32> to vector<5x8xf32>
    %15 = vector.extract_strided_slice %13 {offsets = [0, 16], sizes = [5, 8], strides = [1, 1]} : vector<5x48xf32> to vector<5x8xf32>
    %16 = vector.extract_strided_slice %13 {offsets = [0, 32], sizes = [5, 8], strides = [1, 1]} : vector<5x48xf32> to vector<5x8xf32>
    %17 = arith.truncf %14 : vector<5x8xf32> to vector<5x8xbf16>
    %18 = arith.truncf %15 : vector<5x8xf32> to vector<5x8xbf16>
    %cst_9 = arith.constant dense<0.000000e+00> : vector<5x5xf32>
    %19 = tpu.matmul %17, %18, %cst_9 {dimension_numbers = #tpu.dot_dimension_numbers<[1], [1], [0], [0], [0, 0, 1, 0], [], []>} : vector<5x8xbf16>, vector<5x8xbf16>, vector<5x5xf32> -> vector<5x5xf32>
    %cst_10 = arith.constant 0.353553385 : f32
    %20 = vector.broadcast %cst_10 : f32 to vector<5x5xf32>
    %21 = arith.mulf %19, %20 : vector<5x5xf32>
    %c0_11 = arith.constant 0 : index
    %c0_12 = arith.constant 0 : index
    %c0_13 = arith.constant 0 : index
    %22 = vector.load %arg3[%c0_11, %c0_12, %c0_13] : memref<2x5x5xf32, #tpu.memory_space<vmem>>, vector<1x5x5xf32>
    %23 = vector.shape_cast %22 : vector<1x5x5xf32> to vector<5x5xf32>
    %24 = arith.addf %21, %23 : vector<5x5xf32>
    %c0_14 = arith.constant 0 : index
    %c0_15 = arith.constant 0 : index
    %c0_16 = arith.constant 0 : index
    %25 = vector.load %arg9[%c0_14, %c0_15, %c0_16] : memref<2x5x5xf32, #tpu.memory_space<vmem>>, vector<1x5x5xf32>
    %26 = vector.shape_cast %25 : vector<1x5x5xf32> to vector<5x5xf32>
    %27 = vector.shape_cast %24 : vector<5x5xf32> to vector<1x5x5xf32>
    tpu.vector_store %arg9[%c0_14, %c0_15, %c0_16], %27 {strides = array<i32>} : memref<2x5x5xf32, #tpu.memory_space<vmem>>, vector<1x5x5xf32>,
    %cst_17 = arith.constant dense<0xFF800000> : vector<5xf32>
    %28 = vector.multi_reduction <maximumf>, %24, %cst_17 [1] : vector<5x5xf32> to vector<5xf32>
    %29 = vector.shape_cast %28 : vector<5xf32> to vector<5x1xf32>
    %30 = vector.broadcast %29 : vector<5x1xf32> to vector<5x5xf32>
    %31 = arith.subf %24, %30 : vector<5x5xf32>
    %32 = math.exp %31 : vector<5x5xf32>
    %cst_18 = arith.constant dense<0.000000e+00> : vector<5xf32>
    %33 = vector.multi_reduction <add>, %32, %cst_18 [1] : vector<5x5xf32> to vector<5xf32>
    %34 = vector.shape_cast %33 : vector<5xf32> to vector<5x1xf32>
    %35 = tpu.reciprocal %34 {approx = true} : vector<5x1xf32> -> vector<5x1xf32>
    %36 = vector.broadcast %35 : vector<5x1xf32> to vector<5x5xf32>
    %37 = arith.mulf %32, %36 : vector<5x5xf32>
    %38 = arith.truncf %37 : vector<5x5xf32> to vector<5x5xbf16>
    %39 = arith.truncf %16 : vector<5x8xf32> to vector<5x8xbf16>
    %cst_19 = arith.constant dense<0.000000e+00> : vector<5x8xf32>
    %40 = tpu.matmul %38, %39, %cst_19 {dimension_numbers = #tpu.dot_dimension_numbers<[1], [0], [0], [1], [0, 0, 1, 1], [], []>} : vector<5x5xbf16>, vector<5x8xbf16>, vector<5x8xf32> -> vector<5x8xf32>
    %41 = vector.extract_strided_slice %13 {offsets = [0, 8], sizes = [5, 8], strides = [1, 1]} : vector<5x48xf32> to vector<5x8xf32>
    %42 = vector.extract_strided_slice %13 {offsets = [0, 24], sizes = [5, 8], strides = [1, 1]} : vector<5x48xf32> to vector<5x8xf32>
    %43 = vector.extract_strided_slice %13 {offsets = [0, 40], sizes = [5, 8], strides = [1, 1]} : vector<5x48xf32> to vector<5x8xf32>
    %44 = arith.truncf %41 : vector<5x8xf32> to vector<5x8xbf16>
    %45 = arith.truncf %42 : vector<5x8xf32> to vector<5x8xbf16>
    %cst_20 = arith.constant dense<0.000000e+00> : vector<5x5xf32>
    %46 = tpu.matmul %44, %45, %cst_20 {dimension_numbers = #tpu.dot_dimension_numbers<[1], [1], [0], [0], [0, 0, 1, 0], [], []>} : vector<5x8xbf16>, vector<5x8xbf16>, vector<5x5xf32> -> vector<5x5xf32>
    %cst_21 = arith.constant 0.353553385 : f32
    %47 = vector.broadcast %cst_21 : f32 to vector<5x5xf32>
    %48 = arith.mulf %46, %47 : vector<5x5xf32>
    %c1_22 = arith.constant 1 : index
    %c0_23 = arith.constant 0 : index
    %c0_24 = arith.constant 0 : index
    %49 = vector.load %arg3[%c1_22, %c0_23, %c0_24] : memref<2x5x5xf32, #tpu.memory_space<vmem>>, vector<1x5x5xf32>
    %50 = vector.shape_cast %49 : vector<1x5x5xf32> to vector<5x5xf32>
    %51 = arith.addf %48, %50 : vector<5x5xf32>
    %c1_25 = arith.constant 1 : index
    %c0_26 = arith.constant 0 : index
    %c0_27 = arith.constant 0 : index
    %52 = vector.load %arg9[%c1_25, %c0_26, %c0_27] : memref<2x5x5xf32, #tpu.memory_space<vmem>>, vector<1x5x5xf32>
    %53 = vector.shape_cast %52 : vector<1x5x5xf32> to vector<5x5xf32>
    %54 = vector.shape_cast %51 : vector<5x5xf32> to vector<1x5x5xf32>
    tpu.vector_store %arg9[%c1_25, %c0_26, %c0_27], %54 {strides = array<i32>} : memref<2x5x5xf32, #tpu.memory_space<vmem>>, vector<1x5x5xf32>,
    %cst_28 = arith.constant dense<0xFF800000> : vector<5xf32>
    %55 = vector.multi_reduction <maximumf>, %51, %cst_28 [1] : vector<5x5xf32> to vector<5xf32>
    %56 = vector.shape_cast %55 : vector<5xf32> to vector<5x1xf32>
    %57 = vector.broadcast %56 : vector<5x1xf32> to vector<5x5xf32>
    %58 = arith.subf %51, %57 : vector<5x5xf32>
    %59 = math.exp %58 : vector<5x5xf32>
    %cst_29 = arith.constant dense<0.000000e+00> : vector<5xf32>
    %60 = vector.multi_reduction <add>, %59, %cst_29 [1] : vector<5x5xf32> to vector<5xf32>
    %61 = vector.shape_cast %60 : vector<5xf32> to vector<5x1xf32>
    %62 = tpu.reciprocal %61 {approx = true} : vector<5x1xf32> -> vector<5x1xf32>
    %63 = vector.broadcast %62 : vector<5x1xf32> to vector<5x5xf32>
    %64 = arith.mulf %59, %63 : vector<5x5xf32>
    %65 = arith.truncf %64 : vector<5x5xf32> to vector<5x5xbf16>
    %66 = arith.truncf %43 : vector<5x8xf32> to vector<5x8xbf16>
    %cst_30 = arith.constant dense<0.000000e+00> : vector<5x8xf32>
    %67 = tpu.matmul %65, %66, %cst_30 {dimension_numbers = #tpu.dot_dimension_numbers<[1], [0], [0], [1], [0, 0, 1, 1], [], []>} : vector<5x5xbf16>, vector<5x8xbf16>, vector<5x8xf32> -> vector<5x8xf32>
    %68 = tpu.concatenate %40, %67 in 1 : vector<5x8xf32>, vector<5x8xf32> -> vector<5x16xf32>
    %69 = arith.truncf %68 : vector<5x16xf32> to vector<5x16xbf16>
    %c0_31 = arith.constant 0 : index
    %c0_32 = arith.constant 0 : index
    %70 = vector.load %arg6[%c0_31, %c0_32] : memref<16x16xbf16, #tpu.memory_space<vmem>>, vector<16x16xbf16>
    %cst_33 = arith.constant dense<0.000000e+00> : vector<5x16xf32>
    %71 = tpu.matmul %69, %70, %cst_33 {dimension_numbers = #tpu.dot_dimension_numbers<[1], [0], [0], [1], [0, 0, 1, 1], [], []>} : vector<5x16xbf16>, vector<16x16xbf16>, vector<5x16xf32> -> vector<5x16xf32>
    %c0_34 = arith.constant 0 : index
    %c0_35 = arith.constant 0 : index
    %72 = vector.load %arg7[%c0_34, %c0_35] : memref<1x16xf32, #tpu.memory_space<vmem>>, vector<1x16xf32>
    %73 = vector.broadcast %72 : vector<1x16xf32> to vector<5x16xf32>
    %74 = arith.addf %71, %73 : vector<5x16xf32>
    %75 = arith.addf %7, %74 : vector<5x16xf32>
    %c0_36 = arith.constant 0 : index
    %c0_37 = arith.constant 0 : index
    %c0_38 = arith.constant 0 : index
    %76 = vector.load %arg8[%c0_36, %c0_37, %c0_38] : memref<1x5x16xf32, #tpu.memory_space<vmem>>, vector<1x5x16xf32>
    %77 = vector.shape_cast %76 : vector<1x5x16xf32> to vector<5x16xf32>
    %78 = vector.shape_cast %75 : vector<5x16xf32> to vector<1x5x16xf32>
    tpu.vector_store %arg8[%c0_36, %c0_37, %c0_38], %78 {strides = array<i32>} : memref<1x5x16xf32, #tpu.memory_space<vmem>>, vector<1x5x16xf32>,
    %cst_39 = arith.constant dense<0.000000e+00> : vector<16xf32>
    %79 = vector.multi_reduction <add>, %75, %cst_39 [0] : vector<5x16xf32> to vector<16xf32>
    %80 = vector.shape_cast %79 : vector<16xf32> to vector<1x16xf32>
    %81 = arith.mulf %75, %75 : vector<5x16xf32>
    %cst_40 = arith.constant dense<0.000000e+00> : vector<16xf32>
    %82 = vector.multi_reduction <add>, %81, %cst_40 [0] : vector<5x16xf32> to vector<16xf32>
    %83 = vector.shape_cast %82 : vector<16xf32> to vector<1x16xf32>
    %84 = tpu.concatenate %80, %83 in 0 : vector<1x16xf32>, vector<1x16xf32> -> vector<2x16xf32>
    %c0_41 = arith.constant 0 : index
    %c0_42 = arith.constant 0 : index
    %c0_43 = arith.constant 0 : index
    %85 = vector.load %arg10[%c0_41, %c0_42, %c0_43] : memref<1x2x16xf32, #tpu.memory_space<vmem>>, vector<1x2x16xf32>
    %86 = vector.shape_cast %85 : vector<1x2x16xf32> to vector<2x16xf32>
    %87 = vector.shape_cast %84 : vector<2x16xf32> to vector<1x2x16xf32>
    tpu.vector_store %arg10[%c0_41, %c0_42, %c0_43], %87 {strides = array<i32>} : memref<1x2x16xf32, #tpu.memory_space<vmem>>, vector<1x2x16xf32>,
    return
  }
  func.func @transform_0(%arg0: i32) -> (i32, i32, i32) {
    %c0_i32 = arith.constant 0 : i32
    %c0_i32_0 = arith.constant 0 : i32
    %c0_i32_1 = arith.constant 0 : i32
    return %arg0, %c0_i32, %c0_i32_0 : i32, i32, i32
  }
  func.func @transform_1(%arg0: i32) -> (i32, i32) {
    %c0_i32 = arith.constant 0 : i32
    %c0_i32_0 = arith.constant 0 : i32
    %c0_i32_1 = arith.constant 0 : i32
    return %c0_i32, %c0_i32_0 : i32, i32
  }
  func.func @transform_2(%arg0: i32) -> (i32, i32, i32) {
    %c0_i32 = arith.constant 0 : i32
    %c0_i32_0 = arith.constant 0 : i32
    %c0_i32_1 = arith.constant 0 : i32
    return %arg0, %c0_i32, %c0_i32_0 : i32, i32, i32
  }
  func.func @transform_3(%arg0: i32) -> (i32, i32) {
    %c0_i32 = arith.constant 0 : i32
    %c0_i32_0 = arith.constant 0 : i32
    %c0_i32_1 = arith.constant 0 : i32
    return %c0_i32, %c0_i32_0 : i32, i32
  }
  func.func @transform_4(%arg0: i32) -> (i32, i32) {
    %c0_i32 = arith.constant 0 : i32
    %c0_i32_0 = arith.constant 0 : i32
    %c0_i32_1 = arith.constant 0 : i32
    return %c0_i32, %c0_i32_0 : i32, i32
  }
  func.func @transform_5(%arg0: i32) -> (i32, i32) {
    %c0_i32 = arith.constant 0 : i32
    %c0_i32_0 = arith.constant 0 : i32
    %c0_i32_1 = arith.constant 0 : i32
    return %c0_i32, %c0_i32_0 : i32, i32
  }
  func.func @transform_6(%arg0: i32) -> (i32, i32) {
    %c0_i32 = arith.constant 0 : i32
    %c0_i32_0 = arith.constant 0 : i32
    %c0_i32_1 = arith.constant 0 : i32
    return %c0_i32, %c0_i32_0 : i32, i32
  }
  func.func @transform_7(%arg0: i32) -> (i32, i32, i32) {
    %c0_i32 = arith.constant 0 : i32
    %c0_i32_0 = arith.constant 0 : i32
    %c0_i32_1 = arith.constant 0 : i32
    return %arg0, %c0_i32, %c0_i32_0 : i32, i32, i32
  }
  func.func @transform_8(%arg0: i32) -> (i32, i32, i32) {
    %c0_i32 = arith.constant 0 : i32
    %c0_i32_0 = arith.constant 0 : i32
    %c0_i32_1 = arith.constant 0 : i32
    return %arg0, %c0_i32, %c0_i32_0 : i32, i32, i32
  }
  func.func @transform_9(%arg0: i32) -> (i32, i32, i32) {
    %c0_i32 = arith.constant 0 : i32
    %c0_i32_0 = arith.constant 0 : i32
    %c0_i32_1 = arith.constant 0 : i32
    return %arg0, %c0_i32, %c0_i32_0 : i32, i32, i32
  }
}

module attributes {stable_mosaic.version = 11 : i64} {
  func.func @_head_kernel(%arg0: i32, %arg1: memref<8x80xf32, #tpu.memory_space<vmem>>, %arg2: memref<1x80xf32, #tpu.memory_space<vmem>>, %arg3: memref<1x80xf32, #tpu.memory_space<vmem>>, %arg4: memref<80x8xbf16, #tpu.memory_space<vmem>>, %arg5: memref<1x8xf32, #tpu.memory_space<vmem>>, %arg6: memref<8x1xf32, #tpu.memory_space<vmem>>, %arg7: memref<8x1xf32, #tpu.memory_space<vmem>>, %arg8: memref<8x8xf32, #tpu.memory_space<vmem>>) attributes {dimension_semantics = [#tpu.dimension_semantics<parallel>], iteration_bounds = array<i64: 1>, scalar_prefetch = 0 : i64, scratch_operands = 0 : i64, tpu.core_type = #tpu.core_type<tc>, window_params = [{transform_indices = @transform_0, window_bounds = array<i64: 8, 80>}, {pipeline_mode = #tpu.pipeline_mode<synchronous>, transform_indices = @transform_1, window_bounds = array<i64: 1, 80>}, {pipeline_mode = #tpu.pipeline_mode<synchronous>, transform_indices = @transform_2, window_bounds = array<i64: 1, 80>}, {pipeline_mode = #tpu.pipeline_mode<synchronous>, transform_indices = @transform_3, window_bounds = array<i64: 80, 8>}, {pipeline_mode = #tpu.pipeline_mode<synchronous>, transform_indices = @transform_4, window_bounds = array<i64: 1, 8>}, {transform_indices = @transform_5, window_bounds = array<i64: 8, 1>}, {transform_indices = @transform_6, window_bounds = array<i64: 8, 1>}, {transform_indices = @transform_7, window_bounds = array<i64: 8, 8>}]} {
    %c0 = arith.constant 0 : index
    %c0_0 = arith.constant 0 : index
    %0 = vector.load %arg1[%c0, %c0_0] : memref<8x80xf32, #tpu.memory_space<vmem>>, vector<8x80xf32>
    %c0_1 = arith.constant 0 : index
    %c0_2 = arith.constant 0 : index
    %1 = vector.load %arg2[%c0_1, %c0_2] : memref<1x80xf32, #tpu.memory_space<vmem>>, vector<1x80xf32>
    %2 = vector.broadcast %1 : vector<1x80xf32> to vector<8x80xf32>
    %3 = arith.mulf %0, %2 : vector<8x80xf32>
    %c0_3 = arith.constant 0 : index
    %c0_4 = arith.constant 0 : index
    %4 = vector.load %arg3[%c0_3, %c0_4] : memref<1x80xf32, #tpu.memory_space<vmem>>, vector<1x80xf32>
    %5 = vector.broadcast %4 : vector<1x80xf32> to vector<8x80xf32>
    %6 = arith.addf %3, %5 : vector<8x80xf32>
    %7 = arith.truncf %6 : vector<8x80xf32> to vector<8x80xbf16>
    %c0_5 = arith.constant 0 : index
    %c0_6 = arith.constant 0 : index
    %8 = vector.load %arg4[%c0_5, %c0_6] : memref<80x8xbf16, #tpu.memory_space<vmem>>, vector<80x8xbf16>
    %cst = arith.constant dense<0.000000e+00> : vector<8x8xf32>
    %9 = tpu.matmul %7, %8, %cst {dimension_numbers = #tpu.dot_dimension_numbers<[1], [0], [0], [1], [0, 0, 1, 1], [], []>} : vector<8x80xbf16>, vector<80x8xbf16>, vector<8x8xf32> -> vector<8x8xf32>
    %c0_7 = arith.constant 0 : index
    %c0_8 = arith.constant 0 : index
    %10 = vector.load %arg5[%c0_7, %c0_8] : memref<1x8xf32, #tpu.memory_space<vmem>>, vector<1x8xf32>
    %11 = vector.broadcast %10 : vector<1x8xf32> to vector<8x8xf32>
    %12 = arith.addf %9, %11 : vector<8x8xf32>
    %c0_9 = arith.constant 0 : index
    %c0_10 = arith.constant 0 : index
    %13 = vector.load %arg6[%c0_9, %c0_10] : memref<8x1xf32, #tpu.memory_space<vmem>>, vector<8x1xf32>
    %14 = vector.broadcast %13 : vector<8x1xf32> to vector<8x8xf32>
    %15 = arith.mulf %12, %14 : vector<8x8xf32>
    %c0_11 = arith.constant 0 : index
    %c0_12 = arith.constant 0 : index
    %16 = vector.load %arg7[%c0_11, %c0_12] : memref<8x1xf32, #tpu.memory_space<vmem>>, vector<8x1xf32>
    %17 = vector.broadcast %16 : vector<8x1xf32> to vector<8x8xf32>
    %18 = arith.addf %15, %17 : vector<8x8xf32>
    %c0_13 = arith.constant 0 : index
    %c0_14 = arith.constant 0 : index
    %19 = vector.load %arg8[%c0_13, %c0_14] : memref<8x8xf32, #tpu.memory_space<vmem>>, vector<8x8xf32>
    tpu.vector_store %arg8[%c0_13, %c0_14], %18 {strides = array<i32>} : memref<8x8xf32, #tpu.memory_space<vmem>>, vector<8x8xf32>,
    return
  }
  func.func @transform_0(%arg0: i32) -> (i32, i32) {
    %c0_i32 = arith.constant 0 : i32
    %c0_i32_0 = arith.constant 0 : i32
    return %arg0, %c0_i32 : i32, i32
  }
  func.func @transform_1(%arg0: i32) -> (i32, i32) {
    %c0_i32 = arith.constant 0 : i32
    %c0_i32_0 = arith.constant 0 : i32
    %c0_i32_1 = arith.constant 0 : i32
    return %c0_i32, %c0_i32_0 : i32, i32
  }
  func.func @transform_2(%arg0: i32) -> (i32, i32) {
    %c0_i32 = arith.constant 0 : i32
    %c0_i32_0 = arith.constant 0 : i32
    %c0_i32_1 = arith.constant 0 : i32
    return %c0_i32, %c0_i32_0 : i32, i32
  }
  func.func @transform_3(%arg0: i32) -> (i32, i32) {
    %c0_i32 = arith.constant 0 : i32
    %c0_i32_0 = arith.constant 0 : i32
    %c0_i32_1 = arith.constant 0 : i32
    return %c0_i32, %c0_i32_0 : i32, i32
  }
  func.func @transform_4(%arg0: i32) -> (i32, i32) {
    %c0_i32 = arith.constant 0 : i32
    %c0_i32_0 = arith.constant 0 : i32
    %c0_i32_1 = arith.constant 0 : i32
    return %c0_i32, %c0_i32_0 : i32, i32
  }
  func.func @transform_5(%arg0: i32) -> (i32, i32) {
    %c0_i32 = arith.constant 0 : i32
    %c0_i32_0 = arith.constant 0 : i32
    return %arg0, %c0_i32 : i32, i32
  }
  func.func @transform_6(%arg0: i32) -> (i32, i32) {
    %c0_i32 = arith.constant 0 : i32
    %c0_i32_0 = arith.constant 0 : i32
    return %arg0, %c0_i32 : i32, i32
  }
  func.func @transform_7(%arg0: i32) -> (i32, i32) {
    %c0_i32 = arith.constant 0 : i32
    %c0_i32_0 = arith.constant 0 : i32
    return %arg0, %c0_i32 : i32, i32
  }
}

</mosaic_0001>

<bundles_post_ra>
// kernel: _lambda_.7
= control target key start
LH: loop header
LB: loop body
LE: loop exit
PB: predicated region body
PF: predicated region fallthrough
CT: control target
= control target key end

     0   :  { %vm42_vm0 = vcmask 1044480   ;;  %vm29_vm1 = vcmask 39936   ;;  %v664_v50 = vmov 683565275   ;;  %v665_v52 = vmov 2475754826   ;;  %s1081_s2 = inlined_call_operand.vmem [shape: f32[5,8], index: 2, kind: input, shape index: {}]   ;;  %s1082_s0 = inlined_call_operand.vmem [shape: f32[32,5], index: 0, kind: input, shape index: {}]   ;;  %s1083_s3 = inlined_call_operand.vmem [shape: f32[1,8], index: 3, kind: input, shape index: {}]   ;;  %s1084_s1 = inlined_call_operand.vmem [shape: f32[32,4], index: 1, kind: input, shape index: {}]   ;;  %s1085_s4 = inlined_call_operand.vmem [shape: f32[32,4], index: 4, kind: output, shape index: {}]  }
   0x1   :  { %v21_v0 = vld [vmem:[%s1081_s2] sm:$0x1f]  ;;  %v19_v2 = vld [vmem:[%s1082_s0 + $0x10] sm:$0xff]  ;;  %v18_v3 = vld [vmem:[%s1082_s0 + $0x8] sm:$0xff]  ;;  %v666_v54 = vmov 2131351028  }
   0x2   :  { %v17_v1 = vld [vmem:[%s1082_s0] sm:$0xff]  ;;  %616 = vmatprep.subr.msk.mxu0 %vm42_vm0, %v21_v0  ;;  %624 = vmatprep.subr.msk.mxu1 %vm42_vm0, %v21_v0  ;;  %v20_v4 = vld [vmem:[%s1082_s0 + $0x18] sm:$0xff]  ;;  %v667_v58 = vmov 2102212464   ;;  %v668_v61 = vmov 920167782  }
   0x3   :  { %617 = vmatpush3.msk.msra.mxu0 %vm42_vm0, %v21_v0  ;;  %625 = vmatpush3.msk.msra.mxu1 %vm42_vm0, %v21_v0  ;;  %v589_v5 = vld [vmem:[%s1083_s3] ss:$0 sm:$0xff]  ;;  %v669_v0 = vmov 1326507024  }
   0x4   :  { %618 = vmatprep.mubr.msk.f32.mxu0 %vm29_vm1, %v17_v1  ;;  %621 = vmatprep.mubr.msk.f32.mxu1 %vm29_vm1, %v19_v2 }
   0x5   :  { %619 = vmatmul.mubr.msk.f32.vlgmr.msra.gmra.mxu0 %vm29_vm1, %v18_v3  ;;  %622 = vmatmul.mubr.msk.f32.vlgmr.msra.gmra.mxu1 %vm29_vm1, %v20_v4 }
  0xc5   :  { %v620_v6 = vpop.f32.mrf.mxu0  ;;  %v623_v7 = vpop.f32.mrf.mxu1 }
  0xc6   :  { %v713_v8 = vadd.f32 %v620_v6, %v589_v5  ;;  %v715_v9 = vadd.f32 %v623_v7, %v589_v5 }
  0xc7   :  { %v112_v10 = vpop.f32.mrf.mxu0  ;;  %v122_v11 = vpop.f32.mrf.mxu1 }
  0xc8   :  { %v449_v12 = vand.u32 2139095040, %v715_v9  ;;  %v718_v13 = vadd.f32 %v589_v5, %v112_v10  ;;  %v720_v14 = vadd.f32 %v589_v5, %v122_v11  ;;  %v241_v15 = vand.u32 2139095040, %v713_v8 }
  0xc9   :  { %v446_v44 = vand.u32 2147483647, %v715_v9 }
  0xca   :  { %v450_v16 = vshrl.u32 %v449_v12, 23  ;;  %v137_v17 = vand.u32 2139095040, %v718_v13  ;;  %v345_v18 = vand.u32 2139095040, %v720_v14  ;;  %v342_v19 = vand.u32 2147483647, %v720_v14 }
  0xcb   :  { %v134_v20 = vand.u32 2147483647, %v718_v13  ;;  %v242_v24 = vshrl.u32 %v241_v15, 23  ;;  %vm344_vm1 = vcmp.lt.s32.totalorder %v720_v14, 0 }
  0xcc   :  { %v607_v21 = vadd.s32 4294967169, %v450_v16  ;;  %v138_v22 = vshrl.u32 %v137_v17, 23  ;;  %v346_v23 = vshrl.u32 %v345_v18, 23  ;;  %v349_v28 = vand.u32 8388607, %v342_v19 }
  0xcd   :  { %v141_v29 = vand.u32 8388607, %v134_v20  ;;  %v599_v33 = vadd.s32 4294967169, %v242_v24 }
  0xce   :  { %v456_v25 = vadd.s32 1, %v607_v21  ;;  %v595_v26 = vadd.s32 4294967169, %v138_v22  ;;  %v603_v27 = vadd.s32 4294967169, %v346_v23  ;;  %v350_v34 = vor.u32 8388608, %v349_v28 }
  0xcf   :  { %v142_v36 = vor.u32 8388608, %v141_v29  ;;  %v738_v41 = vadd.s32 1, %v599_v33 }
  0xd0   :  { %vm457_vm2 = vcmp.gt.s32.totalorder %v456_v25, 0  ;;  %v144_v30 = vadd.s32 1, %v595_v26  ;;  %v352_v31 = vadd.s32 1, %v603_v27  ;;  %v740_v43 = vshll.u32 %v350_v34, 8 }
  0xd1   :  { %v731_v32 = vsel %vm457_vm2, %v456_v25, 0  ;;  %v748_v48 = vshll.u32 %v142_v36, 8  ;;  %vm249_vm14 = vcmp.gt.s32.totalorder %v738_v41, 0 }
  0xd2   :  { %v734_v35 = vand.u32 31, %v731_v32  ;;  %vm145_vm3 = vcmp.gt.s32.totalorder %v144_v30, 0  ;;  %vm353_vm4 = vcmp.gt.s32.totalorder %v352_v31, 0 }
  0xd3   :  { %v146_v37 = vsel %vm145_vm3, %v144_v30, 0  ;;  %v354_v38 = vsel %vm353_vm4, %v352_v31, 0 }
  0xd4   :  { %v736_v39 = vand.u32 31, %v146_v37  ;;  %v356_v40 = vand.u32 31, %v354_v38  ;;  %v355_v42 = vshrl.u32 %v354_v38, 5  ;;  %v744_v45 = vsub.s32 32, %v734_v35 }
  0xd5   :  { %v746_v46 = vshrl.u32 %v146_v37, 5 }
  0xd6   :  { %v357_v47 = vsub.s32 32, %v356_v40  ;;  %v149_v49 = vsub.s32 32, %v736_v39  ;;  %v359_v51 = vshll.u32 %v664_v50, %v356_v40  ;;  %v362_v53 = vshll.u32 %v665_v52, %v356_v40 }
  0xd7   :  { %v365_v55 = vshll.u32 %v666_v54, %v356_v40  ;;  %v368_v60 = vshll.u32 %v667_v58, %v356_v40  ;;  %v371_v63 = vshll.u32 %v668_v61, %v356_v40  ;;  %vm374_vm5 = vcmp.lt.s32.totalorder %v355_v42, 1 }
  0xd8   :  { %v360_v56 = vshrl.u32 %v665_v52, %v357_v47  ;;  %v363_v57 = vshrl.u32 %v666_v54, %v357_v47  ;;  %v366_v59 = vshrl.u32 %v667_v58, %v357_v47  ;;  %v369_v62 = vshrl.u32 %v668_v61, %v357_v47 }
  0xd9   :  { %v372_v1 = vshrl.u32 %v669_v0, %v357_v47  ;;  %v358_v2 = vshrl.u32 %v664_v50, %v357_v47  ;;  %vm376_vm6 = vcmp.lt.s32.totalorder %v355_v42, 3  ;;  %vm377_vm7 = vcmp.lt.s32.totalorder %v355_v42, 4 }
  0xda   :  { %v361_v3 = vor.u32 %v360_v56, %v359_v51  ;;  %v364_v4 = vor.u32 %v363_v57, %v362_v53  ;;  %v367_v5 = vor.u32 %v366_v59, %v365_v55  ;;  %v370_v6 = vor.u32 %v369_v62, %v368_v60 }
  0xdb   :  { %v373_v7 = vor.u32 %v372_v1, %v371_v63  ;;  %v152_v21 = vshrl.u32 %v665_v52, %v149_v49  ;;  %vm375_vm8 = vcmp.lt.s32.totalorder %v355_v42, 2  ;;  %v151_v24 = vshll.u32 %v664_v50, %v736_v39 }
  0xdc   :  { %v378_v10 = vsel %vm374_vm5, %v358_v2, %v361_v3  ;;  %v379_v11 = vsel %vm377_vm7, %v367_v5, 2102212464  ;;  %v382_v12 = vsel %vm374_vm5, %v361_v3, %v364_v4  ;;  %v386_v15 = vsel %vm374_vm5, %v364_v4, %v367_v5 }
  0xdd   :  { %v380_v16 = vsel %vm376_vm6, %v364_v4, %v379_v11  ;;  %v383_v17 = vsel %vm377_vm7, %v370_v6, 920167782  ;;  %v387_v18 = vsel %vm377_vm7, %v373_v7, 1326507024  ;;  %v154_v28 = vshll.u32 %v665_v52, %v736_v39 }
  0xde   :  { %v384_v22 = vsel %vm376_vm6, %v367_v5, %v383_v17  ;;  %v388_v23 = vsel %vm376_vm6, %v370_v6, %v387_v18  ;;  %v381_v25 = vsel %vm375_vm8, %v378_v10, %v380_v16  ;;  %v153_v34 = vor.u32 %v152_v21, %v151_v24 }
  0xdf   :  { %v385_v26 = vsel %vm375_vm8, %v382_v12, %v384_v22  ;;  %v389_v27 = vsel %vm375_vm8, %v386_v15, %v388_v23  ;;  %v155_v36 = vshrl.u32 %v666_v54, %v149_v49  ;;  %v157_v37 = vshll.u32 %v666_v54, %v736_v39 }
  0xe0   :  { %v768_v29 = vmul.u32.u64.low %v740_v43, %v389_v27  ;;  %v769_v30 = vmul.u32.u64.high %v740_v43, %v389_v27, %v768_v29  ;;  %v772_v31 = vmul.u32.u64.low %v740_v43, %v385_v26  ;;  %v773_v33 = vmul.u32.u64.high %v740_v43, %v385_v26, %v772_v31 }
  0xe1   :  { %v158_v38 = vshrl.u32 %v667_v58, %v149_v49  ;;  %v150_v40 = vshrl.u32 %v664_v50, %v149_v49  ;;  %v160_v42 = vshll.u32 %v667_v58, %v736_v39  ;;  %v161_v47 = vshrl.u32 %v668_v61, %v149_v49 }
  0xe2   :  { %v164_v51 = vshrl.u32 %v669_v0, %v149_v49  ;;  %v397_v53 = vmul.u32 %v740_v43, %v381_v25  ;;  %v156_v55 = vor.u32 %v155_v36, %v154_v28  ;;  %v163_v57 = vshll.u32 %v668_v61, %v736_v39 }
  0xe3   :  { %v159_v56 = vor.u32 %v158_v38, %v157_v37  ;;  %vm399_vm9 = vc.u32 %v769_v30, %v772_v31  ;;  %v400_v59 = vadd.s32 1, %v773_v33  ;;  %v162_v60 = vor.u32 %v161_v47, %v160_v42 }
  0xe4   :  { %vm166_vm10 = vcmp.lt.s32.totalorder %v746_v46, 1  ;;  %v165_v62 = vor.u32 %v164_v51, %v163_v57  ;;  %vm168_vm11 = vcmp.lt.s32.totalorder %v746_v46, 3  ;;  %vm169_vm12 = vcmp.lt.s32.totalorder %v746_v46, 4 }
  0xe5   :  { %v174_v49 = vsel %vm166_vm10, %v153_v34, %v156_v55  ;;  %v401_v43 = vsel %vm399_vm9, %v400_v59, %v773_v33  ;;  %v171_v63 = vsel %vm169_vm12, %v159_v56, 2102212464  ;;  %v175_v1 = vsel %vm169_vm12, %v162_v60, 920167782 }
  0xe6   :  { %v178_v2 = vsel %vm166_vm10, %v156_v55, %v159_v56  ;;  %v402_v39 = vadd.s32 %v401_v43, %v397_v53  ;;  %vm167_vm13 = vcmp.lt.s32.totalorder %v746_v46, 2  ;;  %v176_v3 = vsel %vm168_vm11, %v159_v56, %v175_v1 }
  0xe7   :  { %v179_v4 = vsel %vm169_vm12, %v165_v62, 1326507024  ;;  %v170_v5 = vsel %vm166_vm10, %v150_v40, %v153_v34  ;;  %v172_v6 = vsel %vm168_vm11, %v156_v55, %v171_v63  ;;  %v177_v7 = vsel %vm167_vm13, %v174_v49, %v176_v3 }
  0xe8   :  { %v180_v10 = vsel %vm168_vm11, %v162_v60, %v179_v4  ;;  %v403_v11 = vadd.s32 536870912, %v402_v39  ;;  %v797_v15 = vmul.u32.u64.low %v748_v48, %v177_v7  ;;  %v798_v16 = vmul.u32.u64.high %v748_v48, %v177_v7, %v797_v15 }
  0xe9   :  { %v181_v12 = vsel %vm167_vm13, %v178_v2, %v180_v10  ;;  %v807_v46 = vshrl.u32 %v731_v32, 5  ;;  %v173_v22 = vsel %vm167_vm13, %v170_v5, %v172_v6  ;;  %v453_v23 = vand.u32 8388607, %v446_v44 }
  0xea   :  { %v802_v17 = vmul.u32.u64.low %v748_v48, %v181_v12  ;;  %v803_v18 = vmul.u32.u64.high %v748_v48, %v181_v12, %v802_v17  ;;  %v404_v21 = vshrl.u32 %v403_v11, 30  ;;  %v464_v24 = vshrl.u32 %v665_v52, %v744_v45 }
  0xeb   :  { %v467_v25 = vshrl.u32 %v666_v54, %v744_v45  ;;  %v473_v26 = vshrl.u32 %v668_v61, %v744_v45  ;;  %v192_v28 = vadd.s32 1, %v798_v16  ;;  %v470_v32 = vshrl.u32 %v667_v58, %v744_v45 }
  0xec   :  { %v405_v27 = vshll.u32 %v404_v21, 30  ;;  %v472_v29 = vshll.u32 %v667_v58, %v734_v35  ;;  %v189_v33 = vmul.u32 %v748_v48, %v173_v22  ;;  %vm191_vm15 = vc.u32 %v803_v18, %v797_v15 }
  0xed   :  { %v466_v34 = vshll.u32 %v665_v52, %v734_v35  ;;  %v476_v36 = vshrl.u32 %v669_v0, %v744_v45  ;;  %v193_v38 = vsel %vm191_vm15, %v192_v28, %v798_v16  ;;  %v469_v40 = vshll.u32 %v666_v54, %v734_v35 }
  0xee   :  { %v829_v37 = vsub.s32 %v402_v39, %v405_v27  ;;  %v474_v42 = vor.u32 %v473_v26, %v472_v29  ;;  %v194_v47 = vadd.s32 %v193_v38, %v189_v33  ;;  %v463_v48 = vshll.u32 %v664_v50, %v734_v35 }
  0xef   :  { %v475_v51 = vshll.u32 %v668_v61, %v734_v35  ;;  %v250_v53 = vsel %vm249_vm14, %v738_v41, 0  ;;  %v468_v56 = vor.u32 %v467_v25, %v466_v34  ;;  %v471_v57 = vor.u32 %v470_v32, %v469_v40 }
  0xf0   :  { %v408_v55 = vsub.s32 0, %v829_v37  ;;  %v195_v59 = vadd.s32 536870912, %v194_v47  ;;  %v465_v60 = vor.u32 %v464_v24, %v463_v48  ;;  %vm481_vm0 = vcmp.lt.s32.totalorder %v807_v46, 4 }
  0xf1   :  { %v477_v62 = vor.u32 %v476_v36, %v475_v51  ;;  %v454_v43 = vor.u32 8388608, %v453_v23  ;;  %v487_v63 = vsel %vm481_vm0, %v474_v42, 920167782  ;;  %v846_v35 = vand.u32 31, %v250_v53 }
  0xf2   :  { %v604_v49 = vmin.u32 %v408_v55, %v829_v37  ;;  %v849_v41 = vshrl.u32 %v195_v59, 30  ;;  %vm478_vm2 = vcmp.lt.s32.totalorder %v807_v46, 1  ;;  %v428_v2 = vsub.s32 4, %v404_v21 }
  0xf3   :  { %vm480_vm3 = vcmp.lt.s32.totalorder %v807_v46, 3  ;;  %v490_v39 = vsel %vm478_vm2, %v468_v56, %v471_v57  ;;  %v486_v4 = vsel %vm478_vm2, %v465_v60, %v468_v56  ;;  %v491_v6 = vsel %vm481_vm0, %v477_v62, 1326507024 }
  0xf4   :  { %v410_v1 = vclz %v604_v49  ;;  %v197_v3 = vshll.u32 %v849_v41, 30  ;;  %v488_v5 = vsel %vm480_vm3, %v471_v57, %v487_v63  ;;  %vm479_vm4 = vcmp.lt.s32.totalorder %v807_v46, 2 }
  0xf5   :  { %v492_v10 = vsel %vm480_vm3, %v474_v42, %v491_v6  ;;  %v494_v11 = vshll.u32 %v454_v43, 8  ;;  %v462_v16 = vshrl.u32 %v664_v50, %v744_v45  ;;  %v483_v17 = vsel %vm481_vm0, %v471_v57, 2102212464 }
  0xf6   :  { %v605_v7 = vadd.s32 4294967294, %v410_v1  ;;  %v865_v12 = vsub.s32 %v194_v47, %v197_v3  ;;  %v493_v22 = vsel %vm479_vm4, %v490_v39, %v492_v10  ;;  %v489_v23 = vsel %vm479_vm4, %v486_v4, %v488_v5 }
  0xf7   :  { %v875_v24 = vmul.u32.u64.low %v494_v11, %v493_v22  ;;  %v876_v25 = vmul.u32.u64.high %v494_v11, %v493_v22, %v875_v24  ;;  %v398_v26 = vadd.s32 %v772_v31, %v769_v30  ;;  %v429_v45 = vsel %vm344_vm1, %v428_v2, %v404_v21 }
  0xf8   :  { %vm606_vm5 = vcmp.lt.s32.totalorder %v605_v7, 0  ;;  %v200_v28 = vsub.s32 0, %v865_v12  ;;  %v482_v33 = vsel %vm478_vm2, %v462_v16, %v465_v60  ;;  %v484_v34 = vsel %vm480_vm3, %v468_v56, %v483_v17 }
  0xf9   :  { %v413_v27 = vsel %vm606_vm5, 0, %v605_v7  ;;  %v888_v38 = vmul.u32.u64.low %v494_v11, %v489_v23  ;;  %v889_v40 = vmul.u32.u64.high %v494_v11, %v489_v23, %v888_v38  ;;  %v238_v30 = vand.u32 2147483647, %v713_v8 }
  0xfa   :  { %v414_v32 = vsub.s32 32, %v413_v27  ;;  %v418_v29 = vsub.s32 4294967266, %v413_v27  ;;  %v596_v36 = vmin.u32 %v200_v28, %v865_v12  ;;  %vm895_vm6 = vcmp.le.f32.partialorder %v342_v19, 0.7853982 }
  0xfb   :  { %v415_v21 = vshll.u32 %v829_v37, %v413_v27  ;;  %v253_v48 = vsub.s32 32, %v846_v35  ;;  %v431_v51 = vsel %vm895_vm6, 0, %v429_v45  ;;  %v485_v56 = vsel %vm479_vm4, %v482_v33, %v484_v34 }
  0xfc   :  { %v416_v42 = vshrl.u32 %v398_v26, %v414_v32  ;;  %v419_v47 = vadd.s32 127, %v418_v29  ;;  %v202_v55 = vclz %v596_v36  ;;  %vm503_vm7 = vc.u32 %v876_v25, %v888_v38 }
  0xfd   :  { %v907_v19 = vshrl.u32 %v250_v53, 5  ;;  %v504_v37 = vadd.s32 1, %v889_v40  ;;  %v910_v49 = vadd.s32 3, %v431_v51  ;;  %v190_v43 = vadd.s32 %v797_v15, %v803_v18 }
  0xfe   :  { %v417_v57 = vor.u32 %v416_v42, %v415_v21  ;;  %v420_v59 = vshll.u32 %v419_v47, 23  ;;  %v597_v60 = vadd.s32 4294967294, %v202_v55  ;;  %v501_v63 = vmul.u32 %v494_v11, %v485_v56 }
  0xff   :  { %v505_v46 = vsel %vm503_vm7, %v504_v37, %v889_v40  ;;  %v245_v1 = vand.u32 8388607, %v238_v30  ;;  %v256_v2 = vshrl.u32 %v665_v52, %v253_v48  ;;  %v255_v7 = vshll.u32 %v664_v50, %v846_v35 }
 0x100   :  { %v421_v62 = vor.u32 4788187, %v420_v59  ;;  %vm598_vm8 = vcmp.lt.s32.totalorder %v597_v60, 0  ;;  %v424_v39 = vcvt.s32.f32 %v417_v57  ;;  %v506_v4 = vadd.s32 %v505_v46, %v501_v63 }
 0x101   :  { %v205_v3 = vsel %vm598_vm8, 0, %v597_v60  ;;  %v258_v15 = vshll.u32 %v665_v52, %v846_v35  ;;  %v259_v11 = vshrl.u32 %v666_v54, %v253_v48  ;;  %v262_v16 = vshrl.u32 %v667_v58, %v253_v48 }
 0x102   :  { %v422_v53 = vand.u32 2147483647, %v421_v62  ;;  %v206_v5 = vsub.s32 32, %v205_v3  ;;  %v210_v6 = vsub.s32 4294967266, %v205_v3  ;;  %v507_v10 = vadd.s32 536870912, %v506_v4 }
 0x103   :  { %v207_v17 = vshll.u32 %v865_v12, %v205_v3  ;;  %v265_v24 = vshrl.u32 %v668_v61, %v253_v48  ;;  %v257_v45 = vor.u32 %v256_v2, %v255_v7  ;;  %v261_v28 = vshll.u32 %v666_v54, %v846_v35 }
 0x104   :  { %v425_v18 = vmul.f32 %v424_v39, %v422_v53  ;;  %v208_v22 = vshrl.u32 %v190_v43, %v206_v5  ;;  %v211_v23 = vadd.s32 127, %v210_v6  ;;  %v926_v27 = vshrl.u32 %v507_v10, 30 }
 0x105   :  { %v264_v29 = vshll.u32 %v667_v58, %v846_v35  ;;  %v268_v33 = vshrl.u32 %v669_v0, %v253_v48  ;;  %vm136_vm9 = vcmp.lt.s32.totalorder %v718_v13, 0  ;;  %v260_v36 = vor.u32 %v259_v11, %v258_v15 }
 0x106   :  { %v426_v26 = vxor.u32 2147483648, %v425_v18  ;;  %v209_v52 = vor.u32 %v208_v22, %v207_v17  ;;  %v212_v32 = vshll.u32 %v211_v23, 23  ;;  %v509_v34 = vshll.u32 %v926_v27, 30 }
 0x107   :  { %v263_v40 = vor.u32 %v262_v16, %v261_v28  ;;  %vm942_vm10 = vcmp.le.f32.partialorder %v134_v20, 0.7853982  ;;  %v266_v0 = vor.u32 %v265_v24, %v264_v29  ;;  %v267_v42 = vshll.u32 %v668_v61, %v846_v35 }
 0x108   :  { %v427_v12 = vsel %vm344_vm1, %v426_v26, %v425_v18  ;;  %v213_v58 = vor.u32 4788187, %v212_v32  ;;  %v948_v47 = vsub.s32 %v506_v4, %v509_v34  ;;  %v246_v51 = vor.u32 8388608, %v245_v1 }
 0x109   :  { %v430_v54 = vsel %vm895_vm6, %v720_v14, %v427_v12  ;;  %vm270_vm11 = vcmp.lt.s32.totalorder %v907_v19, 1  ;;  %v216_v55 = vcvt.s32.f32 %v209_v52  ;;  %v269_v56 = vor.u32 %v268_v33, %v267_v42 }
 0x10a   :  { %648 = vcosq.f32 %v430_v54  ;;  %v214_v31 = vand.u32 2147483647, %v213_v58  ;;  %v512_v20 = vsub.s32 0, %v948_v47  ;;  %v254_v57 = vshrl.u32 %v664_v50, %v253_v48 }
 0x10b   :  { %650 = vsinq.f32 %v430_v54  ;;  %vm273_vm12 = vcmp.lt.s32.totalorder %v907_v19, 4  ;;  %v278_v59 = vsel %vm270_vm11, %v257_v45, %v260_v36  ;;  %vm272_vm13 = vcmp.lt.s32.totalorder %v907_v19, 3 }
 0x10c   :  { %v217_v61 = vmul.f32 %v216_v55, %v214_v31  ;;  %v275_v35 = vsel %vm273_vm12, %v263_v40, 2102212464  ;;  %v279_v60 = vsel %vm273_vm12, %v266_v0, 920167782  ;;  %v608_v37 = vmin.u32 %v512_v20, %v948_v47 }
 0x10d   :  { %vm271_vm14 = vcmp.lt.s32.totalorder %v907_v19, 2  ;;  %v280_v62 = vsel %vm272_vm13, %v263_v40, %v279_v60  ;;  %v282_v50 = vsel %vm270_vm11, %v260_v36, %v263_v40  ;;  %v283_v63 = vsel %vm273_vm12, %v269_v56, 1326507024 }
 0x10e   :  { %v218_v48 = vxor.u32 2147483648, %v217_v61  ;;  %v281_v43 = vsel %vm271_vm14, %v278_v59, %v280_v62  ;;  %v286_v46 = vshll.u32 %v246_v51, 8  ;;  %v220_v1 = vsub.s32 4, %v849_v41 }
 0x10f   :  { %v514_v2 = vclz %v608_v37  ;;  %v274_v53 = vsel %vm270_vm11, %v254_v57, %v257_v45  ;;  %v276_v39 = vsel %vm272_vm13, %v260_v36, %v275_v35  ;;  %v284_v4 = vsel %vm272_vm13, %v266_v0, %v283_v63 }
 0x110   :  { %v219_v3 = vsel %vm136_vm9, %v218_v48, %v217_v61  ;;  %v974_v5 = vmul.u32.u64.low %v286_v46, %v281_v43  ;;  %v975_v6 = vmul.u32.u64.high %v286_v46, %v281_v43, %v974_v5  ;;  %v131_v7 = vlaneseq }
 0x111   :  { %v222_v15 = vsel %vm942_vm10, %v718_v13, %v219_v3  ;;  %v609_v18 = vadd.s32 4294967294, %v514_v2  ;;  %v285_v10 = vsel %vm271_vm14, %v282_v50, %v284_v4  ;;  %v221_v17 = vsel %vm136_vm9, %v220_v1, %v849_v41 }
 0x112   :  { %652 = vcosq.f32 %v222_v15  ;;  %v983_v11 = vmul.u32.u64.low %v286_v46, %v285_v10  ;;  %v984_v16 = vmul.u32.u64.high %v286_v46, %v285_v10, %v983_v11  ;;  %v277_v22 = vsel %vm271_vm14, %v274_v53, %v276_v39 }
 0x113   :  { %654 = vsinq.f32 %v222_v15  ;;  %vm610_vm15 = vcmp.lt.s32.totalorder %v609_v18, 0  ;;  %v436_v23 = vand.u32 3, %v910_v49  ;;  %v296_v26 = vadd.s32 1, %v975_v6 }
 0x114   :  { %v517_v24 = vsel %vm610_vm15, 0, %v609_v18  ;;  %v993_v45 = vand.u32 127, %v131_v7  ;;  %v502_v28 = vadd.s32 %v888_v38, %v876_v25  ;;  %v223_v41 = vsel %vm942_vm10, 0, %v221_v17 }
 0x115   :  { %v518_v52 = vsub.s32 32, %v517_v24  ;;  %v522_v32 = vsub.s32 4294967266, %v517_v24  ;;  %v519_v33 = vshll.u32 %v948_v47, %v517_v24  ;;  %v293_v19 = vmul.u32 %v286_v46, %v277_v22 }
 0x116   :  { %vm295_vm0 = vc.u32 %v984_v16, %v974_v5  ;;  %vm438_vm1 = vcmp.eq.s32.totalorder %v436_v23, 0  ;;  %vm441_vm2 = vcmp.eq.s32.totalorder %v436_v23, 2  ;;  %v227_v58 = vadd.s32 3, %v223_v41 }
 0x117   :  { %v649_v29 = vpop.eup %648  ;;  %v520_v34 = vshrl.u32 %v502_v28, %v518_v52  ;;  %v523_v36 = vadd.s32 127, %v522_v32  ;;  %v297_v40 = vsel %vm295_vm0, %v296_v26, %v975_v6  ;;  %vm437_vm3 = vcmp.lt.s32.totalorder %v436_v23, 2 }
 0x118   :  { %v651_v49 = vpop.eup %650  ;;  %v442_v12 = vxor.u32 2147483648, %v649_v29  ;;  %v298_v38 = vadd.s32 %v297_v40, %v293_v19  ;;  %vm434_vm4 = vweird.f32 %v720_v14  ;;  %vm133_vm5 = vcmp.eq.s32.totalorder %v993_v45, 0 }
 0x119   :  { %v439_v25 = vxor.u32 2147483648, %v651_v49  ;;  %v521_v21 = vor.u32 %v520_v34, %v519_v33  ;;  %v524_v0 = vshll.u32 %v523_v36, 23  ;;  %vm558_vm6 = vcmask 64512  }
 0x11a   :  { %v443_v54 = vsel %vm441_vm2, %v442_v12, %v651_v49  ;;  %v299_v47 = vadd.s32 536870912, %v298_v38  ;;  %v228_v57 = vand.u32 3, %v227_v58  ;;  %vm448_vm8 = vcmp.lt.s32.totalorder %v715_v9, 0 }
 0x11b   :  { %v440_v42 = vsel %vm438_vm1, %v649_v29, %v439_v25  ;;  %v525_v31 = vor.u32 4788187, %v524_v0  ;;  %v528_v61 = vcvt.s32.f32 %v521_v21  ;;  %v532_v1 = vsub.s32 4, %v926_v27 }
 0x11c   :  { %v444_v51 = vsel %vm437_vm3, %v440_v42, %v443_v54  ;;  %v1005_v56 = vshrl.u32 %v299_v47, 30  ;;  %vm233_vm7 = vcmp.eq.s32.totalorder %v228_v57, 2  ;;  %vm230_vm9 = vcmp.eq.s32.totalorder %v228_v57, 0 }
 0x11d   :  { %v445_v55 = vsel %vm434_vm4, nan, %v444_v51  ;;  %v526_v59 = vand.u32 2147483647, %v525_v31  ;;  %vm229_vm10 = vcmp.lt.s32.totalorder %v228_v57, 2  ;;  %vm1016_vm11 = vcmp.le.f32.partialorder %v446_v44, 0.7853982 }
 0x11e   :  { %v552_v20 = vsel %vm133_vm5, %v720_v14, %v445_v55  ;;  %v301_v60 = vshll.u32 %v1005_v56, 30  ;;  %vm226_vm12 = vweird.f32 %v718_v13  ;;  %v533_v18 = vsel %vm448_vm8, %v532_v1, %v926_v27 }
 0x11f   :  { %v565_v35 = vsel %vm558_vm6, %v552_v20, 0.0  ;;  %v653_v37 = vpop.eup %652  ;;  %v529_v62 = vmul.f32 %v528_v61, %v526_v59  ;;  %v535_v22 = vsel %vm1016_vm11, 0, %v533_v18  ;;  %v294_v26 = vadd.s32 %v974_v5, %v984_v16 }
 0x120   :  { %566 = vadd.xlane.f32.xlu1 %v565_v35  ;;  %v655_v50 = vpop.eup %654  ;;  %v234_v48 = vxor.u32 2147483648, %v653_v37  ;;  %v302_v43 = vsub.s32 %v298_v38, %v301_v60  ;;  %v539_v24 = vadd.s32 3, %v535_v22  ;;  %vm538_vm1 = vweird.f32 %v715_v9 }
 0x121   :  { %v231_v63 = vxor.u32 2147483648, %v655_v50  ;;  %v530_v46 = vxor.u32 2147483648, %v529_v62  ;;  %vm240_vm2 = vcmp.lt.s32.totalorder %v713_v8, 0  ;;  %v324_v42 = vsub.s32 4, %v1005_v56 }
 0x122   :  { %v235_v14 = vsel %vm233_vm7, %v234_v48, %v655_v50  ;;  %v304_v2 = vsub.s32 0, %v302_v43  ;;  %v540_v29 = vand.u32 3, %v539_v24  ;;  %vm239_vm3 = vcmp.le.f32.partialorder %v238_v30, 0.7853982 }
 0x123   :  { %v232_v53 = vsel %vm230_vm9, %v653_v37, %v231_v63  ;;  %v531_v3 = vsel %vm448_vm8, %v530_v46, %v529_v62  ;;  %v325_v55 = vsel %vm240_vm2, %v324_v42, %v1005_v56  ;;  %vm330_vm9 = vweird.f32 %v713_v8 }
 0x124   :  { %v236_v4 = vsel %vm229_vm10, %v232_v53, %v235_v14  ;;  %v534_v6 = vsel %vm1016_vm11, %v715_v9, %v531_v3  ;;  %v600_v7 = vmin.u32 %v304_v2, %v302_v43  ;;  %vm545_vm14 = vcmp.eq.s32.totalorder %v540_v29, 2  ;;  %v557_v53 = vld [vmem:[%s1084_s1 + $0x18] sm:$0xff] }
 0x125   :  { %v237_v15 = vsel %vm226_vm12, nan, %v236_v4  ;;  %656 = vcosq.f32 %v534_v6  ;;  %vm542_vm15 = vcmp.eq.s32.totalorder %v540_v29, 0  ;;  %vm541_vm0 = vcmp.lt.s32.totalorder %v540_v29, 2 }
 0x126   :  { %v550_v44 = vsel %vm133_vm5, %v718_v13, %v237_v15  ;;  %658 = vsinq.f32 %v534_v6  ;;  %v306_v10 = vclz %v600_v7  ;;  %v327_v20 = vsel %vm239_vm3, 0, %v325_v55  ;;  %v555_v6 = vld [vmem:[%s1084_s1 + $0x8] sm:$0xff] }
 0x127   :  { %v559_v11 = vsel %vm558_vm6, %v550_v44, 0.0  ;;  %v331_v57 = vadd.s32 3, %v327_v20  ;;  %vm580_vm10 = vcmask 31744  }
 0x128   :  { %560 = vadd.xlane.f32.xlu0 %v559_v11  ;;  %v601_v17 = vadd.s32 4294967294, %v306_v10 }
 0x12a   :  { %vm602_vm13 = vcmp.lt.s32.totalorder %v601_v17, 0 }
 0x12b   :  { %v309_v23 = vsel %vm602_vm13, 0, %v601_v17 }
 0x12c   :  { %v310_v13 = vsub.s32 32, %v309_v23  ;;  %v314_v28 = vsub.s32 4294967266, %v309_v23  ;;  %v311_v52 = vshll.u32 %v302_v43, %v309_v23  ;;  %v556_v43 = vld [vmem:[%s1084_s1 + $0x10] sm:$0xff] }
 0x12e   :  { %v312_v32 = vshrl.u32 %v294_v26, %v310_v13  ;;  %v315_v27 = vadd.s32 127, %v314_v28 }
 0x130   :  { %v313_v41 = vor.u32 %v312_v32, %v311_v52  ;;  %v316_v33 = vshll.u32 %v315_v27, 23 }
 0x132   :  { %v657_v19 = vpop.eup %656  ;;  %v317_v49 = vor.u32 4788187, %v316_v33  ;;  %v320_v25 = vcvt.s32.f32 %v313_v41 }
 0x133   :  { %v659_v12 = vpop.eup %658  ;;  %v546_v34 = vxor.u32 2147483648, %v657_v19 }
 0x134   :  { %v543_v36 = vxor.u32 2147483648, %v659_v12  ;;  %v318_v40 = vand.u32 2147483647, %v317_v49 }
 0x135   :  { %v547_v38 = vsel %vm545_vm14, %v546_v34, %v659_v12 }
 0x136   :  { %v544_v5 = vsel %vm542_vm15, %v657_v19, %v543_v36  ;;  %v321_v16 = vmul.f32 %v320_v25, %v318_v40 }
 0x137   :  { %v548_v54 = vsel %vm541_vm0, %v544_v5, %v547_v38 }
 0x138   :  { %v549_v58 = vsel %vm538_vm1, nan, %v548_v54  ;;  %v322_v21 = vxor.u32 2147483648, %v321_v16 }
 0x139   :  { %v553_v0 = vsel %vm133_vm5, %v715_v9, %v549_v58  ;;  %v332_v9 = vand.u32 3, %v331_v57 }
 0x13a   :  { %v568_v47 = vsel %vm558_vm6, %v553_v0, 0.0  ;;  %v323_v51 = vsel %vm240_vm2, %v322_v21, %v321_v16 }
 0x13b   :  { %569 = vadd.xlane.f32.xlu1 %v568_v47  ;;  %v326_v31 = vsel %vm239_vm3, %v713_v8, %v323_v51  ;;  %vm337_vm4 = vcmp.eq.s32.totalorder %v332_v9, 2  ;;  %vm334_vm7 = vcmp.eq.s32.totalorder %v332_v9, 0  ;;  %vm333_vm8 = vcmp.lt.s32.totalorder %v332_v9, 2 }
 0x13c   :  { %660 = vcosq.f32 %v326_v31 }
 0x13d   :  { %662 = vsinq.f32 %v326_v31 }
 0x149   :  { %v661_v59 = vpop.eup %660 }
 0x14a   :  { %v663_v61 = vpop.eup %662  ;;  %v338_v35 = vxor.u32 2147483648, %v661_v59 }
 0x14b   :  { %v335_v60 = vxor.u32 2147483648, %v663_v61 }
 0x14c   :  { %v339_v37 = vsel %vm337_vm4, %v338_v35, %v663_v61 }
 0x14d   :  { %v336_v30 = vsel %vm334_vm7, %v661_v59, %v335_v60 }
 0x14e   :  { %v340_v62 = vsel %vm333_vm8, %v336_v30, %v339_v37 }
 0x14f   :  { %v341_v50 = vsel %vm330_vm9, nan, %v340_v62 }
 0x150   :  { %v551_v56 = vsel %vm133_vm5, %v713_v8, %v341_v50  ;;  %v554_v8 = vld [vmem:[%s1084_s1] sm:$0xff] }
 0x151   :  { %v562_v48 = vsel %vm558_vm6, %v551_v56, 0.0 }
 0x152   :  { %563 = vadd.xlane.f32.xlu0 %v562_v48 }
 0x1a9   :  { %v567_v63 = vpop.xlane.xlu1 %566 }
 0x1aa   :  { %v574_v46 = vmul.f32 0.125, %v567_v63 }
 0x1ac   :  { %v578_v14 = vadd.f32 %v574_v46, %v556_v43 }
 0x1ae   :  { %583 = vst.msk [vmem:[%s1085_s4 + $0x10] sm:$0xff] %vm580_vm10, %v578_v14 }
 0x1b1   :  { %v561_v45 = vpop.xlane.xlu0 %560 }
 0x1b2   :  { %v572_v1 = vmul.f32 0.125, %v561_v45 }
 0x1b4   :  { %v576_v2 = vadd.f32 %v572_v1, %v554_v8 }
 0x1b6   :  { %581 = vst.msk [vmem:[%s1085_s4] sm:$0xff] %vm580_vm10, %v576_v2 }
 0x1c4   :  { %v570_v39 = vpop.xlane.xlu1 %569 }
 0x1c5   :  { %v575_v3 = vmul.f32 0.125, %v570_v39 }
 0x1c7   :  { %v579_v4 = vadd.f32 %v575_v3, %v557_v53 }
 0x1c9   :  { %584 = vst.msk [vmem:[%s1085_s4 + $0x18] sm:$0xff] %vm580_vm10, %v579_v4 }
 0x1db   :  { %v564_v7 = vpop.xlane.xlu0 %563 }
 0x1dc   :  { %v573_v15 = vmul.f32 0.125, %v564_v7 }
 0x1de   :  { %v577_v44 = vadd.f32 %v573_v15, %v555_v6 }
 0x1e0   :  { %582 = vst.msk [vmem:[%s1085_s4 + $0x8] sm:$0xff] %vm580_vm10, %v577_v44 }

// kernel: _lambda_.8
= control target key start
LH: loop header
LB: loop body
LE: loop exit
PB: predicated region body
PF: predicated region fallthrough
CT: control target
= control target key end

     0   :  { %vm30_vm0 = vcmask 1043456   ;;  %v823_v1 = vmov 0.0   ;;  %vm824_vm1 = vmmov 0   ;;  %vm26_vm2 = vcmask 31744   ;;  %s825_s19 = smov 124   ;;  %s826_s20 = smov 116   ;;  %s1093_s0 = inlined_call_operand.vmem [shape: f32[8,20], index: 0, kind: input, shape index: {}]   ;;  %s1094_s1 = inlined_call_operand.vmem [shape: f32[4,16], index: 1, kind: input, shape index: {}]   ;;  %s1095_s2 = inlined_call_operand.vmem [shape: f32[1,16], index: 2, kind: input, shape index: {}]   ;;  %s1096_s3 = inlined_call_operand.vmem [shape: f32[5,16], index: 3, kind: input, shape index: {}]   ;;  %s1097_s4 = inlined_call_operand.vmem [shape: f32[8,5,16], index: 4, kind: output, shape index: {}]  }
   0x1   :  { %v17_v0 = vld [vmem:[%s1093_s0] sm:$0xff]  ;;  %791 = vmatprep.subr.mxu0 %v823_v1  ;;  %793 = vmatprep.mubr.msk.f32.mxu0 %vm824_vm1, %v823_v1  ;;  %s827_s0 = smov 120   ;;  %v829_v7 = vmov 1966171168   ;;  %v115_v9 = vlaneseq  ;;  %vm168_vm3 = vcmask 122880  }
   0x2   :  { %v18_v2 = vld [vmem:[%s1094_s1] sm:$0xf]  ;;  %177 = vrot.lane.b32.xlu0 %v17_v0, %s825_s19  ;;  %469 = vrot.lane.b32.xlu1 %v17_v0, %s826_s20  ;;  %s828_s1 = smov 112   ;;  %v113_v8 = vunpack.c.l.s4 %v829_v7  ;;  %v780_v61 = vld [vmem:[%s1096_s3 + $0x4] ss:$0 sm:$0xff] }
   0x3   :  { %792 = vmatpush3.msk.msra.mxu0 %vm30_vm0, %v18_v2  ;;  %796 = vmatprep.subr.mxu1 %v823_v1  ;;  %v116_v11 = vshrl.u32 %v115_v9, 7  ;;  %v879_v12 = vld [vmem:[%s1095_s2] ss:$0 sm:$0xff]  ;;  %v771_v33 = vld [vmem:[%s1096_s3 + $0x1] ss:$0 sm:$0xff] }
   0x4   :  { %794 = vmatmul.mubr.msk.f32.vlgmr.msra.gmra.mxu0 %vm26_vm2, %v17_v0  ;;  %797 = vmatpush3.msk.msra.mxu1 %vm30_vm0, %v18_v2  ;;  %v114_v10 = vunpack.c.0.s8 %v113_v8  ;;  %v768_v14 = vld [vmem:[%s1096_s3] ss:$0 sm:$0xff]  ;;  %v774_v38 = vld [vmem:[%s1096_s3 + $0x2] ss:$0 sm:$0xff]  ;;  %v777_v44 = vld [vmem:[%s1096_s3 + $0x3] ss:$0 sm:$0xff] }
   0x5   :  { %798 = vmatprep.mubr.msk.f32.mxu1 %vm824_vm1, %v823_v1  ;;  %801 = vmatprep.subr.mxu0 %v823_v1 }
   0x6   :  { %323 = vrot.lane.b32.xlu0 %v17_v0, %s827_s0  ;;  %615 = vrot.lane.b32.xlu1 %v17_v0, %s828_s1  ;;  %v885_v16 = vsub.s32 %v114_v10, %v116_v11 }
   0x7   :  { %802 = vmatpush3.msk.msra.mxu0 %vm30_vm0, %v18_v2  ;;  %806 = vmatprep.subr.mxu1 %v823_v1 }
   0x8   :  { %803 = vmatprep.mubr.msk.f32.mxu0 %vm824_vm1, %v823_v1  ;;  %811 = vmatprep.subr.mxu0 %v823_v1 }
  0x74   :  { %v178_v3 = vpop.permute.xlu0 %177  ;;  %v470_v4 = vpop.permute.xlu1 %469 }
  0x75   :  { %799 = vmatmul.mubr.msk.f32.vlgmr.msra.gmra.mxu1 %vm26_vm2, %v178_v3 }
  0x76   :  { %807 = vmatpush3.msk.msra.mxu1 %vm30_vm0, %v18_v2  ;;  %808 = vmatprep.mubr.msk.f32.mxu1 %vm824_vm1, %v823_v1 }
  0x78   :  { %v324_v5 = vpop.permute.xlu0 %323  ;;  %v616_v6 = vpop.permute.xlu1 %615 }
  0x79   :  { %804 = vmatmul.mubr.msk.f32.vlgmr.msra.gmra.mxu0 %vm26_vm2, %v324_v5  ;;  %809 = vmatmul.mubr.msk.f32.vlgmr.msra.gmra.mxu1 %vm26_vm2, %v470_v4 }
  0x7a   :  { %812 = vmatpush3.msk.msra.mxu0 %vm30_vm0, %v18_v2  ;;  %813 = vmatprep.mubr.msk.f32.mxu0 %vm824_vm1, %v823_v1 }
  0x7d   :  { %814 = vmatmul.mubr.msk.f32.vlgmr.msra.gmra.mxu0 %vm26_vm2, %v616_v6 }
  0xc4   :  { %v100_v13 = vpop.f32.mrf.mxu0 }
  0xc5   :  { %v101_v15 = vadd.f32 %v879_v12, %v100_v13 }
  0xc6   :  { %v795_v17 = vpop.f32.mrf.mxu0 }
  0xc7   :  { %v109_v18 = vadd.f32 %v768_v14, %v101_v15 }
  0xc9   :  { %v111_v19 = vcombine.high %v109_v18, %v109_v18  ;;  %v118_v20 = vrot.slane %v109_v18, %v885_v16 }
  0xcb   :  { %v125_v21 = vrot.slane %v111_v19, %v885_v16  ;;  %v126_v22 = vcombine.high %v118_v20, %v118_v20  ;;  %v134_v23 = vrot.slane %v118_v20, %v885_v16 }
  0xcd   :  { %v127_v24 = vcombine.high %v125_v21, %v125_v21  ;;  %v141_v25 = vrot.slane %v125_v21, %v885_v16  ;;  %v148_v26 = vrot.slane %v126_v22, %v885_v16  ;;  %v156_v27 = vcombine.high %v134_v23, %v134_v23  ;;  %169 = vst.msk [vmem:[%s1097_s4] sm:$0x1] %vm168_vm3, %v134_v23 }
  0xcf   :  { %v155_v28 = vrot.slane %v127_v24, %v885_v16  ;;  %v157_v29 = vcombine.high %v141_v25, %v141_v25  ;;  %v158_v30 = vcombine.high %v148_v26, %v148_v26  ;;  %170 = vst.msk [vmem:[%s1097_s4 + $0x8] sm:$0x1] %vm168_vm3, %v148_v26  ;;  %171 = vst.msk [vmem:[%s1097_s4 + $0x10] sm:$0x1] %vm168_vm3, %v156_v27 }
  0xd0   :  { %173 = vst.msk [vmem:[%s1097_s4 + $0x20] sm:$0x1] %vm168_vm3, %v141_v25 }
  0xd1   :  { %v159_v31 = vcombine.high %v155_v28, %v155_v28  ;;  %172 = vst.msk [vmem:[%s1097_s4 + $0x18] sm:$0x1] %vm168_vm3, %v158_v30  ;;  %174 = vst.msk [vmem:[%s1097_s4 + $0x28] sm:$0x1] %vm168_vm3, %v155_v28 }
  0xd2   :  { %175 = vst.msk [vmem:[%s1097_s4 + $0x30] sm:$0x1] %vm168_vm3, %v157_v29 }
  0xd3   :  { %176 = vst.msk [vmem:[%s1097_s4 + $0x38] sm:$0x1] %vm168_vm3, %v159_v31 }
 0x135   :  { %v247_v32 = vpop.f32.mrf.mxu1 }
 0x136   :  { %v248_v34 = vadd.f32 %v879_v12, %v247_v32 }
 0x137   :  { %v800_v35 = vpop.f32.mrf.mxu1 }
 0x138   :  { %v256_v36 = vadd.f32 %v771_v33, %v248_v34 }
 0x139   :  { %v393_v37 = vpop.f32.mrf.mxu0  ;;  %v539_v39 = vpop.f32.mrf.mxu1 }
 0x13a   :  { %v258_v40 = vcombine.high %v256_v36, %v256_v36  ;;  %v265_v41 = vrot.slane %v256_v36, %v885_v16  ;;  %v394_v42 = vadd.f32 %v879_v12, %v393_v37  ;;  %v540_v43 = vadd.f32 %v879_v12, %v539_v39 }
 0x13b   :  { %v805_v45 = vpop.f32.mrf.mxu0  ;;  %v810_v46 = vpop.f32.mrf.mxu1 }
 0x13c   :  { %v272_v47 = vrot.slane %v258_v40, %v885_v16  ;;  %v273_v48 = vcombine.high %v265_v41, %v265_v41  ;;  %v281_v49 = vrot.slane %v265_v41, %v885_v16  ;;  %v402_v50 = vadd.f32 %v774_v38, %v394_v42 }
 0x13d   :  { %v548_v51 = vadd.f32 %v777_v44, %v540_v43  ;;  %v685_v52 = vpop.f32.mrf.mxu0 }
 0x13e   :  { %v274_v53 = vcombine.high %v272_v47, %v272_v47  ;;  %v288_v54 = vrot.slane %v272_v47, %v885_v16  ;;  %v295_v55 = vrot.slane %v273_v48, %v885_v16  ;;  %v303_v56 = vcombine.high %v281_v49, %v281_v49  ;;  %315 = vst.msk [vmem:[%s1097_s4 + $0x1] sm:$0x1] %vm168_vm3, %v281_v49 }
 0x13f   :  { %v404_v57 = vcombine.high %v402_v50, %v402_v50  ;;  %v411_v58 = vrot.slane %v402_v50, %v885_v16  ;;  %v550_v59 = vcombine.high %v548_v51, %v548_v51  ;;  %v557_v60 = vrot.slane %v548_v51, %v885_v16  ;;  %v815_v62 = vpop.f32.mrf.mxu0 }
 0x140   :  { %v302_v63 = vrot.slane %v274_v53, %v885_v16  ;;  %v304_v0 = vcombine.high %v288_v54, %v288_v54  ;;  %v305_v1 = vcombine.high %v295_v55, %v295_v55  ;;  %316 = vst.msk [vmem:[%s1097_s4 + $0x9] sm:$0x1] %vm168_vm3, %v295_v55  ;;  %317 = vst.msk [vmem:[%s1097_s4 + $0x11] sm:$0x1] %vm168_vm3, %v303_v56 }
 0x141   :  { %319 = vst.msk [vmem:[%s1097_s4 + $0x21] sm:$0x1] %vm168_vm3, %v288_v54  ;;  %v686_v2 = vadd.f32 %v879_v12, %v685_v52  ;;  %v418_v3 = vrot.slane %v404_v57, %v885_v16  ;;  %v419_v4 = vcombine.high %v411_v58, %v411_v58  ;;  %v427_v5 = vrot.slane %v411_v58, %v885_v16 }
 0x142   :  { %v564_v6 = vrot.slane %v550_v59, %v885_v16  ;;  %v306_v7 = vcombine.high %v302_v63, %v302_v63  ;;  %318 = vst.msk [vmem:[%s1097_s4 + $0x19] sm:$0x1] %vm168_vm3, %v305_v1  ;;  %320 = vst.msk [vmem:[%s1097_s4 + $0x29] sm:$0x1] %vm168_vm3, %v302_v63  ;;  %v565_v8 = vcombine.high %v557_v60, %v557_v60 }
 0x143   :  { %321 = vst.msk [vmem:[%s1097_s4 + $0x31] sm:$0x1] %vm168_vm3, %v304_v0  ;;  %v573_v9 = vrot.slane %v557_v60, %v885_v16  ;;  %v694_v10 = vadd.f32 %v780_v61, %v686_v2  ;;  %v420_v11 = vcombine.high %v418_v3, %v418_v3  ;;  %v434_v12 = vrot.slane %v418_v3, %v885_v16 }
 0x144   :  { %v441_v13 = vrot.slane %v419_v4, %v885_v16  ;;  %v449_v14 = vcombine.high %v427_v5, %v427_v5  ;;  %461 = vst.msk [vmem:[%s1097_s4 + $0x2] sm:$0x1] %vm168_vm3, %v427_v5  ;;  %322 = vst.msk [vmem:[%s1097_s4 + $0x39] sm:$0x1] %vm168_vm3, %v306_v7  ;;  %v566_v15 = vcombine.high %v564_v6, %v564_v6 }
 0x145   :  { %v580_v17 = vrot.slane %v564_v6, %v885_v16  ;;  %v587_v18 = vrot.slane %v565_v8, %v885_v16  ;;  %v595_v19 = vcombine.high %v573_v9, %v573_v9  ;;  %607 = vst.msk [vmem:[%s1097_s4 + $0x3] sm:$0x1] %vm168_vm3, %v573_v9  ;;  %v448_v20 = vrot.slane %v420_v11, %v885_v16 }
 0x146   :  { %v450_v21 = vcombine.high %v434_v12, %v434_v12  ;;  %v451_v22 = vcombine.high %v441_v13, %v441_v13  ;;  %462 = vst.msk [vmem:[%s1097_s4 + $0xa] sm:$0x1] %vm168_vm3, %v441_v13  ;;  %463 = vst.msk [vmem:[%s1097_s4 + $0x12] sm:$0x1] %vm168_vm3, %v449_v14  ;;  %v696_v23 = vcombine.high %v694_v10, %v694_v10 }
 0x147   :  { %465 = vst.msk [vmem:[%s1097_s4 + $0x22] sm:$0x1] %vm168_vm3, %v434_v12  ;;  %v594_v24 = vrot.slane %v566_v15, %v885_v16  ;;  %v596_v25 = vcombine.high %v580_v17, %v580_v17  ;;  %v597_v26 = vcombine.high %v587_v18, %v587_v18  ;;  %608 = vst.msk [vmem:[%s1097_s4 + $0xb] sm:$0x1] %vm168_vm3, %v587_v18 }
 0x148   :  { %609 = vst.msk [vmem:[%s1097_s4 + $0x13] sm:$0x1] %vm168_vm3, %v595_v19  ;;  %611 = vst.msk [vmem:[%s1097_s4 + $0x23] sm:$0x1] %vm168_vm3, %v580_v17  ;;  %v703_v27 = vrot.slane %v694_v10, %v885_v16  ;;  %v452_v28 = vcombine.high %v448_v20, %v448_v20  ;;  %v710_v29 = vrot.slane %v696_v23, %v885_v16 }
 0x149   :  { %464 = vst.msk [vmem:[%s1097_s4 + $0x1a] sm:$0x1] %vm168_vm3, %v451_v22  ;;  %466 = vst.msk [vmem:[%s1097_s4 + $0x2a] sm:$0x1] %vm168_vm3, %v448_v20  ;;  %v598_v30 = vcombine.high %v594_v24, %v594_v24 }
 0x14a   :  { %467 = vst.msk [vmem:[%s1097_s4 + $0x32] sm:$0x1] %vm168_vm3, %v450_v21  ;;  %610 = vst.msk [vmem:[%s1097_s4 + $0x1b] sm:$0x1] %vm168_vm3, %v597_v26  ;;  %v711_v31 = vcombine.high %v703_v27, %v703_v27  ;;  %v719_v32 = vrot.slane %v703_v27, %v885_v16  ;;  %v712_v33 = vcombine.high %v710_v29, %v710_v29 }
 0x14b   :  { %612 = vst.msk [vmem:[%s1097_s4 + $0x2b] sm:$0x1] %vm168_vm3, %v594_v24  ;;  %613 = vst.msk [vmem:[%s1097_s4 + $0x33] sm:$0x1] %vm168_vm3, %v596_v25  ;;  %v726_v34 = vrot.slane %v710_v29, %v885_v16 }
 0x14c   :  { %468 = vst.msk [vmem:[%s1097_s4 + $0x3a] sm:$0x1] %vm168_vm3, %v452_v28  ;;  %614 = vst.msk [vmem:[%s1097_s4 + $0x3b] sm:$0x1] %vm168_vm3, %v598_v30  ;;  %v733_v35 = vrot.slane %v711_v31, %v885_v16  ;;  %v741_v36 = vcombine.high %v719_v32, %v719_v32  ;;  %v740_v37 = vrot.slane %v712_v33, %v885_v16 }
 0x14d   :  { %753 = vst.msk [vmem:[%s1097_s4 + $0x4] sm:$0x1] %vm168_vm3, %v719_v32  ;;  %v742_v38 = vcombine.high %v726_v34, %v726_v34  ;;  %757 = vst.msk [vmem:[%s1097_s4 + $0x24] sm:$0x1] %vm168_vm3, %v726_v34 }
 0x14e   :  { %v743_v39 = vcombine.high %v733_v35, %v733_v35  ;;  %754 = vst.msk [vmem:[%s1097_s4 + $0xc] sm:$0x1] %vm168_vm3, %v733_v35  ;;  %755 = vst.msk [vmem:[%s1097_s4 + $0x14] sm:$0x1] %vm168_vm3, %v741_v36  ;;  %v744_v40 = vcombine.high %v740_v37, %v740_v37 }
 0x14f   :  { %758 = vst.msk [vmem:[%s1097_s4 + $0x2c] sm:$0x1] %vm168_vm3, %v740_v37  ;;  %759 = vst.msk [vmem:[%s1097_s4 + $0x34] sm:$0x1] %vm168_vm3, %v742_v38 }
 0x150   :  { %756 = vst.msk [vmem:[%s1097_s4 + $0x1c] sm:$0x1] %vm168_vm3, %v743_v39  ;;  %760 = vst.msk [vmem:[%s1097_s4 + $0x3c] sm:$0x1] %vm168_vm3, %v744_v40 }

// kernel: tile.11
= control target key start
LH: loop header
LB: loop body
LE: loop exit
PB: predicated region body
PF: predicated region fallthrough
CT: control target
= control target key end

     0   :  { %s22_s0 = inlined_call_operand.vmem [shape: f32[16], index: 0, kind: input, shape index: {}]   ;;  %s23_s1 = inlined_call_operand.vmem [shape: f32[5,16], index: 1, kind: output, shape index: {}]  }
   0x1   :  { %v4_v0 = vld [vmem:[%s22_s0] ss:$0 sm:$0xff] }
   0x2   :  { %5 = vst [vmem:[%s23_s1] sm:$0xff] %v4_v0 }

// kernel: tile.12
= control target key start
LH: loop header
LB: loop body
LE: loop exit
PB: predicated region body
PF: predicated region fallthrough
CT: control target
= control target key end

     0   :  { %s45_s10 = smov 64   ;;  %s46_s11 = smov 32   ;;  %vm3_vm0 = vcmask 130048   ;;  %vm9_vm1 = vcmask 654848   ;;  %vm15_vm2 = vcmask 523648   ;;  %vm21_vm3 = vcmask 392448   ;;  %s77_s0 = inlined_call_operand.vmem [shape: f32[5,16], index: 0, kind: input, shape index: {}]   ;;  %s78_s1 = inlined_call_operand.vmem [shape: f32[1,80], index: 1, kind: output, shape index: {}]  }
   0x1   :  { %v37_v0 = vld [vmem:[%s77_s0 + $0x4] sm:$0x1]   ;;  %v39_v1 = vld [vmem:[%s77_s0 + $0x2] sm:$0x1]   ;;  %v38_v2 = vld [vmem:[%s77_s0 + $0x3] sm:$0x1]  }
   0x2   :  { %7 = vrot.lane.b32.xlu0 %v37_v0, %s45_s10  ;;  %19 = vrot.lane.b32.xlu1 %v39_v1, %s46_s11  ;;  %v40_v3 = vld [vmem:[%s77_s0 + $0x1] sm:$0x1]   ;;  %v2_v4 = vld [vmem:[%s77_s0] sm:$0x1]   ;;  %s47_s0 = smov 48   ;;  %s48_s18 = smov 16  }
   0x3   :  { %4 = vst.msk [vmem:[#allocation0] sm:$0x1] %vm3_vm0, %v2_v4   ;;  %vm27_vm4 = vcmask 261248  }
   0x6   :  { %13 = vrot.lane.b32.xlu0 %v38_v2, %s47_s0  ;;  %25 = vrot.lane.b32.xlu1 %v40_v3, %s48_s18 }
  0x74   :  { %v8_v5 = vpop.permute.xlu0 %7   ;;  %v20_v6 = vpop.permute.xlu1 %19  }
  0x75   :  { %10 = vst.msk [vmem:[#allocation0] sm:$0x1] %vm9_vm1, %v8_v5  }
  0x78   :  { %v14_v7 = vpop.permute.xlu0 %13   ;;  %v26_v8 = vpop.permute.xlu1 %25  }
  0x79   :  { %16 = vst.msk [vmem:[#allocation0] sm:$0x1] %vm15_vm2, %v14_v7  }
  0x7a   :  { %22 = vst.msk [vmem:[#allocation0] sm:$0x1] %vm21_vm3, %v20_v6  }
  0x7b   :  { %28 = vst.msk [vmem:[#allocation0] sm:$0x1] %vm27_vm4, %v26_v8  }
  0x82   :  { %v33_v9 = vld [vmem:[#allocation0] sm:$0x1] }
  0x83   :  { %36 = vst [vmem:[%s78_s1] sm:$0x1] %v33_v9 }

// kernel: _lambda_.9
= control target key start
LH: loop header
LB: loop body
LE: loop exit
PB: predicated region body
PF: predicated region fallthrough
CT: control target
= control target key end

     0   :  { %s1071_s30 = smov 0   ;;  %s1172_s0 = inlined_call_operand.vmem [shape: f32[8,5,16], index: 0, kind: input, shape index: {}]   ;;  %s1173_s1 = inlined_call_operand.vmem [shape: f32[2,16], index: 1, kind: input, shape index: {}]   ;;  %s1174_s2 = inlined_call_operand.vmem [shape: f32[16,5,5], index: 2, kind: input, shape index: {}]   ;;  %s1175_s3 = inlined_call_operand.vmem [shape: bf16[16,48], index: 3, kind: input, shape index: {}]   ;;  %s1176_s4 = inlined_call_operand.vmem [shape: f32[1,48], index: 4, kind: input, shape index: {}]   ;;  %s1177_s5 = inlined_call_operand.vmem [shape: bf16[16,16], index: 5, kind: input, shape index: {}]   ;;  %s1178_s6 = inlined_call_operand.vmem [shape: f32[1,16], index: 6, kind: input, shape index: {}]   ;;  %s1179_s7 = inlined_call_operand.vmem [shape: f32[8,5,16], index: 7, kind: output, shape index: {0}]   ;;  %s1180_s8 = inlined_call_operand.vmem [shape: f32[16,5,5], index: 8, kind: output, shape index: {1}]   ;;  %s1181_s9 = inlined_call_operand.vmem [shape: f32[8,2,16], index: 9, kind: output, shape index: {2}]  }
   0x1 LB: > { %s1077_s10 = sadd.s32 4294967295, %s1010_s30   ;;  %p905_p0 = scmp.ge.s32.totalorder %s1010_s30, 1  ;;  %s1010_s30 = sphi %s1071_s30, %s20_s30  }
   0x2   : > { %p302_p1 = scmp.lt.s32.totalorder %s1010_s30, 9 }
   0x4   : > { %p303_p2 = pnand %p905_p0, %p302_p1 }
   0x5   : > { %p350_p3 = scmp.lt.s32.totalorder (!%p303_p2), %s1077_s10, 7  ;;  %s1014_s24 = smov (!%p303_p2), 120  }
   0x6   : > { %306 = sbr.rel (%p303_p2) target bundleno = 1386 (0x56a), region = 48  ;;  %s1015_s25 = smov (!%p303_p2), 112  }
   0x7   : > { %s1016_s26 = smov (!%p303_p2), 104   ;;  %s907_s27 = sshll.u32 (!%p303_p2), %s1077_s10, 1 }
   0x8   : > { %p355_p4 = scmp.lt.s32.totalorder (!%p303_p2), %s907_s27, 15  ;;  %s1018_s18 = smov (!%p303_p2), 88  }
   0x9   : > { %s1020_s21 = smov (!%p303_p2), 8  }
   0xb   : > { %v994_v0 = vld [vmem:[%s1175_s3] sm:$0xff]   ;;  %v1012_v1 = vmov 0.0   ;;  %vm1013_vm0 = vmmov 0   ;;  %s1090_s13 = scalar_select %p350_p3, %s1077_s10, 7  ;;  %vm404_vm1 = vcmask 130048   ;;  %vm452_vm2 = vcmask 64512  }
   0xc   : > { %941 = vmatprep.subr.bf16.mxu0 %v1012_v1  ;;  %947 = vmatprep.subr.bf16.mxu1 %v1012_v1  ;;  %v913_v2 = vld [vmem:[%s1173_s1] ss:$0 sm:$0xff]  ;;  %v914_v4 = vld [vmem:[%s1173_s1 + $0x1] ss:$0 sm:$0xff]  ;;  %s1183_s27 = smov (!%p355_p4, %s907_s27), 15  ;;  %vm502_vm3 = vcmask 36864  }
   0xd   : > { %942 = vmatpush3.bf16.msra.mxu0 %v994_v0  ;;  %943 = vmatprep.mubr.msk.bf16.mxu0 %vm1013_vm0, %v1012_v1  ;;  %s906_s14 = sshll.u32 %s1090_s13, 3  ;;  %v915_v8 = vld [vmem:[%s1176_s4] ss:$0 sm:$0xff]  ;;  %s908_s28 = sshll.u32 %s1183_s27, 3  ;;  %vm522_vm4 = vcmask 1041408   ;;  %vm523_vm5 = vcmask 1042432  }
   0xe   : > { %949 = vmatprep.mubr.msk.bf16.mxu1 %vm1013_vm0, %v1012_v1  ;;  %953 = vmatprep.subr.bf16.mxu0 %v1012_v1  ;;  %s353_s19 = scalar_lea.vmem %s1172_s0, %s906_s14  ;;  %s358_s12 = scalar_lea.vmem %s1174_s2, %s908_s28  ;;  %v1019_v46 = vmov 65535   ;;  %vm518_vm6 = vcmask 39936   ;;  %v995_v61 = vld [vmem:[%s1177_s5] sm:$0xff]   ;;  %vm750_vm7 = vcmask 126976   ;;  %vm767_vm8 = vcmask 1040384  }
   0xf   : > { %v375_v3 = vld [vmem:[%s353_s19] sm:$0x1f]  ;;  %s368_s17 = scalar_lea.vmem %s1180_s8, %s908_s28  ;;  %v921_v29 = vld [vmem:[%s358_s12 + $0x8] sm:$0x1f]  ;;  %s1017_s10 = smov 96   ;;  %v524_v47 = vsel %vm522_vm4, 4294967295, %v1019_v46 }
  0x10   : > { %v382_v5 = vsub.f32 %v375_v3, %v913_v2  ;;  %v500_v21 = vld [vmem:[%s358_s12] sm:$0x1f]  ;;  %v525_v49 = vsel %vm523_vm5, %v524_v47, 0  ;;  %vm769_vm9 = vcmask 123904  }
  0x12   : > { %v1107_v6 = vmul.f32 %v914_v4, %v382_v5 }
  0x14   : > { %v388_v7 = vpack.c.bf16 %v1107_v6, %v1107_v6 }
  0x16   : > { %944 = vmatmul.mubr.msk.bf16.vlgmr.msra.gmra.mxu0 %vm404_vm1, %v388_v7 }
  0x17   : > { %955 = vmatprep.mubr.msk.bf16.mxu0 %vm1013_vm0, %v1012_v1 }
  0xd6   : > { %v442_v9 = vpop.f32.mrf.mxu0 }
  0xd7   : > { %v443_v10 = vadd.f32 %v915_v8, %v442_v9 }
  0xd8   : > { %v945_v11 = vpop.f32.mrf.mxu0 }
  0xd9   : > { %v1117_v12 = vpack.c.bf16 %v443_v10, %v443_v10  ;;  %v924_v10 = vld [vmem:[%s1178_s6] ss:$0 sm:$0xff] }
  0xda   : > { %v445_v13 = vpop.f32.mrf.mxu0 }
  0xdb   : > { %569 = vrot.lane.b32.xlu1 %v1117_v12, %s1014_s24  ;;  %450 = vrot.lane.b32.xlu0 %v1117_v12, %s1015_s25 }
  0xdc   : > { %v946_v14 = vpop.f32.mrf.mxu0 }
  0xdf   : > { %571 = vrot.lane.b32.xlu0 %v1117_v12, %s1016_s26  ;;  %s363_s26 = scalar_lea.vmem %s1179_s7, %s906_s14  ;;  %s912_s14 = sshll.u32 %s1090_s13, 1 }
  0xe0   : > { %s373_s29 = scalar_lea.vmem %s1181_s9, %s912_s14 }
 0x14d   : > { %v451_v15 = vpop.permute.xlu0 %450  ;;  %v570_v19 = vpop.permute.xlu1 %569 }
 0x14e   : > { %v457_v16 = vsel %vm452_vm2, %v451_v15, 0 }
 0x14f   : > { %948 = vmatpush3.bf16.xpose.msra.mxu1 %v457_v16 }
 0x150   : > { %959 = vmatprep.subr.bf16.mxu1 %v1012_v1 }
 0x151   : > { %v572_v17 = vpop.permute.xlu0 %571 }
 0x152   : > { %v577_v18 = vsel %vm452_vm2, %v572_v17, 0 }
 0x156   : > { %950 = vmatmul.mubr.msk.bf16.vlgmr.msra.gmra.mxu1 %vm452_vm2, %v1117_v12 }
 0x157   : > { %960 = vmatpush3.bf16.xpose.msra.mxu1 %v577_v18  ;;  %961 = vmatprep.mubr.msk.bf16.mxu1 %vm1013_vm0, %v1012_v1 }
 0x158   : > { %971 = vmatprep.subr.bf16.mxu1 %v1012_v1 }
 0x15e   : > { %962 = vmatmul.mubr.msk.bf16.vlgmr.msra.gmra.mxu1 %vm452_vm2, %v570_v19 }
 0x15f   : > { %973 = vmatprep.mubr.msk.bf16.mxu1 %vm1013_vm0, %v1012_v1  ;;  %972 = vmatpush3.bf16.msra.mxu1 %v995_v61 }
 0x216   : > { %v493_v20 = vpop.f32.mrf.mxu1 }
 0x217   : > { %v499_v22 = vmul.f32 0.35355338, %v493_v20 }
 0x218   : > { %v951_v23 = vpop.f32.mrf.mxu1 }
 0x219   : > { %v501_v24 = vadd.f32 %v500_v21, %v499_v22 }
 0x21a   : > { %v496_v25 = vpop.f32.mrf.mxu1 }
 0x21b   : > { %503 = vst.msk [vmem:[%s368_s17] sm:$0x1f] %vm502_vm3, %v501_v24  ;;  %v504_v26 = vsel %vm502_vm3, %v501_v24, -inf }
 0x21c   : > { %505 = vmax.xlane.f32.xlu1 %v504_v26  ;;  %v952_v27 = vpop.f32.mrf.mxu1 }
 0x21e   : > { %v613_v28 = vpop.f32.mrf.mxu1 }
 0x21f   : > { %v619_v30 = vmul.f32 0.35355338, %v613_v28 }
 0x220   : > { %v963_v31 = vpop.f32.mrf.mxu1 }
 0x221   : > { %v622_v32 = vadd.f32 %v921_v29, %v619_v30 }
 0x222   : > { %v616_v33 = vpop.f32.mrf.mxu1 }
 0x223   : > { %922 = vst.msk [vmem:[%s368_s17 + $0x8] sm:$0x1f] %vm502_vm3, %v622_v32  ;;  %v625_v34 = vsel %vm502_vm3, %v622_v32, -inf }
 0x224   : > { %626 = vmax.xlane.f32.xlu0 %v625_v34  ;;  %v964_v35 = vpop.f32.mrf.mxu1 }
 0x2a5   : > { %v506_v36 = vpop.xlane.xlu1 %505 }
 0x2a6   : > { %v507_v37 = vsub.f32 %v501_v24, %v506_v36 }
 0x2a8   : > { %v508_v38 = vmul.f32 1.442695, %v507_v37 }
 0x2aa   : > { %996 = vpow2.f32 %v508_v38 }
 0x2ad   : > { %v627_v39 = vpop.xlane.xlu0 %626 }
 0x2ae   : > { %v628_v40 = vsub.f32 %v622_v32, %v627_v39 }
 0x2b0   : > { %v629_v41 = vmul.f32 1.442695, %v628_v40 }
 0x2b2   : > { %998 = vpow2.f32 %v629_v41 }
 0x2b7   : > { %v997_v42 = vpop.eup %996 }
 0x2b8   : > { %v510_v43 = vsel %vm502_vm3, %v997_v42, 0.0 }
 0x2b9   : > { %511 = vadd.xlane.f32.xlu0 %v510_v43 }
 0x2bf   : > { %v999_v44 = vpop.eup %998 }
 0x2c0   : > { %v631_v45 = vsel %vm502_vm3, %v999_v44, 0.0 }
 0x2c1   : > { %632 = vadd.xlane.f32.xlu1 %v631_v45 }
 0x2cf   : > { %516 = vrot.lane.b32.xlu0 %v1117_v12, %s1017_s10 }
 0x2d2   : > { %637 = vrot.lane.b32.xlu1 %v1117_v12, %s1018_s18 }
 0x342   : > { %v512_v48 = vpop.xlane.xlu0 %511 }
 0x343   : > { %1000 = vrcp.f32 %v512_v48 }
 0x346   : > { %v517_v50 = vpop.permute.xlu0 %516 }
 0x347   : > { %v527_v51 = vand.u32 %v525_v49, %v517_v50 }
 0x349   : > { %954 = vmatpush3.bf16.msra.mxu0 %v527_v51 }
 0x34a   : > { %v633_v52 = vpop.xlane.xlu1 %632  ;;  %965 = vmatprep.subr.bf16.mxu0 %v1012_v1 }
 0x34b   : > { %1002 = vrcp.f32 %v633_v52 }
 0x34e   : > { %v638_v54 = vpop.permute.xlu1 %637 }
 0x34f   : > { %v643_v57 = vand.u32 %v638_v54, %v525_v49 }
 0x350   : > { %v1001_v53 = vpop.eup %1000 }
 0x351   : > { %v514_v55 = vmul.f32 %v1001_v53, %v997_v42 }
 0x353   : > { %v515_v56 = vpack.c.bf16 %v514_v55, %v514_v55 }
 0x355   : > { %956 = vmatmul.mubr.msk.bf16.vlgmr.msra.gmra.mxu0 %vm518_vm6, %v515_v56 }
 0x356   : > { %966 = vmatpush3.bf16.msra.mxu0 %v643_v57  ;;  %967 = vmatprep.mubr.msk.bf16.mxu0 %vm1013_vm0, %v1012_v1 }
 0x358   : > { %v1003_v58 = vpop.eup %1002 }
 0x359   : > { %v635_v59 = vmul.f32 %v1003_v58, %v999_v44 }
 0x35b   : > { %v636_v60 = vpack.c.bf16 %v635_v59, %v635_v59 }
 0x35d   : > { %968 = vmatmul.mubr.msk.bf16.vlgmr.msra.gmra.mxu0 %vm518_vm6, %v636_v60 }
 0x415   : > { %v563_v62 = vpop.f32.mrf.mxu0 }
 0x417   : > { %v957_v63 = vpop.f32.mrf.mxu0 }
 0x419   : > { %v566_v0 = vpop.f32.mrf.mxu0 }
 0x41b   : > { %v958_v2 = vpop.f32.mrf.mxu0 }
 0x41d   : > { %v679_v3 = vpop.f32.mrf.mxu0 }
 0x41e   : > { %686 = vrot.lane.b32.xlu1 %v679_v3, %s1020_s21 }
 0x41f   : > { %v969_v4 = vpop.f32.mrf.mxu0 }
 0x421   : > { %v682_v5 = vpop.f32.mrf.mxu0 }
 0x423   : > { %v970_v1 = vpop.f32.mrf.mxu0 }
 0x490   : > { %v687_v7 = vpop.permute.xlu1 %686 }
 0x491   : > { %v689_v8 = vsel %vm452_vm2, %v563_v62, %v687_v7 }
 0x492   : > { %v690_v9 = vpack.c.bf16 %v689_v8, %v689_v8 }
 0x494   : > { %974 = vmatmul.mubr.msk.bf16.vlgmr.msra.gmra.mxu1 %vm404_vm1, %v690_v9 }
 0x554   : > { %v743_v11 = vpop.f32.mrf.mxu1 }
 0x555   : > { %v744_v12 = vadd.f32 %v924_v10, %v743_v11 }
 0x556   : > { %v975_v13 = vpop.f32.mrf.mxu1 }
 0x557   : > { %v749_v14 = vadd.f32 %v744_v12, %v1107_v6 }
 0x558   : > { %v746_v15 = vpop.f32.mrf.mxu1 }
 0x559   : > { %751 = vst.msk [vmem:[%s363_s26] sm:$0x1f] %vm750_vm7, %v749_v14  ;;  %v752_v16 = vsel %vm750_vm7, %v749_v14, 0.0  ;;  %v759_v17 = vmul.f32 %v749_v14, %v749_v14 }
 0x55a   : > { %v753_v18 = vrot.slane %v752_v16, 4  ;;  %v976_v19 = vpop.f32.mrf.mxu1 }
 0x55b   : > { %v760_v20 = vsel %vm750_vm7, %v759_v17, 0.0 }
 0x55c   : > { %v754_v21 = vadd.f32 %v753_v18, %v752_v16  ;;  %v761_v22 = vrot.slane %v760_v20, 4 }
 0x55e   : > { %v755_v23 = vrot.slane %v754_v21, 2  ;;  %v762_v24 = vadd.f32 %v761_v22, %v760_v20 }
 0x560   : > { %v756_v25 = vadd.f32 %v755_v23, %v754_v21  ;;  %v763_v26 = vrot.slane %v762_v24, 2 }
 0x562   : > { %v757_v27 = vrot.slane %v756_v25, 1  ;;  %v764_v28 = vadd.f32 %v763_v26, %v762_v24 }
 0x564   : > { %v765_v29 = vrot.slane %v764_v28, 1  ;;  %v758_v6 = vadd.f32 %v757_v27, %v756_v25 }
 0x566   : > { %v766_v30 = vadd.f32 %v765_v29, %v764_v28 }
 0x568   : > { %v768_v31 = vsel %vm767_vm8, %v758_v6, %v766_v30 }
 0x569   : > { %770 = vst.msk [vmem:[%s373_s29] sm:$0x3] %vm769_vm9, %v768_v31 }
 0x56a PF: > { %s20_s30 = sadd.s32 1, %s1010_s30  }
 0x56b   : > { %p17_p5 = scmp.ge.s32.totalorder %s20_s30, 10  }
 0x56d   :  { %19 = sbr.rel (!%p17_p5) target bundleno = 1 (0x1), region = 107 }

// kernel: _lambda_.10
= control target key start
LH: loop header
LB: loop body
LE: loop exit
PB: predicated region body
PF: predicated region fallthrough
CT: control target
= control target key end

     0   :  { %v496_v0 = vmov 0.0   ;;  %vm497_vm0 = vmmov 0   ;;  %vm69_vm1 = vcmask 130048   ;;  %vm296_vm5 = vcmask 261120   ;;  %s689_s2 = inlined_call_operand.vmem [shape: bf16[16,32], index: 2, kind: input, shape index: {}]   ;;  %s690_s0 = inlined_call_operand.vmem [shape: f32[40,16], index: 0, kind: input, shape index: {}]   ;;  %s691_s1 = inlined_call_operand.vmem [shape: f32[2,16], index: 1, kind: input, shape index: {}]   ;;  %s692_s4 = inlined_call_operand.vmem [shape: bf16[32,16], index: 4, kind: input, shape index: {}]   ;;  %s693_s3 = inlined_call_operand.vmem [shape: f32[1,32], index: 3, kind: input, shape index: {}]   ;;  %s694_s5 = inlined_call_operand.vmem [shape: f32[1,16], index: 5, kind: input, shape index: {}]   ;;  %s695_s6 = inlined_call_operand.vmem [shape: f32[40,16], index: 6, kind: output, shape index: {0}]   ;;  %s696_s7 = inlined_call_operand.vmem [shape: f32[1,2,16], index: 7, kind: output, shape index: {1}]  }
   0x1   :  { %441 = vmatprep.subr.bf16.mxu0 %v496_v0  ;;  %v473_v1 = vld [vmem:[%s689_s2] sm:$0xff]   ;;  %443 = vmatprep.mubr.msk.bf16.mxu0 %vm497_vm0, %v496_v0  ;;  %v27_v3 = vld [vmem:[%s690_s0 + $0x8] sm:$0xff]  ;;  %v28_v8 = vld [vmem:[%s690_s0 + $0x10] sm:$0xff]  ;;  %vm407_vm8 = vcmask 1040384   ;;  %vm409_vm9 = vcmask 123904  }
   0x2   :  { %v26_v2 = vld [vmem:[%s690_s0] sm:$0xff]  ;;  %455 = vmatprep.subr.bf16.mxu1 %v496_v0  ;;  %459 = vmatprep.mubr.msk.bf16.mxu1 %vm497_vm0, %v496_v0  ;;  %v29_v9 = vld [vmem:[%s690_s0 + $0x18] sm:$0xff]  ;;  %v474_v22 = vld [vmem:[%s692_s4 + $0x8] sm:$0xff]  }
   0x3   :  { %v419_v4 = vld [vmem:[%s691_s1] ss:$0 sm:$0xff]  ;;  %442 = vmatpush3.bf16.msra.mxu0 %v473_v1  ;;  %v420_v5 = vld [vmem:[%s691_s1 + $0x1] ss:$0 sm:$0xff]  ;;  %456 = vmatpush3.bf16.msra.mxu1 %v474_v22 }
   0x4   :  { %v37_v6 = vsub.f32 %v26_v2, %v419_v4  ;;  %v38_v7 = vsub.f32 %v27_v3, %v419_v4  ;;  %v39_v12 = vsub.f32 %v28_v8, %v419_v4  ;;  %v40_v13 = vsub.f32 %v29_v9, %v419_v4  ;;  %v30_v17 = vld [vmem:[%s690_s0 + $0x20] sm:$0xff]  ;;  %457 = vmatprep.subr.bf16.mxu1 %v496_v0 }
   0x5   :  { %v41_v19 = vsub.f32 %v30_v17, %v419_v4  ;;  %v475_v23 = vld [vmem:[%s692_s4] sm:$0xff]  }
   0x6   :  { %v565_v10 = vmul.f32 %v420_v5, %v37_v6  ;;  %v567_v11 = vmul.f32 %v420_v5, %v38_v7  ;;  %v572_v15 = vmul.f32 %v420_v5, %v39_v12  ;;  %v574_v16 = vmul.f32 %v420_v5, %v40_v13  ;;  %v421_v24 = vld [vmem:[%s693_s3] ss:$0 sm:$0xff] }
   0x7   :  { %v584_v20 = vmul.f32 %v420_v5, %v41_v19  ;;  %458 = vmatpush3.bf16.msra.mxu1 %v475_v23 }
   0x8   :  { %v51_v14 = vpack.c.bf16 %v567_v11, %v565_v10  ;;  %v52_v18 = vpack.c.bf16 %v574_v16, %v572_v15 }
   0x9   :  { %v53_v21 = vpack.c.bf16 %v584_v20, %v584_v20 }
   0xa   :  { %444 = vmatmul.mubr.msk.bf16.vlgmr.msra.gmra.mxu0 %vm69_vm1, %v51_v14 }
   0xb   :  { %447 = vmatprep.mubr.msk.bf16.mxu0 %vm497_vm0, %v496_v0 }
  0x12   :  { %448 = vmatmul.mubr.msk.bf16.gmra.mxu0 %vm69_vm1, %v52_v18 }
  0x13   :  { %451 = vmatprep.mubr.msk.bf16.mxu0 %vm497_vm0, %v496_v0 }
  0x1a   :  { %452 = vmatmul.mubr.msk.bf16.gmra.mxu0 %vm69_vm1, %v53_v21 }
  0xca   :  { %v113_v25 = vpop.f32.mrf.mxu0 }
  0xcb   :  { %v601_v26 = vadd.f32 %v421_v24, %v113_v25 }
  0xcc   :  { %v445_v27 = vpop.f32.mrf.mxu0 }
  0xcd   :  { %v604_v28 = vmul.f32 0.70710677, %v601_v26 }
  0xce   :  { %v116_v29 = vpop.f32.mrf.mxu0 }
  0xcf   :  { %v145_v30 = vand.u32 2147483647, %v604_v28  ;;  %v607_v31 = vadd.f32 %v421_v24, %v116_v29  ;;  %vm245_vm2 = vcmp.ge.f32.partialorder %v604_v28, 0.0  ;;  %v135_v28 = vmul.f32 0.5, %v601_v26 }
  0xd0   :  { %v446_v32 = vpop.f32.mrf.mxu0 }
  0xd1   :  { %v150_v33 = vmul.f32 0.3275911, %v145_v30  ;;  %v610_v34 = vmul.f32 0.70710677, %v607_v31  ;;  %v215_v50 = vmul.f32 %v145_v30, %v145_v30 }
  0xd2   :  { %v121_v35 = vpop.f32.mrf.mxu0 }
  0xd3   :  { %v155_v36 = vadd.f32 1.0, %v150_v33  ;;  %v146_v37 = vand.u32 2147483647, %v610_v34  ;;  %v613_v38 = vadd.f32 %v421_v24, %v121_v35  ;;  %v220_v58 = vsub.f32 0.0, %v215_v50 }
  0xd4   :  { %v449_v39 = vpop.f32.mrf.mxu0  ;;  %vm246_vm3 = vcmp.ge.f32.partialorder %v610_v34, 0.0 }
  0xd5   :  { %476 = vrcp.f32 %v155_v36  ;;  %v151_v40 = vmul.f32 0.3275911, %v146_v37  ;;  %v616_v41 = vmul.f32 0.70710677, %v613_v38  ;;  %v216_v59 = vmul.f32 %v146_v37, %v146_v37 }
  0xd6   :  { %v124_v42 = vpop.f32.mrf.mxu0  ;;  %v225_v3 = vmul.f32 1.442695, %v220_v58 }
  0xd7   :  { %v156_v43 = vadd.f32 1.0, %v151_v40  ;;  %v618_v44 = vadd.f32 %v421_v24, %v124_v42  ;;  %v147_v45 = vand.u32 2147483647, %v616_v41  ;;  %v221_v4 = vsub.f32 0.0, %v216_v59 }
  0xd8   :  { %v450_v46 = vpop.f32.mrf.mxu0  ;;  %vm247_vm4 = vcmp.ge.f32.partialorder %v616_v41, 0.0 }
  0xd9   :  { %478 = vrcp.f32 %v156_v43  ;;  %v622_v47 = vmul.f32 0.70710677, %v618_v44  ;;  %v152_v48 = vmul.f32 0.3275911, %v147_v45  ;;  %v217_v6 = vmul.f32 %v147_v45, %v147_v45 }
  0xda   :  { %v129_v49 = vpop.f32.mrf.mxu0  ;;  %v227_v14 = vmul.f32 1.442695, %v221_v4  ;;  %v138_v41 = vmul.f32 0.5, %v618_v44  ;;  %v426_v44 = vld [vmem:[%s694_s5] ss:$0 sm:$0xff] }
  0xdb   :  { %v148_v51 = vand.u32 2147483647, %v622_v47  ;;  %v625_v52 = vadd.f32 %v421_v24, %v129_v49  ;;  %v157_v53 = vadd.f32 1.0, %v152_v48  ;;  %v222_v17 = vsub.f32 0.0, %v217_v6 }
  0xdc   :  { %v453_v54 = vpop.f32.mrf.mxu0  ;;  %vm248_vm6 = vcmp.ge.f32.partialorder %v622_v47, 0.0 }
  0xdd   :  { %v153_v55 = vmul.f32 0.3275911, %v148_v51  ;;  %v628_v56 = vmul.f32 0.70710677, %v625_v52  ;;  %480 = vrcp.f32 %v157_v53  ;;  %v218_v9 = vmul.f32 %v148_v51, %v148_v51 }
  0xde   :  { %v132_v57 = vpop.f32.mrf.mxu0  ;;  %v229_v29 = vmul.f32 1.442695, %v222_v17 }
  0xdf   :  { %v158_v60 = vadd.f32 1.0, %v153_v55  ;;  %v149_v61 = vand.u32 2147483647, %v628_v56  ;;  %v223_v21 = vsub.f32 0.0, %v218_v9  ;;  %vm249_vm7 = vcmp.ge.f32.partialorder %v628_v56, 0.0 }
  0xe0   :  { %v454_v62 = vpop.f32.mrf.mxu0 }
  0xe1   :  { %482 = vrcp.f32 %v158_v60  ;;  %v154_v63 = vmul.f32 0.3275911, %v149_v61  ;;  %v219_v22 = vmul.f32 %v149_v61, %v149_v61  ;;  %v231_v36 = vmul.f32 1.442695, %v223_v21 }
  0xe2   :  { %v477_v1 = vpop.eup %476 }
  0xe3   :  { %v170_v2 = vmul.f32 1.0614054, %v477_v1  ;;  %v159_v5 = vadd.f32 1.0, %v154_v63  ;;  %v224_v37 = vsub.f32 0.0, %v219_v22 }
  0xe5   :  { %v175_v7 = vadd.f32 -1.4531521, %v170_v2  ;;  %484 = vrcp.f32 %v159_v5  ;;  %v233_v51 = vmul.f32 1.442695, %v224_v37 }
  0xe6   :  { %v479_v8 = vpop.eup %478  ;;  %486 = vpow2.f32 %v225_v3 }
  0xe7   :  { %v180_v12 = vmul.f32 %v477_v1, %v175_v7  ;;  %v171_v13 = vmul.f32 1.0614054, %v479_v8  ;;  %488 = vpow2.f32 %v227_v14 }
  0xe8   :  { %490 = vpow2.f32 %v229_v29 }
  0xe9   :  { %v185_v18 = vadd.f32 1.4214138, %v180_v12  ;;  %v176_v19 = vadd.f32 -1.4531521, %v171_v13  ;;  %492 = vpow2.f32 %v231_v36 }
  0xea   :  { %v481_v23 = vpop.eup %480  ;;  %494 = vpow2.f32 %v233_v51 }
  0xeb   :  { %v190_v24 = vmul.f32 %v477_v1, %v185_v18  ;;  %v181_v25 = vmul.f32 %v479_v8, %v176_v19  ;;  %v172_v27 = vmul.f32 1.0614054, %v481_v23 }
  0xed   :  { %v195_v30 = vadd.f32 -0.28449672, %v190_v24  ;;  %v186_v32 = vadd.f32 1.4214138, %v181_v25  ;;  %v177_v35 = vadd.f32 -1.4531521, %v172_v27 }
  0xee   :  { %v483_v33 = vpop.eup %482 }
  0xef   :  { %v200_v39 = vmul.f32 %v477_v1, %v195_v30  ;;  %v191_v40 = vmul.f32 %v479_v8, %v186_v32  ;;  %v173_v42 = vmul.f32 1.0614054, %v483_v33  ;;  %v182_v43 = vmul.f32 %v481_v23, %v177_v35 }
  0xf1   :  { %v205_v45 = vadd.f32 0.2548296, %v200_v39  ;;  %v196_v46 = vadd.f32 -0.28449672, %v191_v40  ;;  %v178_v48 = vadd.f32 -1.4531521, %v173_v42 }
  0xf2   :  { %v485_v49 = vpop.eup %484  ;;  %v187_v50 = vadd.f32 1.4214138, %v182_v43  ;;  %v136_v40 = vmul.f32 0.5, %v607_v31 }
  0xf3   :  { %v210_v53 = vmul.f32 %v477_v1, %v205_v45  ;;  %v201_v54 = vmul.f32 %v479_v8, %v196_v46  ;;  %v183_v55 = vmul.f32 %v483_v33, %v178_v48  ;;  %v174_v57 = vmul.f32 1.0614054, %v485_v49  ;;  %v487_v58 = vpop.eup %486 }
  0xf4   :  { %v192_v59 = vmul.f32 %v481_v23, %v187_v50  ;;  %v489_v7 = vpop.eup %488 }
  0xf5   :  { %v235_v60 = vmul.f32 %v487_v58, %v210_v53  ;;  %v206_v61 = vadd.f32 0.2548296, %v201_v54  ;;  %v188_v62 = vadd.f32 1.4214138, %v183_v55  ;;  %v179_v63 = vadd.f32 -1.4531521, %v174_v57  ;;  %v491_v25 = vpop.eup %490 }
  0xf6   :  { %v197_v2 = vadd.f32 -0.28449672, %v192_v59  ;;  %v493_v35 = vpop.eup %492  ;;  %v137_v59 = vmul.f32 0.5, %v613_v38 }
  0xf7   :  { %v240_v3 = vsub.f32 1.0, %v235_v60  ;;  %v211_v4 = vmul.f32 %v479_v8, %v206_v61  ;;  %v193_v5 = vmul.f32 %v483_v33, %v188_v62  ;;  %v184_v6 = vmul.f32 %v485_v49, %v179_v63  ;;  %v495_v51 = vpop.eup %494 }
  0xf8   :  { %v202_v9 = vmul.f32 %v481_v23, %v197_v2 }
  0xf9   :  { %v250_v12 = vsub.f32 0.0, %v240_v3  ;;  %v236_v13 = vmul.f32 %v489_v7, %v211_v4  ;;  %v198_v1 = vadd.f32 -0.28449672, %v193_v5  ;;  %v189_v14 = vadd.f32 1.4214138, %v184_v6 }
  0xfa   :  { %v207_v17 = vadd.f32 0.2548296, %v202_v9 }
  0xfb   :  { %v255_v18 = vsel %vm245_vm2, %v240_v3, %v250_v12  ;;  %v241_v19 = vsub.f32 1.0, %v236_v13  ;;  %v203_v21 = vmul.f32 %v483_v33, %v198_v1  ;;  %v194_v22 = vmul.f32 %v485_v49, %v189_v14 }
  0xfc   :  { %v212_v24 = vmul.f32 %v481_v23, %v207_v17  ;;  %v260_v30 = vadd.f32 1.0, %v255_v18  ;;  %v139_v3 = vmul.f32 0.5, %v625_v52 }
  0xfd   :  { %v251_v27 = vsub.f32 0.0, %v241_v19  ;;  %v208_v29 = vadd.f32 0.2548296, %v203_v21  ;;  %v199_v8 = vadd.f32 -0.28449672, %v194_v22 }
  0xfe   :  { %v237_v32 = vmul.f32 %v491_v25, %v212_v24  ;;  %v265_v46 = vmul.f32 %v260_v30, %v135_v28 }
  0xff   :  { %v256_v36 = vsel %vm246_vm3, %v241_v19, %v251_v27  ;;  %v213_v37 = vmul.f32 %v483_v33, %v208_v29  ;;  %v204_v39 = vmul.f32 %v485_v49, %v199_v8 }
 0x100   :  { %v261_v42 = vadd.f32 1.0, %v256_v36  ;;  %v242_v43 = vsub.f32 1.0, %v237_v32 }
 0x101   :  { %v238_v45 = vmul.f32 %v493_v35, %v213_v37  ;;  %v209_v23 = vadd.f32 0.2548296, %v204_v39 }
 0x102   :  { %v266_v48 = vmul.f32 %v261_v42, %v136_v40  ;;  %v252_v50 = vsub.f32 0.0, %v242_v43 }
 0x103   :  { %v243_v34 = vsub.f32 1.0, %v238_v45  ;;  %v214_v53 = vmul.f32 %v485_v49, %v209_v23 }
 0x104   :  { %v270_v54 = vpack.c.bf16 %v266_v48, %v265_v46  ;;  %v257_v33 = vsel %vm247_vm4, %v242_v43, %v252_v50 }
 0x105   :  { %v253_v55 = vsub.f32 0.0, %v243_v34  ;;  %v239_v57 = vmul.f32 %v495_v51, %v214_v53  ;;  %v262_v26 = vadd.f32 1.0, %v257_v33 }
 0x106   :  { %460 = vmatmul.mubr.msk.bf16.vlgmr.msra.gmra.mxu1 %vm296_vm5, %v270_v54 }
 0x107   :  { %v258_v31 = vsel %vm248_vm6, %v243_v34, %v253_v55  ;;  %v244_v58 = vsub.f32 1.0, %v239_v57  ;;  %463 = vmatprep.mubr.msk.bf16.mxu1 %vm497_vm0, %v496_v0  ;;  %v267_v61 = vmul.f32 %v262_v26, %v137_v59 }
 0x108   :  { %v263_v49 = vadd.f32 1.0, %v258_v31 }
 0x109   :  { %v254_v60 = vsub.f32 0.0, %v244_v58 }
 0x10a   :  { %v268_v62 = vmul.f32 %v263_v49, %v138_v41 }
 0x10b   :  { %v259_v63 = vsel %vm249_vm7, %v244_v58, %v254_v60 }
 0x10c   :  { %v271_v2 = vpack.c.bf16 %v268_v62, %v267_v61  ;;  %v264_v47 = vadd.f32 1.0, %v259_v63 }
 0x10e   :  { %464 = vmatmul.mubr.msk.bf16.gmra.mxu1 %vm296_vm5, %v271_v2  ;;  %v269_v4 = vmul.f32 %v264_v47, %v139_v3 }
 0x10f   :  { %467 = vmatprep.mubr.msk.bf16.mxu1 %vm497_vm0, %v496_v0 }
 0x110   :  { %v272_v38 = vpack.c.bf16 %v269_v4, %v269_v4 }
 0x116   :  { %468 = vmatmul.mubr.msk.bf16.gmra.mxu1 %vm296_vm5, %v272_v38 }
 0x1c6   :  { %v340_v5 = vpop.f32.mrf.mxu1 }
 0x1c7   :  { %v341_v56 = vadd.f32 %v426_v44, %v340_v5 }
 0x1c8   :  { %v461_v6 = vpop.f32.mrf.mxu1 }
 0x1c9   :  { %v362_v7 = vadd.f32 %v341_v56, %v565_v10 }
 0x1ca   :  { %v343_v9 = vpop.f32.mrf.mxu1 }
 0x1cb   :  { %367 = vst.msk [vmem:[%s695_s6] sm:$0xff] %vm69_vm1, %v362_v7  ;;  %v344_v0 = vadd.f32 %v426_v44, %v343_v9  ;;  %v387_v18 = vmul.f32 %v362_v7, %v362_v7  ;;  %v372_v25 = vsel %vm69_vm1, %v362_v7, 0.0 }
 0x1cc   :  { %v462_v52 = vpop.f32.mrf.mxu1 }
 0x1cd   :  { %v363_v12 = vadd.f32 %v344_v0, %v567_v11  ;;  %v392_v8 = vsel %vm69_vm1, %v387_v18, 0.0 }
 0x1ce   :  { %v348_v13 = vpop.f32.mrf.mxu1 }
 0x1cf   :  { %368 = vst.msk [vmem:[%s695_s6 + $0x8] sm:$0xff] %vm69_vm1, %v363_v12  ;;  %v349_v1 = vadd.f32 %v426_v44, %v348_v13  ;;  %v388_v17 = vmul.f32 %v363_v12, %v363_v12  ;;  %v373_v21 = vsel %vm69_vm1, %v363_v12, 0.0 }
 0x1d0   :  { %v465_v14 = vpop.f32.mrf.mxu1  ;;  %v374_v30 = vadd.f32 %v373_v21, %v372_v25 }
 0x1d1   :  { %v364_v10 = vadd.f32 %v349_v1, %v572_v15  ;;  %v393_v27 = vsel %vm69_vm1, %v388_v17, 0.0 }
 0x1d2   :  { %v351_v19 = vpop.f32.mrf.mxu1  ;;  %v394_v28 = vadd.f32 %v393_v27, %v392_v8 }
 0x1d3   :  { %369 = vst.msk [vmem:[%s695_s6 + $0x10] sm:$0xff] %vm69_vm1, %v364_v10  ;;  %v389_v11 = vmul.f32 %v364_v10, %v364_v10  ;;  %v352_v22 = vadd.f32 %v426_v44, %v351_v19  ;;  %v375_v29 = vsel %vm69_vm1, %v364_v10, 0.0 }
 0x1d4   :  { %v466_v24 = vpop.f32.mrf.mxu1  ;;  %v376_v40 = vadd.f32 %v375_v29, %v374_v30 }
 0x1d5   :  { %v365_v15 = vadd.f32 %v352_v22, %v574_v16  ;;  %v395_v35 = vsel %vm69_vm1, %v389_v11, 0.0 }
 0x1d6   :  { %v356_v32 = vpop.f32.mrf.mxu1  ;;  %v396_v45 = vadd.f32 %v395_v35, %v394_v28 }
 0x1d7   :  { %370 = vst.msk [vmem:[%s695_s6 + $0x18] sm:$0xff] %vm69_vm1, %v365_v15  ;;  %v377_v36 = vsel %vm69_vm1, %v365_v15, 0.0  ;;  %v390_v37 = vmul.f32 %v365_v15, %v365_v15  ;;  %v357_v39 = vadd.f32 %v426_v44, %v356_v32 }
 0x1d8   :  { %v469_v42 = vpop.f32.mrf.mxu1  ;;  %v378_v23 = vadd.f32 %v377_v36, %v376_v40 }
 0x1d9   :  { %v397_v16 = vsel %vm69_vm1, %v390_v37, 0.0  ;;  %v366_v43 = vadd.f32 %v357_v39, %v584_v20 }
 0x1da   :  { %v359_v46 = vpop.f32.mrf.mxu1  ;;  %v398_v51 = vadd.f32 %v397_v16, %v396_v45 }
 0x1db   :  { %371 = vst.msk [vmem:[%s695_s6 + $0x20] sm:$0xff] %vm69_vm1, %v366_v43  ;;  %v379_v48 = vsel %vm69_vm1, %v366_v43, 0.0  ;;  %v391_v50 = vmul.f32 %v366_v43, %v366_v43 }
 0x1dc   :  { %v380_v34 = vadd.f32 %v379_v48, %v378_v23  ;;  %v470_v53 = vpop.f32.mrf.mxu1 }
 0x1dd   :  { %v399_v54 = vsel %vm69_vm1, %v391_v50, 0.0 }
 0x1de   :  { %v381_v33 = vrot.slane %v380_v34, 4  ;;  %v400_v55 = vadd.f32 %v399_v54, %v398_v51 }
 0x1e0   :  { %v382_v57 = vadd.f32 %v381_v33, %v380_v34  ;;  %v401_v20 = vrot.slane %v400_v55, 4 }
 0x1e2   :  { %v383_v26 = vrot.slane %v382_v57, 2  ;;  %v402_v31 = vadd.f32 %v401_v20, %v400_v55 }
 0x1e4   :  { %v384_v58 = vadd.f32 %v383_v26, %v382_v57  ;;  %v403_v59 = vrot.slane %v402_v31, 2 }
 0x1e6   :  { %v385_v41 = vrot.slane %v384_v58, 1  ;;  %v404_v49 = vadd.f32 %v403_v59, %v402_v31 }
 0x1e8   :  { %v405_v60 = vrot.slane %v404_v49, 1  ;;  %v386_v61 = vadd.f32 %v385_v41, %v384_v58 }
 0x1ea   :  { %v406_v62 = vadd.f32 %v405_v60, %v404_v49 }
 0x1ec   :  { %v408_v63 = vsel %vm407_vm8, %v386_v61, %v406_v62 }
 0x1ed   :  { %410 = vst.msk [vmem:[%s696_s7] sm:$0x3] %vm409_vm9, %v408_v63 }

// kernel: _lambda_.11
= control target key start
LH: loop header
LB: loop body
LE: loop exit
PB: predicated region body
PF: predicated region fallthrough
CT: control target
= control target key end

     0   :  { %15 = vsyncpa [#allocation3], 0  ;;  %s1372_s0 = inlined_call_operand.vmem [shape: f32[8,5,16], index: 0, kind: input, shape index: {}]   ;;  %s1373_s1 = inlined_call_operand.vmem [shape: f32[2,16], index: 1, kind: input, shape index: {}]   ;;  %s1374_s2 = inlined_call_operand.vmem [shape: f32[16,5,5], index: 2, kind: input, shape index: {}]   ;;  %s1375_s3 = inlined_call_operand.vmem [shape: bf16[16,48], index: 3, kind: input, shape index: {}]   ;;  %s1376_s4 = inlined_call_operand.vmem [shape: f32[1,48], index: 4, kind: input, shape index: {}]   ;;  %s1377_s5 = inlined_call_operand.vmem [shape: bf16[16,16], index: 5, kind: input, shape index: {}]   ;;  %s1378_s6 = inlined_call_operand.vmem [shape: f32[1,16], index: 6, kind: input, shape index: {}]   ;;  %s1379_s7 = inlined_call_operand.vmem [shape: f32[8,5,16], index: 7, kind: output, shape index: {0}]   ;;  %s1380_s8 = inlined_call_operand.hbm [shape: f32[16,5,5], index: 8, kind: output, shape index: {1}]   ;;  %s1381_s9 = inlined_call_operand.vmem [shape: f32[8,2,16], index: 9, kind: output, shape index: {2}]  }
   0x1   :  { %17 = vsyncpa [#allocation3 + $0x1], 0  ;;  %s1179_s30 = smov 0   ;;  %s1181_s10 = smov 0  }
   0x2   :  { %s1183_s11 = smov 0   ;;  %s1185_s12 = smov 0  }
   0x3 LB: > { %s1200_s13 = sadd.s32 4294967295, %s1116_s12   ;;  %s919_s14 = sadd.s32 4294967294, %s1116_s12   ;;  %s1116_s12 = sphi %s1185_s12, %s1391_s12   ;;  %s1112_s11 = sphi %s1183_s11, %s1390_s11   ;;  %s1108_s10 = sphi %s1181_s10, %s1389_s10   ;;  %s1104_s30 = sphi %s1179_s30, %s1388_s30  }
   0x4   : > { %s1204_s15 = sadd.s32 1, %s1116_s12   ;;  %s213_s16 = sadd.s32 1, %s1112_s11 }
   0x5   : > { %s210_s17 = ssub.s32 %s1116_s12, %s1204_s15  ;;  %p223_p0 = scmp.ne.s32.totalorder %s1112_s11, %s1108_s10 }
   0x6   : > { %p211_p1 = scmp.eq.s32.totalorder %s210_s17, 0  ;;  %p224_p2 = scmp.eq.s32.totalorder %s1200_s13, 7 }
   0x7   : > { %p229_p3 = scmp.ne.s32.totalorder %s1108_s10, %s1104_s30  ;;  %p230_p4 = scmp.eq.s32.totalorder %s919_s14, 7 }
   0x8   : > { %s1215_s18 = scalar_select %p211_p1, %s1112_s11, %s213_s16  }
   0x9   : > { %p1217_p5 = por %p224_p2, %p223_p0  ;;  %p1221_p6 = por %p230_p4, %p229_p3 }
   0xa   : > { %p922_p7 = scmp.ge.s32.totalorder %s1116_s12, 1  ;;  %p305_p8 = scmp.lt.s32.totalorder %s1116_s12, 9 }
   0xc   : > { %p306_p9 = pnand %p922_p7, %p305_p8 }
   0xd   : > { %p353_p10 = scmp.lt.s32.totalorder (!%p306_p9), %s1200_s13, 7  ;;  %s1120_s22 = smov (!%p306_p9), 120  }
   0xe   : > { %309 = sbr.rel (%p306_p9) target bundleno = 1394 (0x572), region = 48  ;;  %s1121_s25 = smov (!%p306_p9), 112  }
   0xf   : > { %s1122_s26 = smov (!%p306_p9), 104   ;;  %s925_s27 = sshll.u32 (!%p306_p9), %s1200_s13, 1 }
  0x10   : > { %p358_p11 = scmp.lt.s32.totalorder (!%p306_p9), %s925_s27, 15  ;;  %s1383_s14 = smov (!%p306_p9), 8  }
  0x13   : > { %v1046_v0 = vld [vmem:[%s1375_s3] sm:$0xff]   ;;  %v1118_v1 = vmov 0.0   ;;  %vm1119_vm0 = vmmov 0   ;;  %s1236_s23 = scalar_select %p353_p10, %s1200_s13, 7  ;;  %vm402_vm1 = vcmask 130048   ;;  %vm450_vm2 = vcmask 64512  }
  0x14   : > { %961 = vmatprep.subr.bf16.mxu0 %v1118_v1  ;;  %967 = vmatprep.subr.bf16.mxu1 %v1118_v1  ;;  %v929_v2 = vld [vmem:[%s1373_s1] ss:$0 sm:$0xff]  ;;  %v930_v4 = vld [vmem:[%s1373_s1 + $0x1] ss:$0 sm:$0xff]  ;;  %s1393_s27 = smov (!%p358_p11, %s925_s27), 15  ;;  %vm500_vm3 = vcmask 36864  }
  0x15   : > { %962 = vmatpush3.bf16.msra.mxu0 %v1046_v0  ;;  %963 = vmatprep.mubr.msk.bf16.mxu0 %vm1119_vm0, %v1118_v1  ;;  %s1382_s24 = sshll.u32 %s1236_s23, 3  ;;  %v931_v8 = vld [vmem:[%s1376_s4] ss:$0 sm:$0xff]  ;;  %s926_s28 = sshll.u32 %s1393_s27, 3  ;;  %vm520_vm4 = vcmask 1041408   ;;  %vm521_vm5 = vcmask 1042432  }
  0x16   : > { %969 = vmatprep.mubr.msk.bf16.mxu1 %vm1119_vm0, %v1118_v1  ;;  %973 = vmatprep.subr.bf16.mxu0 %v1118_v1  ;;  %s356_s29 = scalar_lea.vmem %s1372_s0, %s1382_s24  ;;  %s361_s17 = scalar_lea.vmem %s1374_s2, %s926_s28  ;;  %v1125_v46 = vmov 65535   ;;  %vm516_vm6 = vcmask 39936   ;;  %v1047_v61 = vld [vmem:[%s1377_s5] sm:$0xff]  }
  0x17   : > { %v373_v3 = vld [vmem:[%s356_s29] sm:$0x1f]  ;;  %s344_s29 = sand.u32 1, %s1108_s10   ;;  %v937_v29 = vld [vmem:[%s361_s17 + $0x8] sm:$0x1f]  ;;  %v522_v47 = vsel %vm520_vm4, 4294967295, %v1125_v46 }
  0x18   : > { %v380_v5 = vsub.f32 %v373_v3, %v929_v2  ;;  %s923_s21 = sshll.u32 %s344_s29, 4  ;;  %v498_v21 = vld [vmem:[%s361_s17] sm:$0x1f]  ;;  %v523_v49 = vsel %vm521_vm5, %v522_v47, 0  ;;  %s948_s17 = sshll.u32 %s1200_s13, 8 }
  0x19   : > { %s1318_s27 = scalar_lea.sflag [#allocation3], %s344_s29 }
  0x1a   : > { %v1253_v6 = vmul.f32 %v930_v4, %v380_v5 }
  0x1c   : > { %v386_v7 = vpack.c.bf16 %v1253_v6, %v1253_v6 }
  0x1e   : > { %964 = vmatmul.mubr.msk.bf16.vlgmr.msra.gmra.mxu0 %vm402_vm1, %v386_v7 }
  0x1f   : > { %975 = vmatprep.mubr.msk.bf16.mxu0 %vm1119_vm0, %v1118_v1 }
  0xde   : > { %v440_v9 = vpop.f32.mrf.mxu0 }
  0xdf   : > { %v441_v10 = vadd.f32 %v931_v8, %v440_v9 }
  0xe0   : > { %v965_v11 = vpop.f32.mrf.mxu0 }
  0xe1   : > { %v1263_v12 = vpack.c.bf16 %v441_v10, %v441_v10 }
  0xe2   : > { %v443_v13 = vpop.f32.mrf.mxu0 }
  0xe3   : > { %567 = vrot.lane.b32.xlu1 %v1263_v12, %s1120_s22  ;;  %448 = vrot.lane.b32.xlu0 %v1263_v12, %s1121_s25  ;;  %s1286_s22 = scalar_lea.vmem [#allocation2], %s923_s21  ;;  %s1123_s25 = smov 96  }
  0xe4   : > { %v966_v14 = vpop.f32.mrf.mxu0  ;;  %s794_s16 = sshll.u32 %s1286_s22, 4  ;;  %s1314_s16 = int_to_ptr.vmem [resolvable:$true] %s794_s16 }
  0xe5   : > { %s1056_s28 = scalar_lea.vmem %s1314_s16, 256 }
  0xe6   : > { %p1057_p12 = scmp.ne.s32.totalorder %s1314_s16, %s1056_s28 }
  0xe7   : > { %569 = vrot.lane.b32.xlu0 %v1263_v12, %s1122_s26  ;;  %s1124_s26 = smov 88  }
  0xe8   : > { %p1058_p13 = pnand %p1057_p12, %p1217_p5 }
  0xea   : > { %p1059_p0 = pneg %p1058_p13 }
 0x155   : > { %v449_v15 = vpop.permute.xlu0 %448  ;;  %v568_v19 = vpop.permute.xlu1 %567 }
 0x156   : > { %v455_v16 = vsel %vm450_vm2, %v449_v15, 0 }
 0x157   : > { %968 = vmatpush3.bf16.xpose.msra.mxu1 %v455_v16 }
 0x158   : > { %979 = vmatprep.subr.bf16.mxu1 %v1118_v1 }
 0x159   : > { %v570_v17 = vpop.permute.xlu0 %569 }
 0x15a   : > { %v575_v18 = vsel %vm450_vm2, %v570_v17, 0 }
 0x15e   : > { %970 = vmatmul.mubr.msk.bf16.vlgmr.msra.gmra.mxu1 %vm450_vm2, %v1263_v12 }
 0x15f   : > { %980 = vmatpush3.bf16.xpose.msra.mxu1 %v575_v18  ;;  %981 = vmatprep.mubr.msk.bf16.mxu1 %vm1119_vm0, %v1118_v1 }
 0x160   : > { %991 = vmatprep.subr.bf16.mxu1 %v1118_v1 }
 0x166   : > { %982 = vmatmul.mubr.msk.bf16.vlgmr.msra.gmra.mxu1 %vm450_vm2, %v568_v19 }
 0x167   : > { %993 = vmatprep.mubr.msk.bf16.mxu1 %vm1119_vm0, %v1118_v1  ;;  %992 = vmatpush3.bf16.msra.mxu1 %v1047_v61 }
 0x21e   : > { %v491_v20 = vpop.f32.mrf.mxu1 }
 0x21f   : > { %v497_v22 = vmul.f32 0.35355338, %v491_v20 }
 0x220   : > { %v971_v23 = vpop.f32.mrf.mxu1 }
 0x221   : > { %v499_v24 = vadd.f32 %v498_v21, %v497_v22 }
 0x222   : > { %v494_v25 = vpop.f32.mrf.mxu1 }
 0x223   : > { %501 = vst.msk [vmem:[%s1286_s22] sm:$0x1f] %vm500_vm3, %v499_v24  ;;  %v502_v26 = vsel %vm500_vm3, %v499_v24, -inf }
 0x224   : > { %503 = vmax.xlane.f32.xlu1 %v502_v26  ;;  %v972_v27 = vpop.f32.mrf.mxu1 }
 0x226   : > { %v611_v28 = vpop.f32.mrf.mxu1 }
 0x227   : > { %v617_v30 = vmul.f32 0.35355338, %v611_v28 }
 0x228   : > { %v983_v31 = vpop.f32.mrf.mxu1 }
 0x229   : > { %v620_v32 = vadd.f32 %v937_v29, %v617_v30 }
 0x22a   : > { %v614_v33 = vpop.f32.mrf.mxu1 }
 0x22b   : > { %938 = vst.msk [vmem:[%s1286_s22 + $0x8] sm:$0x1f] %vm500_vm3, %v620_v32  ;;  %v623_v34 = vsel %vm500_vm3, %v620_v32, -inf  ;;  %s1127_s22 = smov [#allocation2]  }
 0x22c   : > { %624 = vmax.xlane.f32.xlu0 %v623_v34  ;;  %v984_v35 = vpop.f32.mrf.mxu1  ;;  %s1060_s13 = sshll.u32 %s1127_s22, 4  ;;  %s1061_s13 = int_to_ptr.vmem [resolvable:$false] %s1060_s13 }
 0x22d   : > { %s1062_s24 = scalar_lea.vmem %s1061_s13, 512  ;;  %p1063_p1 = scmp.lt.s32.totalorder %s1314_s16, %s1061_s13 }
 0x22e   : > { %p1064_p2 = scmp.lt.s32.totalorder %s1062_s24, %s1056_s28 }
 0x230   : > { %p1065_p3 = por %p1064_p2, %p1063_p1 }
 0x232   : > { %p1066_p4 = pnand %p1065_p3, %p1059_p0 }
 0x2ad   : > { %v504_v36 = vpop.xlane.xlu1 %503 }
 0x2ae   : > { %v505_v37 = vsub.f32 %v499_v24, %v504_v36 }
 0x2b0   : > { %v506_v38 = vmul.f32 1.442695, %v505_v37 }
 0x2b2   : > { %1048 = vpow2.f32 %v506_v38 }
 0x2b5   : > { %v625_v39 = vpop.xlane.xlu0 %624 }
 0x2b6   : > { %v626_v40 = vsub.f32 %v620_v32, %v625_v39 }
 0x2b8   : > { %v627_v41 = vmul.f32 1.442695, %v626_v40 }
 0x2ba   : > { %1050 = vpow2.f32 %v627_v41 }
 0x2bf   : > { %v1049_v42 = vpop.eup %1048 }
 0x2c0   : > { %v508_v43 = vsel %vm500_vm3, %v1049_v42, 0.0 }
 0x2c1   : > { %509 = vadd.xlane.f32.xlu0 %v508_v43 }
 0x2c7   : > { %v1051_v44 = vpop.eup %1050 }
 0x2c8   : > { %v629_v45 = vsel %vm500_vm3, %v1051_v44, 0.0 }
 0x2c9   : > { %630 = vadd.xlane.f32.xlu1 %v629_v45 }
 0x2d7   : > { %514 = vrot.lane.b32.xlu0 %v1263_v12, %s1123_s25 }
 0x2da   : > { %635 = vrot.lane.b32.xlu1 %v1263_v12, %s1124_s26  ;;  %s1312_s26 = scalar_lea.hbm %s1380_s8, %s948_s17 }
 0x34a   : > { %v510_v48 = vpop.xlane.xlu0 %509 }
 0x34b   : > { %1052 = vrcp.f32 %v510_v48 }
 0x34e   : > { %v515_v50 = vpop.permute.xlu0 %514 }
 0x34f   : > { %v525_v51 = vand.u32 %v523_v49, %v515_v50 }
 0x351   : > { %974 = vmatpush3.bf16.msra.mxu0 %v525_v51 }
 0x352   : > { %v631_v52 = vpop.xlane.xlu1 %630  ;;  %985 = vmatprep.subr.bf16.mxu0 %v1118_v1 }
 0x353   : > { %1054 = vrcp.f32 %v631_v52 }
 0x356   : > { %v636_v54 = vpop.permute.xlu1 %635 }
 0x357   : > { %v641_v57 = vand.u32 %v636_v54, %v523_v49 }
 0x358   : > { %v1053_v53 = vpop.eup %1052 }
 0x359   : > { %v512_v55 = vmul.f32 %v1053_v53, %v1049_v42 }
 0x35b   : > { %v513_v56 = vpack.c.bf16 %v512_v55, %v512_v55 }
 0x35d   : > { %976 = vmatmul.mubr.msk.bf16.vlgmr.msra.gmra.mxu0 %vm516_vm6, %v513_v56 }
 0x35e   : > { %986 = vmatpush3.bf16.msra.mxu0 %v641_v57  ;;  %987 = vmatprep.mubr.msk.bf16.mxu0 %vm1119_vm0, %v1118_v1 }
 0x360   : > { %v1055_v58 = vpop.eup %1054 }
 0x361   : > { %v633_v59 = vmul.f32 %v1055_v58, %v1051_v44 }
 0x363   : > { %v634_v60 = vpack.c.bf16 %v633_v59, %v633_v59 }
 0x365   : > { %988 = vmatmul.mubr.msk.bf16.vlgmr.msra.gmra.mxu0 %vm516_vm6, %v634_v60 }
 0x41d   : > { %v561_v62 = vpop.f32.mrf.mxu0 }
 0x41f   : > { %v977_v63 = vpop.f32.mrf.mxu0 }
 0x421   : > { %v564_v0 = vpop.f32.mrf.mxu0 }
 0x423   : > { %v978_v2 = vpop.f32.mrf.mxu0 }
 0x425   : > { %v677_v3 = vpop.f32.mrf.mxu0 }
 0x426   : > { %684 = vrot.lane.b32.xlu1 %v677_v3, %s1383_s14 }
 0x427   : > { %v989_v1 = vpop.f32.mrf.mxu0 }
 0x429   : > { %v680_v4 = vpop.f32.mrf.mxu0 }
 0x42b   : > { %v990_v5 = vpop.f32.mrf.mxu0 }
 0x498   : > { %v685_v7 = vpop.permute.xlu1 %684 }
 0x499   : > { %v687_v8 = vsel %vm450_vm2, %v561_v62, %v685_v7 }
 0x49a   : > { %v688_v9 = vpack.c.bf16 %v687_v8, %v687_v8 }
 0x49c   : > { %994 = vmatmul.mubr.msk.bf16.vlgmr.msra.gmra.mxu1 %vm402_vm1, %v688_v9 }
 0x49d   : > { %1069 = shalt.err (!%p1066_p4)
}
 0x49e   : > { %s1070_s29 = scalar_lea.hbm %s1312_s26, 256  ;;  %s1074_s25 = scalar_lea.hbm %s1380_s8, 2048 }
 0x49f   : > { %p1071_p7 = scmp.ne.s32.totalorder %s1312_s26, %s1070_s29  ;;  %p1075_p10 = scmp.lt.s32.totalorder %s1312_s26, %s1380_s8 }
 0x4a0   : > { %p1076_p11 = scmp.lt.s32.totalorder %s1074_s25, %s1070_s29 }
 0x4a1   : > { %p1072_p8 = pnand %p1071_p7, %p1217_p5 }
 0x4a2   : > { %p1077_p12 = por %p1076_p11, %p1075_p10 }
 0x4a3   : > { %p1073_p9 = pneg %p1072_p8 }
 0x4a5   : > { %p1078_p13 = pnand %p1077_p12, %p1073_p9 }
 0x4a7   : > { %1081 = shalt.err (!%p1078_p13)
}
 0x4a8   : > { %s1128_s24 = smov 128   ;;  %s1386_s28 = smov 8   ;;  %v940_v10 = vld [vmem:[%s1378_s6] ss:$0 sm:$0xff]  ;;  %vm748_vm7 = vcmask 126976   ;;  %vm765_vm8 = vcmask 1040384  }
 0x4a9   : > { %997 = dma.vmem_to_hbm [thread:$0]  (%p1217_p5), %s1314_s16, 256, %s1312_s26, %s1318_s27, %s1128_s24, %s1128_s24, %s1386_s28   ;;  %vm767_vm9 = vcmask 123904  }
 0x4aa   : > { %s1387_s14 = sshll.u32 %s1236_s23, 3  ;;  %s928_s19 = sshll.u32 %s1236_s23, 1 }
 0x4ab   : > { %s366_s25 = scalar_lea.vmem %s1379_s7, %s1387_s14  ;;  %s371_s27 = scalar_lea.vmem %s1381_s9, %s928_s19 }
 0x55c   : > { %v741_v11 = vpop.f32.mrf.mxu1 }
 0x55d   : > { %v742_v12 = vadd.f32 %v940_v10, %v741_v11 }
 0x55e   : > { %v995_v13 = vpop.f32.mrf.mxu1 }
 0x55f   : > { %v747_v14 = vadd.f32 %v742_v12, %v1253_v6 }
 0x560   : > { %v744_v15 = vpop.f32.mrf.mxu1 }
 0x561   : > { %749 = vst.msk [vmem:[%s366_s25] sm:$0x1f] %vm748_vm7, %v747_v14  ;;  %v750_v16 = vsel %vm748_vm7, %v747_v14, 0.0  ;;  %v757_v17 = vmul.f32 %v747_v14, %v747_v14 }
 0x562   : > { %v751_v18 = vrot.slane %v750_v16, 4  ;;  %v996_v19 = vpop.f32.mrf.mxu1 }
 0x563   : > { %v758_v20 = vsel %vm748_vm7, %v757_v17, 0.0 }
 0x564   : > { %v752_v21 = vadd.f32 %v751_v18, %v750_v16  ;;  %v759_v22 = vrot.slane %v758_v20, 4 }
 0x566   : > { %v753_v23 = vrot.slane %v752_v21, 2  ;;  %v760_v24 = vadd.f32 %v759_v22, %v758_v20 }
 0x568   : > { %v754_v25 = vadd.f32 %v753_v23, %v752_v21  ;;  %v761_v26 = vrot.slane %v760_v24, 2 }
 0x56a   : > { %v755_v27 = vrot.slane %v754_v25, 1  ;;  %v762_v28 = vadd.f32 %v761_v26, %v760_v24 }
 0x56c   : > { %v763_v29 = vrot.slane %v762_v28, 1  ;;  %v756_v6 = vadd.f32 %v755_v27, %v754_v25 }
 0x56e   : > { %v764_v30 = vadd.f32 %v763_v29, %v762_v28 }
 0x570   : > { %v766_v31 = vsel %vm765_vm8, %v756_v6, %v764_v30 }
 0x571   : > { %768 = vst.msk [vmem:[%s371_s27] sm:$0x3] %vm767_vm9, %v766_v31 }
 0x572 PF: > { %p1003_p5 = scmp.ge.s32.totalorder %s1116_s12, 2  ;;  %s819_s22 = sand.u32 1, %s1104_s30  }
 0x573   : > { %s820_s23 = scalar_lea.sflag [#allocation3], %s819_s22 }
 0x574   : > { %p1000_p0 = pnand %p1003_p5, %p1221_p6 }
 0x576   : > { %p1001_p1 = pneg %p1000_p0 }
 0x578   : > { %1099 = dma.done.wait (%p1001_p1), %s820_s23, 256  }
 0x579   : > { %1101 = vsyncadd (%p1001_p1), %s820_s23, 4294967040  ;;  %p20_p2 = scmp.ge.s32.totalorder %s1204_s15, 10   ;;  %s1388_s30 = smov %s1108_s10 }
 0x57a   : > { %s1389_s10 = smov %s1112_s11  ;;  %s1390_s11 = smov %s1215_s18 }
 0x57b   : > { %s1391_s12 = smov %s1204_s15  ;;  %22 = sbr.rel (!%p20_p2) target bundleno = 3 (0x3), region = 112 }
 0x580   :  { %832 = vsyncpa [#allocation3], 1 }
 0x581   :  { %834 = vsyncpa [#allocation3 + $0x1], 1 }

// kernel: _lambda_.13
= control target key start
LH: loop header
LB: loop body
LE: loop exit
PB: predicated region body
PF: predicated region fallthrough
CT: control target
= control target key end

     0   :  { %v228_v1 = vmov 0.0   ;;  %vm229_vm0 = vmmov 0   ;;  %v230_v3 = vmov 0   ;;  %s308_s0 = inlined_call_operand.vmem [shape: f32[8,80], index: 0, kind: input, shape index: {}]   ;;  %s309_s1 = inlined_call_operand.vmem [shape: f32[1,80], index: 1, kind: input, shape index: {}]   ;;  %s310_s2 = inlined_call_operand.vmem [shape: f32[1,80], index: 2, kind: input, shape index: {}]   ;;  %s311_s3 = inlined_call_operand.vmem [shape: bf16[80,8], index: 3, kind: input, shape index: {}]   ;;  %s312_s4 = inlined_call_operand.vmem [shape: f32[1,8], index: 4, kind: input, shape index: {}]   ;;  %s313_s5 = inlined_call_operand.vmem [shape: f32[8,1], index: 5, kind: input, shape index: {}]   ;;  %s314_s6 = inlined_call_operand.vmem [shape: f32[8,1], index: 6, kind: input, shape index: {}]   ;;  %s315_s7 = inlined_call_operand.hbm [shape: f32[8,8], index: 7, kind: output, shape index: {}]  }
   0x1   :  { %v201_v0 = vld [vmem:[%s311_s3 + $0x20] sm:$0xff]   ;;  %182 = vmatprep.subr.bf16.mxu0 %v228_v1  ;;  %v202_v2 = vld [vmem:[%s311_s3 + $0x18] sm:$0xff]   ;;  %192 = vmatprep.mubr.msk.bf16.mxu0 %vm229_vm0, %v228_v1  ;;  %v203_v4 = vld [vmem:[%s311_s3 + $0x10] sm:$0xff]  }
   0x2   :  { %183 = vmatpush3.bf16.msra.mxu0 %v201_v0  ;;  %200 = vset.pattern.permute.xlu0 %v230_v3  ;;  %v28_v5 = vld [vmem:[%s308_s0] sm:$0xff] }
   0x3   :  { %184 = vmatprep.subr.bf16.mxu0 %v228_v1  ;;  %v167_v6 = vld [vmem:[%s309_s1] ss:$0 sm:$0xff] }
   0x4   :  { %v137_v7 = vld [vmem:[%s313_s5] sm:$0xff] }
   0x5   :  { %140 = vperm.xlu0 %200, %v137_v7  }
   0x6   :  { %185 = vmatpush3.bf16.msra.mxu0 %v202_v2 }
   0x7   :  { %186 = vmatprep.subr.bf16.mxu0 %v228_v1 }
   0x8   :  { %12 = vsyncpa [#allocation3], 0  ;;  %v144_v8 = vld [vmem:[%s314_s6] sm:$0xff]  ;;  %v36_v9 = vmul.f32 %v167_v6, %v28_v5  ;;  %v204_v10 = vld [vmem:[%s311_s3 + $0x8] sm:$0xff]   ;;  %vm93_vm1 = vcmask 654336   ;;  %vm151_vm2 = vcmask 64512  }
   0x9   :  { %v168_v11 = vld [vmem:[%s310_s2] ss:$0 sm:$0xff]  ;;  %147 = vperm.xlu0 %200, %v144_v8   ;;  %s231_s2 = smov [#allocation2]  }
   0xa   :  { %187 = vmatpush3.bf16.msra.mxu0 %v203_v4  ;;  %v44_v12 = vadd.f32 %v168_v11, %v36_v9  ;;  %v205_v13 = vld [vmem:[%s311_s3] sm:$0xff]   ;;  %s159_s19 = sshll.u32 %s231_s2, 4  ;;  %s160_s19 = int_to_ptr.vmem [resolvable:$true] %s159_s19 }
   0xb   :  { %188 = vmatprep.subr.bf16.mxu0 %v228_v1  ;;  %v169_v16 = vld [vmem:[%s312_s4] ss:$0 sm:$0xff]  ;;  %s206_s3 = scalar_lea.vmem %s160_s19, 128  ;;  %p211_p1 = scmp.lt.s32.totalorder %s160_s19, %s160_s19 }
   0xc   :  { %v45_v14 = vpack.c.bf16 %v44_v12, %v44_v12  ;;  %p207_p0 = scmp.ne.s32.totalorder %s160_s19, %s206_s3  ;;  %p212_p2 = scmp.lt.s32.totalorder %s206_s3, %s206_s3 }
   0xe   :  { %189 = vmatpush3.bf16.msra.mxu0 %v204_v10  ;;  %p213_p3 = por %p212_p2, %p211_p1 }
   0xf   :  { %190 = vmatprep.subr.bf16.mxu0 %v228_v1 }
  0x10   :  { %p214_p4 = pnand %p213_p3, %p207_p0 }
  0x12   :  { %191 = vmatpush3.bf16.msra.mxu0 %v205_v13 }
  0x15   :  { %193 = vmatmul.mubr.msk.bf16.vlgmr.msra.gmra.mxu0 %vm93_vm1, %v45_v14 }
  0x80   :  { %v141_v15 = vpop.permute.xlu0 %140 }
  0x84   :  { %v148_v21 = vpop.permute.xlu0 %147 }
  0xd5   :  { %v131_v17 = vpop.f32.mrf.mxu0 }
  0xd6   :  { %v132_v18 = vadd.f32 %v169_v16, %v131_v17 }
  0xd7   :  { %v194_v19 = vpop.f32.mrf.mxu0 }
  0xd8   :  { %v143_v20 = vmul.f32 %v141_v15, %v132_v18 }
  0xd9   :  { %v134_v22 = vpop.f32.mrf.mxu0 }
  0xda   :  { %v150_v23 = vadd.f32 %v148_v21, %v143_v20 }
  0xdb   :  { %v195_v24 = vpop.f32.mrf.mxu0 }
  0xdc   :  { %152 = vst.msk [vmem:[#allocation2] sm:$0xff] %vm151_vm2, %v150_v23 }
  0xdd   :  { %217 = shalt.err (!%p214_p4)
}
  0xde   :  { %162 = dma.vmem_to_hbm [thread:$0]  %s160_s19, 128, %s315_s7, [#allocation3]  }
  0xdf   :  { %226 = dma.done.wait [#allocation3], 128  }
  0xe0   :  { %227 = vsyncadd [#allocation3], 4294967168 }
  0xe1   :  { %166 = vsyncpa [#allocation3], 1 }

</bundles_post_ra>
